<compile_context>
chip_gen: v6e
topology: v6e:2x2x1
jax: 0.10.0
libtpu: 0.0.40
codegen_flags: <defaults>
</compile_context>

<pallas_src>
import functools

import jax
import jax.numpy as jnp
from jax import lax
from jax.experimental import pallas as pl
from jax.experimental.pallas import tpu as pltpu

EXPANSION = 4
COMPUTE_DTYPE = jnp.bfloat16           # MXU-native; all kernels accumulate in f32
VMEM_LIMIT = 48 * 1024 * 1024          # explicit scoped-VMEM cap (headroom on v7x 64MiB)
VMEM_BUDGET = 40 * 1024 * 1024         # tile-footprint budget used when picking tiles


def _round_up(x, m):
    return ((x + m - 1) // m) * m


def _cdiv(a, b):
    return (a + b - 1) // b


# --------------------------------------------------------------------------------------
# Fused matmul kernels (1x1 convs): o = act(x @ w + b [+ residual | + residual @ ws])
# BN is folded into w (scale) and b (shift); ReLU / residual add live in the epilogue.
# --------------------------------------------------------------------------------------
def _mm_kernel(x_ref, w_ref, b_ref, o_ref, *, relu):
    acc = jnp.dot(x_ref[...], w_ref[...], preferred_element_type=jnp.float32)
    acc = acc + b_ref[...].astype(jnp.float32)
    if relu:
        acc = jnp.maximum(acc, 0.0)
    o_ref[...] = acc.astype(o_ref.dtype)


def _mm_res_kernel(x_ref, w_ref, b_ref, r_ref, o_ref):
    """Identity shortcut: o = relu(x @ w + b + residual)."""
    acc = jnp.dot(x_ref[...], w_ref[...], preferred_element_type=jnp.float32)
    acc = acc + b_ref[...].astype(jnp.float32) + r_ref[...].astype(jnp.float32)
    o_ref[...] = jnp.maximum(acc, 0.0).astype(o_ref.dtype)


def _mm_proj_kernel(x_ref, w_ref, b_ref, r_ref, v_ref, o_ref):
    """Projection shortcut fused in: o = relu(x @ w + r @ v + b)."""
    acc = jnp.dot(x_ref[...], w_ref[...], preferred_element_type=jnp.float32)
    acc = acc + jnp.dot(r_ref[...], v_ref[...], preferred_element_type=jnp.float32)
    acc = acc + b_ref[...].astype(jnp.float32)
    o_ref[...] = jnp.maximum(acc, 0.0).astype(o_ref.dtype)


def _pick_tm(m, per_row_bytes, *, block_m=512):
    """Row tile: multiple of 8 sublanes, double-buffered footprint under the VMEM budget,
    and >= 4 row tiles when there is enough work (2 per TensorCore on v7x megacore)."""
    tm = min(block_m, _round_up(m, 8))

    def halve(t):
        return max(8, _round_up(t // 2, 8))

    while tm > 8 and 2 * tm * per_row_bytes > VMEM_BUDGET:
        tm = halve(tm)
    while tm > 64 and _cdiv(m, tm) < 4:
        tm = halve(tm)
    return tm


def fused_matmul(x, w, b, *, residual=None, res_weight=None, relu=True,
                 out_dtype=None, block_m=512):
    """Tiled (M,K)@(K,N) on the MXU with fused bias (+residual [@ res_weight]) (+relu)."""
    m, k = x.shape
    n = w.shape[1]
    out_dtype = out_dtype if out_dtype is not None else x.dtype
    b = jnp.asarray(b, jnp.float32).reshape(1, n)

    rk = 0 if residual is None else residual.shape[1]
    per_row_bytes = 2 * (k + rk + 2 * n)          # bf16 activation/residual/output rows
    tm = _pick_tm(m, per_row_bytes, block_m=block_m)
    grid = (_cdiv(m, tm),)                        # ragged tail handled by Pallas (M only)

    in_specs = [pl.BlockSpec((tm, k), lambda i: (i, 0)),
                pl.BlockSpec((k, n), lambda i: (0, 0)),   # weights stay VMEM-resident
                pl.BlockSpec((1, n), lambda i: (0, 0))]   # folded-BN bias stays resident
    args = [x, w, b]
    flops = 2 * m * k * n

    if residual is None:
        kernel = functools.partial(_mm_kernel, relu=relu)
    else:
        in_specs.append(pl.BlockSpec((tm, rk), lambda i: (i, 0)))
        args.append(residual)
        if res_weight is None:
            kernel = _mm_res_kernel
        else:
            in_specs.append(pl.BlockSpec((rk, n), lambda i: (0, 0)))
            args.append(res_weight)
            kernel = _mm_proj_kernel
            flops += 2 * m * rk * n

    bytes_accessed = sum(int(a.size) * a.dtype.itemsize for a in args)
    bytes_accessed += m * n * jnp.dtype(out_dtype).itemsize

    return pl.pallas_call(
        kernel,
        out_shape=jax.ShapeDtypeStruct((m, n), out_dtype),
        grid=grid,
        in_specs=in_specs,
        out_specs=pl.BlockSpec((tm, n), lambda i: (i, 0)),
        compiler_params=pltpu.CompilerParams(
            dimension_semantics=("parallel",),    # row tiles shard across TCs on v7x
            vmem_limit_bytes=VMEM_LIMIT),
        cost_estimate=pl.CostEstimate(flops=int(flops), transcendentals=0,
                                      bytes_accessed=int(bytes_accessed)),
    )(*args)


# --------------------------------------------------------------------------------------
# In-kernel 3x3 conv (stride=1, pad=1): 9 accumulated shifted matmuls over a haloed
# per-image VMEM tile. No im2col expansion in HBM.
# --------------------------------------------------------------------------------------
def _conv3x3_kernel(x_ref, w_ref, b_ref, o_ref):
    # x_ref: (1, H+2, W+2, Cin) haloed image; w_ref: (9, Cin, Cout); o_ref: (1, H*W, Cout)
    _, hp, wp, cin = x_ref.shape
    ho, wo = hp - 2, wp - 2
    cout = w_ref.shape[2]
    acc = jnp.zeros((ho * wo, cout), jnp.float32)
    for dy in range(3):                                  # 9 shifted taps, f32 accumulate
        for dx in range(3):
            patch = x_ref[0, dy:dy + ho, dx:dx + wo, :].reshape(ho * wo, cin)
            acc = acc + jnp.dot(patch, w_ref[dy * 3 + dx],
                                preferred_element_type=jnp.float32)
    acc = acc + b_ref[...].astype(jnp.float32)
    o_ref[0] = jnp.maximum(acc, 0.0).astype(o_ref.dtype)


def conv3x3_bn_relu(y1p, w2m, b2, out_dtype):
    """3x3 / pad=1 / stride=1 conv + folded BN + ReLU on spatially pre-padded NHWC input.

    Returns (N, Ho*Wo, Cout). One haloed image per grid step (parallel across images).
    """
    # TODO(synk): row-tile the image (overlapping haloed blocks) for spatial sizes whose
    # full padded image does not fit comfortably in VMEM.
    n, hp, wp, cin = y1p.shape
    ho, wo = hp - 2, wp - 2
    cout = w2m.shape[2]
    b2 = jnp.asarray(b2, jnp.float32).reshape(1, cout)

    flops = 2 * n * ho * wo * 9 * cin * cout
    bytes_accessed = (int(y1p.size) * y1p.dtype.itemsize
                      + int(w2m.size) * w2m.dtype.itemsize
                      + int(b2.size) * 4
                      + n * ho * wo * cout * jnp.dtype(out_dtype).itemsize)

    return pl.pallas_call(
        _conv3x3_kernel,
        out_shape=jax.ShapeDtypeStruct((n, ho * wo, cout), out_dtype),
        grid=(n,),
        in_specs=[pl.BlockSpec((1, hp, wp, cin), lambda i: (i, 0, 0, 0)),
                  pl.BlockSpec((9, cin, cout), lambda i: (0, 0, 0)),   # resident weights
                  pl.BlockSpec((1, cout), lambda i: (0, 0))],          # resident bias
        out_specs=pl.BlockSpec((1, ho * wo, cout), lambda i: (i, 0, 0)),
        compiler_params=pltpu.CompilerParams(
            dimension_semantics=("parallel",),
            vmem_limit_bytes=VMEM_LIMIT),
        cost_estimate=pl.CostEstimate(flops=int(flops), transcendentals=0,
                                      bytes_accessed=int(bytes_accessed)),
    )(y1p, w2m, b2)


# --------------------------------------------------------------------------------------
# Block assembly
# --------------------------------------------------------------------------------------
def _fold_bn(w_mat, bn, eps=1e-5):
    """Fold inference-mode BatchNorm into conv-as-matmul weights (last axis = Cout)."""
    gamma, beta, mean, var = bn
    s = gamma / jnp.sqrt(var + eps)
    return (w_mat * s).astype(COMPUTE_DTYPE), (beta - s * mean).astype(jnp.float32)


def _im2col_3x3(x_nhwc, stride):
    """3x3/pad=1 patches -> (N*Ho*Wo, 9*C), tap-major / channel-minor (stride>1 fallback)."""
    n, h, w, c = x_nhwc.shape
    ho = (h - 1) // stride + 1
    wo = (w - 1) // stride + 1
    xp = jnp.pad(x_nhwc, ((0, 0), (1, 1), (1, 1), (0, 0)))
    taps = []
    for dy in range(3):
        for dx in range(3):
            taps.append(xp[:, dy:dy + (ho - 1) * stride + 1:stride,
                           dx:dx + (wo - 1) * stride + 1:stride, :])
    cols = jnp.concatenate(taps, axis=-1)
    return cols.reshape(n * ho * wo, 9 * c), (ho, wo)


def resnet_block_forward(x_nchw, params, *, stride=1, eps=1e-5):
    """Pallas forward of the bottleneck ResNetblock (inference-mode BN)."""
    n, c1, h, w = x_nchw.shape
    c2 = params["w1"].shape[0]
    c3 = EXPANSION * c2
    out_dtype = x_nchw.dtype

    # NCHW -> NHWC so channels sit on the lane axis; cast to bf16 for the MXU.
    # TODO(synk): keep the surrounding network NHWC end-to-end to drop these transposes.
    x_nhwc = jnp.transpose(x_nchw, (0, 2, 3, 1)).astype(COMPUTE_DTYPE)
    x_flat = x_nhwc.reshape(n * h * w, c1)

    # ---- conv1 (1x1) + bn1 + relu : one fused matmul pass ----
    w1m, b1 = _fold_bn(params["w1"].reshape(c2, c1).T, params["bn1"], eps)
    y1 = fused_matmul(x_flat, w1m, b1, relu=True, out_dtype=COMPUTE_DTYPE)

    # ---- conv2 (3x3, pad=1) + bn2 + relu ----
    w2m, b2 = _fold_bn(jnp.transpose(params["w2"], (2, 3, 1, 0)).reshape(9, c2, c2),
                       params["bn2"], eps)
    if stride == 1:
        y1p = jnp.pad(y1.reshape(n, h, w, c2), ((0, 0), (1, 1), (1, 1), (0, 0)))
        ho, wo = h, w
        y2 = conv3x3_bn_relu(y1p, w2m, b2, COMPUTE_DTYPE).reshape(n * ho * wo, c2)
    else:
        # TODO(synk): fold the stride into the in-kernel tap slicing; strided 3x3 still
        # falls back to a plain-JAX im2col feeding the fused matmul kernel.
        cols, (ho, wo) = _im2col_3x3(y1.reshape(n, h, w, c2), stride)
        y2 = fused_matmul(cols, w2m.reshape(9 * c2, c2), b2, relu=True,
                          out_dtype=COMPUTE_DTYPE)

    # ---- conv3 (1x1) + bn3 + shortcut add + final relu : one fused pass ----
    w3m, b3 = _fold_bn(params["w3"].reshape(c3, c2).T, params["bn3"], eps)
    if stride != 1 or c1 != c3:
        # Projection shortcut fused into the same kernel: relu(y2@w3 + xs@ws + b3 + bs).
        wsm, bs = _fold_bn(params["ws"].reshape(c3, c1).T, params["bns"], eps)
        xs = x_nhwc[:, ::stride, ::stride, :].reshape(n * ho * wo, c1)
        y3 = fused_matmul(y2, w3m, b3 + bs, residual=xs, res_weight=wsm,
                          out_dtype=out_dtype)
    else:
        y3 = fused_matmul(y2, w3m, b3, residual=x_flat, out_dtype=out_dtype)

    return jnp.transpose(y3.reshape(n, ho, wo, c3), (0, 3, 1, 2))


# --------------------------------------------------------------------------------------
# Pure-JAX reference (lax.conv + inference BN) for correctness checking.
# --------------------------------------------------------------------------------------
def _reference_forward(x, params, *, stride=1, eps=1e-5):
    def conv(x, w, s=1, pad=0):
        return lax.conv_general_dilated(
            x, w, (s, s), [(pad, pad), (pad, pad)],
            dimension_numbers=("NCHW", "OIHW", "NCHW"))

    def bn(x, p):
        gamma, beta, mean, var = p
        s = gamma / jnp.sqrt(var + eps)
        return x * s[None, :, None, None] + (beta - s * mean)[None, :, None, None]

    out = jax.nn.relu(bn(conv(x, params["w1"]), params["bn1"]))
    out = jax.nn.relu(bn(conv(out, params["w2"], s=stride, pad=1), params["bn2"]))
    out = bn(conv(out, params["w3"]), params["bn3"])
    if "ws" in params:
        sc = bn(conv(x, params["ws"], s=stride), params["bns"])
    else:
        sc = x
    return jax.nn.relu(out + sc)


if __name__ == "__main__":
    key = jax.random.PRNGKey(0)
    N, C1, H, W = 2, 4, 16, 16
    C2 = 4
    STRIDE = 1
    C3 = EXPANSION * C2

    keys = jax.random.split(key, 9)

    def bn_params(k, c):
        k1, k2, k3, k4 = jax.random.split(k, 4)
        gamma = 1.0 + 0.1 * jax.random.normal(k1, (c,), jnp.float32)
        beta = 0.1 * jax.random.normal(k2, (c,), jnp.float32)
        mean = 0.1 * jax.random.normal(k3, (c,), jnp.float32)
        var = 0.5 + jax.random.uniform(k4, (c,), jnp.float32)
        return (gamma, beta, mean, var)

    params = {
        "w1": 0.1 * jax.random.normal(keys[0], (C2, C1, 1, 1), jnp.float32),
        "w2": 0.1 * jax.random.normal(keys[1], (C2, C2, 3, 3), jnp.float32),
        "w3": 0.1 * jax.random.normal(keys[2], (C3, C2, 1, 1), jnp.float32),
        "bn1": bn_params(keys[3], C2),
        "bn2": bn_params(keys[4], C2),
        "bn3": bn_params(keys[5], C3),
    }
    if STRIDE != 1 or C1 != C3:   # PyTorch shortcut = conv1x1(stride) + BN
        params["ws"] = 0.1 * jax.random.normal(keys[6], (C3, C1, 1, 1), jnp.float32)
        params["bns"] = bn_params(keys[7], C3)

    x = jax.random.normal(keys[8], (N, C1, H, W), dtype=jnp.float32)

    fwd = jax.jit(lambda xx, pp: resnet_block_forward(xx, pp, stride=STRIDE))
    out = jax.block_until_ready(fwd(x, params))

    ref = _reference_forward(x, params, stride=STRIDE)
    assert out.shape == ref.shape, (out.shape, ref.shape)
    max_err = float(jnp.max(jnp.abs(out - ref)))
    # bf16 activations/weights with f32 accumulation: loosened tolerance vs pure f32.
    assert jnp.allclose(out, ref, atol=3e-2, rtol=3e-2), max_err

    print("KERNEL_OK")
</pallas_src>

<mosaic_0001>
module attributes {stable_mosaic.version = 11 : i64} {
  func.func @_mm_kernel(%arg0: i32, %arg1: memref<128x4xbf16, #tpu.memory_space<vmem>>, %arg2: memref<4x4xbf16, #tpu.memory_space<vmem>>, %arg3: memref<1x4xf32, #tpu.memory_space<vmem>>, %arg4: memref<128x4xbf16, #tpu.memory_space<vmem>>) attributes {dimension_semantics = [#tpu.dimension_semantics<parallel>], iteration_bounds = array<i64: 4>, scalar_prefetch = 0 : i64, scratch_operands = 0 : i64, tpu.core_type = #tpu.core_type<tc>, window_params = [{transform_indices = @transform_0, window_bounds = array<i64: 128, 4>}, {pipeline_mode = #tpu.pipeline_mode<synchronous>, transform_indices = @transform_1, window_bounds = array<i64: 4, 4>}, {pipeline_mode = #tpu.pipeline_mode<synchronous>, transform_indices = @transform_2, window_bounds = array<i64: 1, 4>}, {transform_indices = @transform_3, window_bounds = array<i64: 128, 4>}]} {
    %c0 = arith.constant 0 : index
    %c0_0 = arith.constant 0 : index
    %0 = vector.load %arg1[%c0, %c0_0] : memref<128x4xbf16, #tpu.memory_space<vmem>>, vector<128x4xbf16>
    %c0_1 = arith.constant 0 : index
    %c0_2 = arith.constant 0 : index
    %1 = vector.load %arg2[%c0_1, %c0_2] : memref<4x4xbf16, #tpu.memory_space<vmem>>, vector<4x4xbf16>
    %cst = arith.constant dense<0.000000e+00> : vector<128x4xf32>
    %2 = tpu.matmul %0, %1, %cst {dimension_numbers = #tpu.dot_dimension_numbers<[1], [0], [0], [1], [0, 0, 1, 1], [], []>} : vector<128x4xbf16>, vector<4x4xbf16>, vector<128x4xf32> -> vector<128x4xf32>
    %c0_3 = arith.constant 0 : index
    %c0_4 = arith.constant 0 : index
    %3 = vector.load %arg3[%c0_3, %c0_4] : memref<1x4xf32, #tpu.memory_space<vmem>>, vector<1x4xf32>
    %4 = vector.broadcast %3 : vector<1x4xf32> to vector<128x4xf32>
    %5 = arith.addf %2, %4 : vector<128x4xf32>
    %cst_5 = arith.constant 0.000000e+00 : f32
    %6 = vector.broadcast %cst_5 : f32 to vector<128x4xf32>
    %7 = arith.maximumf %5, %6 : vector<128x4xf32>
    %8 = arith.truncf %7 : vector<128x4xf32> to vector<128x4xbf16>
    %c0_6 = arith.constant 0 : index
    %c0_7 = arith.constant 0 : index
    %9 = vector.load %arg4[%c0_6, %c0_7] : memref<128x4xbf16, #tpu.memory_space<vmem>>, vector<128x4xbf16>
    tpu.vector_store %arg4[%c0_6, %c0_7], %8 {strides = array<i32>} : memref<128x4xbf16, #tpu.memory_space<vmem>>, vector<128x4xbf16>,
    return
  }
  func.func @transform_0(%arg0: i32) -> (i32, i32) {
    %c0_i32 = arith.constant 0 : i32
    %c0_i32_0 = arith.constant 0 : i32
    return %arg0, %c0_i32 : i32, i32
  }
  func.func @transform_1(%arg0: i32) -> (i32, i32) {
    %c0_i32 = arith.constant 0 : i32
    %c0_i32_0 = arith.constant 0 : i32
    %c0_i32_1 = arith.constant 0 : i32
    return %c0_i32, %c0_i32_0 : i32, i32
  }
  func.func @transform_2(%arg0: i32) -> (i32, i32) {
    %c0_i32 = arith.constant 0 : i32
    %c0_i32_0 = arith.constant 0 : i32
    %c0_i32_1 = arith.constant 0 : i32
    return %c0_i32, %c0_i32_0 : i32, i32
  }
  func.func @transform_3(%arg0: i32) -> (i32, i32) {
    %c0_i32 = arith.constant 0 : i32
    %c0_i32_0 = arith.constant 0 : i32
    return %arg0, %c0_i32 : i32, i32
  }
}

module attributes {stable_mosaic.version = 11 : i64} {
  func.func @_conv3x3_kernel(%arg0: i32, %arg1: memref<1x18x18x4xbf16, #tpu.memory_space<vmem>>, %arg2: memref<9x4x4xbf16, #tpu.memory_space<vmem>>, %arg3: memref<1x4xf32, #tpu.memory_space<vmem>>, %arg4: memref<1x256x4xbf16, #tpu.memory_space<vmem>>) attributes {dimension_semantics = [#tpu.dimension_semantics<parallel>], iteration_bounds = array<i64: 2>, scalar_prefetch = 0 : i64, scratch_operands = 0 : i64, tpu.core_type = #tpu.core_type<tc>, window_params = [{transform_indices = @transform_0, window_bounds = array<i64: 1, 18, 18, 4>}, {pipeline_mode = #tpu.pipeline_mode<synchronous>, transform_indices = @transform_1, window_bounds = array<i64: 9, 4, 4>}, {pipeline_mode = #tpu.pipeline_mode<synchronous>, transform_indices = @transform_2, window_bounds = array<i64: 1, 4>}, {transform_indices = @transform_3, window_bounds = array<i64: 1, 256, 4>}]} {
    %cst = arith.constant 0.000000e+00 : f32
    %0 = vector.broadcast %cst : f32 to vector<256x4xf32>
    %c0 = arith.constant 0 : index
    %c0_0 = arith.constant 0 : index
    %c0_1 = arith.constant 0 : index
    %c0_2 = arith.constant 0 : index
    %1 = vector.load %arg1[%c0, %c0_0, %c0_1, %c0_2] : memref<1x18x18x4xbf16, #tpu.memory_space<vmem>>, vector<1x16x16x4xbf16>
    %2 = vector.shape_cast %1 : vector<1x16x16x4xbf16> to vector<16x16x4xbf16>
    %3 = vector.shape_cast %2 : vector<16x16x4xbf16> to vector<256x4xbf16>
    %c0_3 = arith.constant 0 : index
    %c0_4 = arith.constant 0 : index
    %c0_5 = arith.constant 0 : index
    %4 = vector.load %arg2[%c0_3, %c0_4, %c0_5] : memref<9x4x4xbf16, #tpu.memory_space<vmem>>, vector<1x4x4xbf16>
    %5 = vector.shape_cast %4 : vector<1x4x4xbf16> to vector<4x4xbf16>
    %cst_6 = arith.constant dense<0.000000e+00> : vector<256x4xf32>
    %6 = tpu.matmul %3, %5, %cst_6 {dimension_numbers = #tpu.dot_dimension_numbers<[1], [0], [0], [1], [0, 0, 1, 1], [], []>} : vector<256x4xbf16>, vector<4x4xbf16>, vector<256x4xf32> -> vector<256x4xf32>
    %7 = arith.addf %0, %6 : vector<256x4xf32>
    %c0_7 = arith.constant 0 : index
    %c0_8 = arith.constant 0 : index
    %c1 = arith.constant 1 : index
    %c0_9 = arith.constant 0 : index
    %8 = vector.load %arg1[%c0_7, %c0_8, %c1, %c0_9] : memref<1x18x18x4xbf16, #tpu.memory_space<vmem>>, vector<1x16x16x4xbf16>
    %9 = vector.shape_cast %8 : vector<1x16x16x4xbf16> to vector<16x16x4xbf16>
    %10 = vector.shape_cast %9 : vector<16x16x4xbf16> to vector<256x4xbf16>
    %c1_10 = arith.constant 1 : index
    %c0_11 = arith.constant 0 : index
    %c0_12 = arith.constant 0 : index
    %11 = vector.load %arg2[%c1_10, %c0_11, %c0_12] : memref<9x4x4xbf16, #tpu.memory_space<vmem>>, vector<1x4x4xbf16>
    %12 = vector.shape_cast %11 : vector<1x4x4xbf16> to vector<4x4xbf16>
    %cst_13 = arith.constant dense<0.000000e+00> : vector<256x4xf32>
    %13 = tpu.matmul %10, %12, %cst_13 {dimension_numbers = #tpu.dot_dimension_numbers<[1], [0], [0], [1], [0, 0, 1, 1], [], []>} : vector<256x4xbf16>, vector<4x4xbf16>, vector<256x4xf32> -> vector<256x4xf32>
    %14 = arith.addf %7, %13 : vector<256x4xf32>
    %c0_14 = arith.constant 0 : index
    %c0_15 = arith.constant 0 : index
    %c2 = arith.constant 2 : index
    %c0_16 = arith.constant 0 : index
    %15 = vector.load %arg1[%c0_14, %c0_15, %c2, %c0_16] : memref<1x18x18x4xbf16, #tpu.memory_space<vmem>>, vector<1x16x16x4xbf16>
    %16 = vector.shape_cast %15 : vector<1x16x16x4xbf16> to vector<16x16x4xbf16>
    %17 = vector.shape_cast %16 : vector<16x16x4xbf16> to vector<256x4xbf16>
    %c2_17 = arith.constant 2 : index
    %c0_18 = arith.constant 0 : index
    %c0_19 = arith.constant 0 : index
    %18 = vector.load %arg2[%c2_17, %c0_18, %c0_19] : memref<9x4x4xbf16, #tpu.memory_space<vmem>>, vector<1x4x4xbf16>
    %19 = vector.shape_cast %18 : vector<1x4x4xbf16> to vector<4x4xbf16>
    %cst_20 = arith.constant dense<0.000000e+00> : vector<256x4xf32>
    %20 = tpu.matmul %17, %19, %cst_20 {dimension_numbers = #tpu.dot_dimension_numbers<[1], [0], [0], [1], [0, 0, 1, 1], [], []>} : vector<256x4xbf16>, vector<4x4xbf16>, vector<256x4xf32> -> vector<256x4xf32>
    %21 = arith.addf %14, %20 : vector<256x4xf32>
    %c0_21 = arith.constant 0 : index
    %c1_22 = arith.constant 1 : index
    %c0_23 = arith.constant 0 : index
    %c0_24 = arith.constant 0 : index
    %22 = vector.load %arg1[%c0_21, %c1_22, %c0_23, %c0_24] : memref<1x18x18x4xbf16, #tpu.memory_space<vmem>>, vector<1x16x16x4xbf16>
    %23 = vector.shape_cast %22 : vector<1x16x16x4xbf16> to vector<16x16x4xbf16>
    %24 = vector.shape_cast %23 : vector<16x16x4xbf16> to vector<256x4xbf16>
    %c3 = arith.constant 3 : index
    %c0_25 = arith.constant 0 : index
    %c0_26 = arith.constant 0 : index
    %25 = vector.load %arg2[%c3, %c0_25, %c0_26] : memref<9x4x4xbf16, #tpu.memory_space<vmem>>, vector<1x4x4xbf16>
    %26 = vector.shape_cast %25 : vector<1x4x4xbf16> to vector<4x4xbf16>
    %cst_27 = arith.constant dense<0.000000e+00> : vector<256x4xf32>
    %27 = tpu.matmul %24, %26, %cst_27 {dimension_numbers = #tpu.dot_dimension_numbers<[1], [0], [0], [1], [0, 0, 1, 1], [], []>} : vector<256x4xbf16>, vector<4x4xbf16>, vector<256x4xf32> -> vector<256x4xf32>
    %28 = arith.addf %21, %27 : vector<256x4xf32>
    %c0_28 = arith.constant 0 : index
    %c1_29 = arith.constant 1 : index
    %c1_30 = arith.constant 1 : index
    %c0_31 = arith.constant 0 : index
    %29 = vector.load %arg1[%c0_28, %c1_29, %c1_30, %c0_31] : memref<1x18x18x4xbf16, #tpu.memory_space<vmem>>, vector<1x16x16x4xbf16>
    %30 = vector.shape_cast %29 : vector<1x16x16x4xbf16> to vector<16x16x4xbf16>
    %31 = vector.shape_cast %30 : vector<16x16x4xbf16> to vector<256x4xbf16>
    %c4 = arith.constant 4 : index
    %c0_32 = arith.constant 0 : index
    %c0_33 = arith.constant 0 : index
    %32 = vector.load %arg2[%c4, %c0_32, %c0_33] : memref<9x4x4xbf16, #tpu.memory_space<vmem>>, vector<1x4x4xbf16>
    %33 = vector.shape_cast %32 : vector<1x4x4xbf16> to vector<4x4xbf16>
    %cst_34 = arith.constant dense<0.000000e+00> : vector<256x4xf32>
    %34 = tpu.matmul %31, %33, %cst_34 {dimension_numbers = #tpu.dot_dimension_numbers<[1], [0], [0], [1], [0, 0, 1, 1], [], []>} : vector<256x4xbf16>, vector<4x4xbf16>, vector<256x4xf32> -> vector<256x4xf32>
    %35 = arith.addf %28, %34 : vector<256x4xf32>
    %c0_35 = arith.constant 0 : index
    %c1_36 = arith.constant 1 : index
    %c2_37 = arith.constant 2 : index
    %c0_38 = arith.constant 0 : index
    %36 = vector.load %arg1[%c0_35, %c1_36, %c2_37, %c0_38] : memref<1x18x18x4xbf16, #tpu.memory_space<vmem>>, vector<1x16x16x4xbf16>
    %37 = vector.shape_cast %36 : vector<1x16x16x4xbf16> to vector<16x16x4xbf16>
    %38 = vector.shape_cast %37 : vector<16x16x4xbf16> to vector<256x4xbf16>
    %c5 = arith.constant 5 : index
    %c0_39 = arith.constant 0 : index
    %c0_40 = arith.constant 0 : index
    %39 = vector.load %arg2[%c5, %c0_39, %c0_40] : memref<9x4x4xbf16, #tpu.memory_space<vmem>>, vector<1x4x4xbf16>
    %40 = vector.shape_cast %39 : vector<1x4x4xbf16> to vector<4x4xbf16>
    %cst_41 = arith.constant dense<0.000000e+00> : vector<256x4xf32>
    %41 = tpu.matmul %38, %40, %cst_41 {dimension_numbers = #tpu.dot_dimension_numbers<[1], [0], [0], [1], [0, 0, 1, 1], [], []>} : vector<256x4xbf16>, vector<4x4xbf16>, vector<256x4xf32> -> vector<256x4xf32>
    %42 = arith.addf %35, %41 : vector<256x4xf32>
    %c0_42 = arith.constant 0 : index
    %c2_43 = arith.constant 2 : index
    %c0_44 = arith.constant 0 : index
    %c0_45 = arith.constant 0 : index
    %43 = vector.load %arg1[%c0_42, %c2_43, %c0_44, %c0_45] : memref<1x18x18x4xbf16, #tpu.memory_space<vmem>>, vector<1x16x16x4xbf16>
    %44 = vector.shape_cast %43 : vector<1x16x16x4xbf16> to vector<16x16x4xbf16>
    %45 = vector.shape_cast %44 : vector<16x16x4xbf16> to vector<256x4xbf16>
    %c6 = arith.constant 6 : index
    %c0_46 = arith.constant 0 : index
    %c0_47 = arith.constant 0 : index
    %46 = vector.load %arg2[%c6, %c0_46, %c0_47] : memref<9x4x4xbf16, #tpu.memory_space<vmem>>, vector<1x4x4xbf16>
    %47 = vector.shape_cast %46 : vector<1x4x4xbf16> to vector<4x4xbf16>
    %cst_48 = arith.constant dense<0.000000e+00> : vector<256x4xf32>
    %48 = tpu.matmul %45, %47, %cst_48 {dimension_numbers = #tpu.dot_dimension_numbers<[1], [0], [0], [1], [0, 0, 1, 1], [], []>} : vector<256x4xbf16>, vector<4x4xbf16>, vector<256x4xf32> -> vector<256x4xf32>
    %49 = arith.addf %42, %48 : vector<256x4xf32>
    %c0_49 = arith.constant 0 : index
    %c2_50 = arith.constant 2 : index
    %c1_51 = arith.constant 1 : index
    %c0_52 = arith.constant 0 : index
    %50 = vector.load %arg1[%c0_49, %c2_50, %c1_51, %c0_52] : memref<1x18x18x4xbf16, #tpu.memory_space<vmem>>, vector<1x16x16x4xbf16>
    %51 = vector.shape_cast %50 : vector<1x16x16x4xbf16> to vector<16x16x4xbf16>
    %52 = vector.shape_cast %51 : vector<16x16x4xbf16> to vector<256x4xbf16>
    %c7 = arith.constant 7 : index
    %c0_53 = arith.constant 0 : index
    %c0_54 = arith.constant 0 : index
    %53 = vector.load %arg2[%c7, %c0_53, %c0_54] : memref<9x4x4xbf16, #tpu.memory_space<vmem>>, vector<1x4x4xbf16>
    %54 = vector.shape_cast %53 : vector<1x4x4xbf16> to vector<4x4xbf16>
    %cst_55 = arith.constant dense<0.000000e+00> : vector<256x4xf32>
    %55 = tpu.matmul %52, %54, %cst_55 {dimension_numbers = #tpu.dot_dimension_numbers<[1], [0], [0], [1], [0, 0, 1, 1], [], []>} : vector<256x4xbf16>, vector<4x4xbf16>, vector<256x4xf32> -> vector<256x4xf32>
    %56 = arith.addf %49, %55 : vector<256x4xf32>
    %c0_56 = arith.constant 0 : index
    %c2_57 = arith.constant 2 : index
    %c2_58 = arith.constant 2 : index
    %c0_59 = arith.constant 0 : index
    %57 = vector.load %arg1[%c0_56, %c2_57, %c2_58, %c0_59] : memref<1x18x18x4xbf16, #tpu.memory_space<vmem>>, vector<1x16x16x4xbf16>
    %58 = vector.shape_cast %57 : vector<1x16x16x4xbf16> to vector<16x16x4xbf16>
    %59 = vector.shape_cast %58 : vector<16x16x4xbf16> to vector<256x4xbf16>
    %c8 = arith.constant 8 : index
    %c0_60 = arith.constant 0 : index
    %c0_61 = arith.constant 0 : index
    %60 = vector.load %arg2[%c8, %c0_60, %c0_61] : memref<9x4x4xbf16, #tpu.memory_space<vmem>>, vector<1x4x4xbf16>
    %61 = vector.shape_cast %60 : vector<1x4x4xbf16> to vector<4x4xbf16>
    %cst_62 = arith.constant dense<0.000000e+00> : vector<256x4xf32>
    %62 = tpu.matmul %59, %61, %cst_62 {dimension_numbers = #tpu.dot_dimension_numbers<[1], [0], [0], [1], [0, 0, 1, 1], [], []>} : vector<256x4xbf16>, vector<4x4xbf16>, vector<256x4xf32> -> vector<256x4xf32>
    %63 = arith.addf %56, %62 : vector<256x4xf32>
    %c0_63 = arith.constant 0 : index
    %c0_64 = arith.constant 0 : index
    %64 = vector.load %arg3[%c0_63, %c0_64] : memref<1x4xf32, #tpu.memory_space<vmem>>, vector<1x4xf32>
    %65 = vector.broadcast %64 : vector<1x4xf32> to vector<256x4xf32>
    %66 = arith.addf %63, %65 : vector<256x4xf32>
    %cst_65 = arith.constant 0.000000e+00 : f32
    %67 = vector.broadcast %cst_65 : f32 to vector<256x4xf32>
    %68 = arith.maximumf %66, %67 : vector<256x4xf32>
    %69 = arith.truncf %68 : vector<256x4xf32> to vector<256x4xbf16>
    %c0_66 = arith.constant 0 : index
    %c0_67 = arith.constant 0 : index
    %c0_68 = arith.constant 0 : index
    %70 = vector.load %arg4[%c0_66, %c0_67, %c0_68] : memref<1x256x4xbf16, #tpu.memory_space<vmem>>, vector<1x256x4xbf16>
    %71 = vector.shape_cast %70 : vector<1x256x4xbf16> to vector<256x4xbf16>
    %72 = vector.shape_cast %69 : vector<256x4xbf16> to vector<1x256x4xbf16>
    tpu.vector_store %arg4[%c0_66, %c0_67, %c0_68], %72 {strides = array<i32>} : memref<1x256x4xbf16, #tpu.memory_space<vmem>>, vector<1x256x4xbf16>,
    return
  }
  func.func @transform_0(%arg0: i32) -> (i32, i32, i32, i32) {
    %c0_i32 = arith.constant 0 : i32
    %c0_i32_0 = arith.constant 0 : i32
    %c0_i32_1 = arith.constant 0 : i32
    %c0_i32_2 = arith.constant 0 : i32
    return %arg0, %c0_i32, %c0_i32_0, %c0_i32_1 : i32, i32, i32, i32
  }
  func.func @transform_1(%arg0: i32) -> (i32, i32, i32) {
    %c0_i32 = arith.constant 0 : i32
    %c0_i32_0 = arith.constant 0 : i32
    %c0_i32_1 = arith.constant 0 : i32
    %c0_i32_2 = arith.constant 0 : i32
    return %c0_i32, %c0_i32_0, %c0_i32_1 : i32, i32, i32
  }
  func.func @transform_2(%arg0: i32) -> (i32, i32) {
    %c0_i32 = arith.constant 0 : i32
    %c0_i32_0 = arith.constant 0 : i32
    %c0_i32_1 = arith.constant 0 : i32
    return %c0_i32, %c0_i32_0 : i32, i32
  }
  func.func @transform_3(%arg0: i32) -> (i32, i32, i32) {
    %c0_i32 = arith.constant 0 : i32
    %c0_i32_0 = arith.constant 0 : i32
    %c0_i32_1 = arith.constant 0 : i32
    return %arg0, %c0_i32, %c0_i32_0 : i32, i32, i32
  }
}

module attributes {stable_mosaic.version = 11 : i64} {
  func.func @_mm_proj_kernel(%arg0: i32, %arg1: memref<128x4xbf16, #tpu.memory_space<vmem>>, %arg2: memref<4x16xbf16, #tpu.memory_space<vmem>>, %arg3: memref<1x16xf32, #tpu.memory_space<vmem>>, %arg4: memref<128x4xbf16, #tpu.memory_space<vmem>>, %arg5: memref<4x16xbf16, #tpu.memory_space<vmem>>, %arg6: memref<128x16xf32, #tpu.memory_space<vmem>>) attributes {dimension_semantics = [#tpu.dimension_semantics<parallel>], iteration_bounds = array<i64: 4>, scalar_prefetch = 0 : i64, scratch_operands = 0 : i64, tpu.core_type = #tpu.core_type<tc>, window_params = [{transform_indices = @transform_0, window_bounds = array<i64: 128, 4>}, {pipeline_mode = #tpu.pipeline_mode<synchronous>, transform_indices = @transform_1, window_bounds = array<i64: 4, 16>}, {pipeline_mode = #tpu.pipeline_mode<synchronous>, transform_indices = @transform_2, window_bounds = array<i64: 1, 16>}, {transform_indices = @transform_3, window_bounds = array<i64: 128, 4>}, {pipeline_mode = #tpu.pipeline_mode<synchronous>, transform_indices = @transform_4, window_bounds = array<i64: 4, 16>}, {transform_indices = @transform_5, window_bounds = array<i64: 128, 16>}]} {
    %c0 = arith.constant 0 : index
    %c0_0 = arith.constant 0 : index
    %0 = vector.load %arg1[%c0, %c0_0] : memref<128x4xbf16, #tpu.memory_space<vmem>>, vector<128x4xbf16>
    %c0_1 = arith.constant 0 : index
    %c0_2 = arith.constant 0 : index
    %1 = vector.load %arg2[%c0_1, %c0_2] : memref<4x16xbf16, #tpu.memory_space<vmem>>, vector<4x16xbf16>
    %cst = arith.constant dense<0.000000e+00> : vector<128x16xf32>
    %2 = tpu.matmul %0, %1, %cst {dimension_numbers = #tpu.dot_dimension_numbers<[1], [0], [0], [1], [0, 0, 1, 1], [], []>} : vector<128x4xbf16>, vector<4x16xbf16>, vector<128x16xf32> -> vector<128x16xf32>
    %c0_3 = arith.constant 0 : index
    %c0_4 = arith.constant 0 : index
    %3 = vector.load %arg4[%c0_3, %c0_4] : memref<128x4xbf16, #tpu.memory_space<vmem>>, vector<128x4xbf16>
    %c0_5 = arith.constant 0 : index
    %c0_6 = arith.constant 0 : index
    %4 = vector.load %arg5[%c0_5, %c0_6] : memref<4x16xbf16, #tpu.memory_space<vmem>>, vector<4x16xbf16>
    %cst_7 = arith.constant dense<0.000000e+00> : vector<128x16xf32>
    %5 = tpu.matmul %3, %4, %cst_7 {dimension_numbers = #tpu.dot_dimension_numbers<[1], [0], [0], [1], [0, 0, 1, 1], [], []>} : vector<128x4xbf16>, vector<4x16xbf16>, vector<128x16xf32> -> vector<128x16xf32>
    %6 = arith.addf %2, %5 : vector<128x16xf32>
    %c0_8 = arith.constant 0 : index
    %c0_9 = arith.constant 0 : index
    %7 = vector.load %arg3[%c0_8, %c0_9] : memref<1x16xf32, #tpu.memory_space<vmem>>, vector<1x16xf32>
    %8 = vector.broadcast %7 : vector<1x16xf32> to vector<128x16xf32>
    %9 = arith.addf %6, %8 : vector<128x16xf32>
    %cst_10 = arith.constant 0.000000e+00 : f32
    %10 = vector.broadcast %cst_10 : f32 to vector<128x16xf32>
    %11 = arith.maximumf %9, %10 : vector<128x16xf32>
    %c0_11 = arith.constant 0 : index
    %c0_12 = arith.constant 0 : index
    %12 = vector.load %arg6[%c0_11, %c0_12] : memref<128x16xf32, #tpu.memory_space<vmem>>, vector<128x16xf32>
    tpu.vector_store %arg6[%c0_11, %c0_12], %11 {strides = array<i32>} : memref<128x16xf32, #tpu.memory_space<vmem>>, vector<128x16xf32>,
    return
  }
  func.func @transform_0(%arg0: i32) -> (i32, i32) {
    %c0_i32 = arith.constant 0 : i32
    %c0_i32_0 = arith.constant 0 : i32
    return %arg0, %c0_i32 : i32, i32
  }
  func.func @transform_1(%arg0: i32) -> (i32, i32) {
    %c0_i32 = arith.constant 0 : i32
    %c0_i32_0 = arith.constant 0 : i32
    %c0_i32_1 = arith.constant 0 : i32
    return %c0_i32, %c0_i32_0 : i32, i32
  }
  func.func @transform_2(%arg0: i32) -> (i32, i32) {
    %c0_i32 = arith.constant 0 : i32
    %c0_i32_0 = arith.constant 0 : i32
    %c0_i32_1 = arith.constant 0 : i32
    return %c0_i32, %c0_i32_0 : i32, i32
  }
  func.func @transform_3(%arg0: i32) -> (i32, i32) {
    %c0_i32 = arith.constant 0 : i32
    %c0_i32_0 = arith.constant 0 : i32
    return %arg0, %c0_i32 : i32, i32
  }
  func.func @transform_4(%arg0: i32) -> (i32, i32) {
    %c0_i32 = arith.constant 0 : i32
    %c0_i32_0 = arith.constant 0 : i32
    %c0_i32_1 = arith.constant 0 : i32
    return %c0_i32, %c0_i32_0 : i32, i32
  }
  func.func @transform_5(%arg0: i32) -> (i32, i32) {
    %c0_i32 = arith.constant 0 : i32
    %c0_i32_0 = arith.constant 0 : i32
    return %arg0, %c0_i32 : i32, i32
  }
}

</mosaic_0001>

<bundles_post_ra>
// kernel: _lambda_.3
= control target key start
LH: loop header
LB: loop body
LE: loop exit
PB: predicated region body
PF: predicated region fallthrough
CT: control target
= control target key end

     0   :  { %s653_s12 = smov 0   ;;  %s739_s0 = inlined_call_operand.vmem [shape: bf16[512,4], index: 0, kind: input, shape index: {}]   ;;  %s740_s1 = inlined_call_operand.vmem [shape: bf16[4,4], index: 1, kind: input, shape index: {}]   ;;  %s741_s2 = inlined_call_operand.vmem [shape: f32[1,4], index: 2, kind: input, shape index: {}]   ;;  %s742_s3 = inlined_call_operand.vmem [shape: bf16[512,4], index: 3, kind: output, shape index: {}]  }
   0x1 LB: > { %s518_s13 = sadd.s32 4294967295, %s631_s12   ;;  %p522_p0 = scmp.ge.s32.totalorder %s631_s12, 1  ;;  %s631_s12 = sphi %s653_s12, %s13_s12  }
   0x2   : > { %p138_p1 = scmp.lt.s32.totalorder %s631_s12, 5 }
   0x4   : > { %p139_p2 = pnand %p522_p0, %p138_p1 }
   0x5   : > { %s523_s16 = sshll.u32 (!%p139_p2), %s518_s13, 4 }
   0x6   : > { %142 = sbr.rel (%p139_p2) target bundleno = 231 (0xe7), region = 32  ;;  %p163_p3 = scmp.lt.s32.totalorder (!%p139_p2), %s523_s16, 63 }
   0xb   : > { %v191_v0 = vld [vmem:[%s740_s1] sm:$0x3]  ;;  %vm264_vm0 = vcmask 1041408   ;;  %s744_s16 = smov (!%p163_p3, %s523_s16), 63  ;;  %vm239_vm1 = vcmask 31744   ;;  %vm445_vm2 = vcmask 27648  }
   0xc   : > { %607 = vmatprep.subr.msk.bf16.mxu0 %vm264_vm0, %v191_v0  ;;  %608 = vmatprep.subr.msk.bf16.mxu1 %vm264_vm0, %v191_v0  ;;  %v266_v1 = vsel %vm264_vm0, %v191_v0, 0  ;;  %s524_s17 = sshll.u32 %s744_s16, 2  ;;  %v681_v10 = vld [vmem:[%s741_s2] ss:$0 sm:$0xff] }
   0xd   : > { %588 = vmatpush3.bf16.msra.mxu0 %v266_v1  ;;  %606 = vmatpush3.bf16.msra.mxu1 %v266_v1  ;;  %s166_s20 = scalar_lea.vmem %s739_s0, %s524_s17  ;;  %s689_s25 = scalar_lea.vmem %s742_s3, %s524_s17 }
   0xe   : > { %v617_v2 = vld [vmem:[%s166_s20] sm:$0xff]   ;;  %v619_v4 = vld [vmem:[%s166_s20 + $0x8] sm:$0xff]   ;;  %v621_v6 = vld [vmem:[%s166_s20 + $0x10] sm:$0xff]  }
   0xf   : > { %v618_v3 = vld [vmem:[%s166_s20 + $0x20] sm:$0xff]   ;;  %589 = vmatprep.mubr.msk.bf16.mxu0 %vm239_vm1, %v617_v2  ;;  %v620_v5 = vld [vmem:[%s166_s20 + $0x28] sm:$0xff]   ;;  %v622_v7 = vld [vmem:[%s166_s20 + $0x30] sm:$0xff]  }
  0x10   : > { %597 = vmatprep.mubr.msk.bf16.mxu1 %vm239_vm1, %v618_v3  ;;  %590 = vmatmul.mubr.msk.bf16.vlgmr.msra.gmra.mxu0 %vm239_vm1, %v619_v4  ;;  %v623_v8 = vld [vmem:[%s166_s20 + $0x18] sm:$0xff]  }
  0x11   : > { %598 = vmatmul.mubr.msk.bf16.vlgmr.msra.gmra.mxu1 %vm239_vm1, %v620_v5  ;;  %593 = vmatprep.mubr.msk.bf16.mxu0 %vm239_vm1, %v621_v6  ;;  %v624_v9 = vld [vmem:[%s166_s20 + $0x38] sm:$0xff]  }
  0x12   : > { %601 = vmatprep.mubr.msk.bf16.mxu1 %vm239_vm1, %v622_v7 }
  0x18   : > { %594 = vmatmul.mubr.msk.bf16.gmra.mxu0 %vm239_vm1, %v623_v8 }
  0x19   : > { %602 = vmatmul.mubr.msk.bf16.gmra.mxu1 %vm239_vm1, %v624_v9 }
  0xd0   : > { %v591_v11 = vpop.f32.mrf.mxu0 }
  0xd1   : > { %v311_v12 = vadd.f32 %v591_v11, %v681_v10  ;;  %v599_v13 = vpop.f32.mrf.mxu1 }
  0xd2   : > { %v343_v14 = vadd.f32 %v599_v13, %v681_v10  ;;  %v302_v15 = vpop.f32.mrf.mxu0 }
  0xd3   : > { %v367_v16 = vmax.f32 %v311_v12, 0.0  ;;  %v303_v17 = vadd.f32 %v681_v10, %v302_v15  ;;  %v334_v18 = vpop.f32.mrf.mxu1 }
  0xd4   : > { %v375_v19 = vmax.f32 %v343_v14, 0.0  ;;  %v335_v20 = vadd.f32 %v681_v10, %v334_v18  ;;  %v592_v21 = vpop.f32.mrf.mxu0 }
  0xd5   : > { %v564_v22 = vpack.c.bf16 %v367_v16, %v367_v16  ;;  %v365_v23 = vmax.f32 %v303_v17, 0.0  ;;  %v314_v24 = vadd.f32 %v592_v21, %v681_v10  ;;  %v600_v25 = vpop.f32.mrf.mxu1 }
  0xd6   : > { %v572_v26 = vpack.c.bf16 %v375_v19, %v375_v19  ;;  %v373_v27 = vmax.f32 %v335_v20, 0.0  ;;  %v346_v28 = vadd.f32 %v600_v25, %v681_v10  ;;  %v305_v29 = vpop.f32.mrf.mxu0 }
  0xd7   : > { %448 = vst.msk [vmem:[%s689_s25 + $0x8] sm:$0xf] %vm445_vm2, %v564_v22  ;;  %v562_v30 = vpack.c.bf16 %v365_v23, %v365_v23  ;;  %v368_v31 = vmax.f32 %v314_v24, 0.0  ;;  %v306_v32 = vadd.f32 %v681_v10, %v305_v29  ;;  %v337_v33 = vpop.f32.mrf.mxu1 }
  0xd8   : > { %456 = vst.msk [vmem:[%s689_s25 + $0x28] sm:$0xf] %vm445_vm2, %v572_v26  ;;  %v570_v34 = vpack.c.bf16 %v373_v27, %v373_v27  ;;  %v376_v35 = vmax.f32 %v346_v28, 0.0  ;;  %v338_v36 = vadd.f32 %v681_v10, %v337_v33  ;;  %v595_v37 = vpop.f32.mrf.mxu0 }
  0xd9   : > { %446 = vst.msk [vmem:[%s689_s25] sm:$0xf] %vm445_vm2, %v562_v30  ;;  %v565_v38 = vpack.c.bf16 %v368_v31, %v368_v31  ;;  %v366_v39 = vmax.f32 %v306_v32, 0.0  ;;  %v327_v40 = vadd.f32 %v595_v37, %v681_v10  ;;  %v603_v41 = vpop.f32.mrf.mxu1 }
  0xda   : > { %454 = vst.msk [vmem:[%s689_s25 + $0x20] sm:$0xf] %vm445_vm2, %v570_v34  ;;  %v573_v42 = vpack.c.bf16 %v376_v35, %v376_v35  ;;  %v374_v43 = vmax.f32 %v338_v36, 0.0  ;;  %v359_v44 = vadd.f32 %v603_v41, %v681_v10  ;;  %v318_v45 = vpop.f32.mrf.mxu0 }
  0xdb   : > { %449 = vst.msk [vmem:[%s689_s25 + $0xc] sm:$0xf] %vm445_vm2, %v565_v38  ;;  %v563_v46 = vpack.c.bf16 %v366_v39, %v366_v39  ;;  %v371_v47 = vmax.f32 %v327_v40, 0.0  ;;  %v319_v48 = vadd.f32 %v681_v10, %v318_v45  ;;  %v350_v49 = vpop.f32.mrf.mxu1 }
  0xdc   : > { %457 = vst.msk [vmem:[%s689_s25 + $0x2c] sm:$0xf] %vm445_vm2, %v573_v42  ;;  %v571_v50 = vpack.c.bf16 %v374_v43, %v374_v43  ;;  %v379_v51 = vmax.f32 %v359_v44, 0.0  ;;  %v351_v52 = vadd.f32 %v681_v10, %v350_v49  ;;  %v596_v53 = vpop.f32.mrf.mxu0 }
  0xdd   : > { %447 = vst.msk [vmem:[%s689_s25 + $0x4] sm:$0xf] %vm445_vm2, %v563_v46  ;;  %v568_v54 = vpack.c.bf16 %v371_v47, %v371_v47  ;;  %v369_v55 = vmax.f32 %v319_v48, 0.0  ;;  %v330_v56 = vadd.f32 %v596_v53, %v681_v10  ;;  %v604_v57 = vpop.f32.mrf.mxu1 }
  0xde   : > { %455 = vst.msk [vmem:[%s689_s25 + $0x24] sm:$0xf] %vm445_vm2, %v571_v50  ;;  %v576_v58 = vpack.c.bf16 %v379_v51, %v379_v51  ;;  %v377_v59 = vmax.f32 %v351_v52, 0.0  ;;  %v362_v60 = vadd.f32 %v604_v57, %v681_v10  ;;  %v321_v61 = vpop.f32.mrf.mxu0 }
  0xdf   : > { %452 = vst.msk [vmem:[%s689_s25 + $0x18] sm:$0xf] %vm445_vm2, %v568_v54  ;;  %v566_v62 = vpack.c.bf16 %v369_v55, %v369_v55  ;;  %v372_v63 = vmax.f32 %v330_v56, 0.0  ;;  %v322_v0 = vadd.f32 %v681_v10, %v321_v61  ;;  %v353_v1 = vpop.f32.mrf.mxu1 }
  0xe0   : > { %460 = vst.msk [vmem:[%s689_s25 + $0x38] sm:$0xf] %vm445_vm2, %v576_v58  ;;  %v574_v2 = vpack.c.bf16 %v377_v59, %v377_v59  ;;  %v380_v3 = vmax.f32 %v362_v60, 0.0  ;;  %v354_v4 = vadd.f32 %v681_v10, %v353_v1 }
  0xe1   : > { %450 = vst.msk [vmem:[%s689_s25 + $0x10] sm:$0xf] %vm445_vm2, %v566_v62  ;;  %v569_v5 = vpack.c.bf16 %v372_v63, %v372_v63  ;;  %v370_v6 = vmax.f32 %v322_v0, 0.0 }
  0xe2   : > { %458 = vst.msk [vmem:[%s689_s25 + $0x30] sm:$0xf] %vm445_vm2, %v574_v2  ;;  %v577_v7 = vpack.c.bf16 %v380_v3, %v380_v3  ;;  %v378_v8 = vmax.f32 %v354_v4, 0.0 }
  0xe3   : > { %453 = vst.msk [vmem:[%s689_s25 + $0x1c] sm:$0xf] %vm445_vm2, %v569_v5  ;;  %v567_v9 = vpack.c.bf16 %v370_v6, %v370_v6 }
  0xe4   : > { %461 = vst.msk [vmem:[%s689_s25 + $0x3c] sm:$0xf] %vm445_vm2, %v577_v7  ;;  %v575_v11 = vpack.c.bf16 %v378_v8, %v378_v8 }
  0xe5   : > { %451 = vst.msk [vmem:[%s689_s25 + $0x14] sm:$0xf] %vm445_vm2, %v567_v9 }
  0xe6   : > { %459 = vst.msk [vmem:[%s689_s25 + $0x34] sm:$0xf] %vm445_vm2, %v575_v11 }
  0xe7 PF: > { %s13_s12 = sadd.s32 1, %s631_s12  }
  0xe8   : > { %p10_p4 = scmp.ge.s32.totalorder %s13_s12, 6  }
  0xea   :  { %12 = sbr.rel (!%p10_p4) target bundleno = 1 (0x1), region = 62 }

// kernel: _lambda_.5
= control target key start
LH: loop header
LB: loop body
LE: loop exit
PB: predicated region body
PF: predicated region fallthrough
CT: control target
= control target key end

     0   :  { %s903_s18 = smov 0   ;;  %s1024_s0 = inlined_call_operand.vmem [shape: bf16[512,4], index: 0, kind: input, shape index: {}]   ;;  %s1025_s1 = inlined_call_operand.vmem [shape: bf16[4,16], index: 1, kind: input, shape index: {}]   ;;  %s1026_s2 = inlined_call_operand.vmem [shape: f32[1,16], index: 2, kind: input, shape index: {}]   ;;  %s1027_s3 = inlined_call_operand.vmem [shape: bf16[512,4], index: 3, kind: input, shape index: {}]   ;;  %s1028_s4 = inlined_call_operand.vmem [shape: bf16[4,16], index: 4, kind: input, shape index: {}]   ;;  %s1029_s5 = inlined_call_operand.vmem [shape: f32[512,16], index: 5, kind: output, shape index: {}]  }
   0x1 LB: > { %s739_s19 = sadd.s32 4294967295, %s871_s18   ;;  %p743_p0 = scmp.ge.s32.totalorder %s871_s18, 1  ;;  %s871_s18 = sphi %s903_s18, %s15_s18  }
   0x2   : > { %p199_p1 = scmp.lt.s32.totalorder %s871_s18, 5 }
   0x4   : > { %p200_p2 = pnand %p743_p0, %p199_p1 }
   0x5   : > { %s744_s24 = sshll.u32 (!%p200_p2), %s739_s19, 4 }
   0x6   : > { %203 = sbr.rel (%p200_p2) target bundleno = 247 (0xf7), region = 40  ;;  %p233_p3 = scmp.lt.s32.totalorder (!%p200_p2), %s744_s24, 63 }
   0xb   : > { %v284_v0 = vld [vmem:[%s1028_s4] sm:$0x3]  ;;  %vm350_vm0 = vcmask 1041408   ;;  %s1031_s24 = smov (!%p233_p3, %s744_s24), 63  ;;  %vm325_vm1 = vcmask 31744   ;;  %vm654_vm2 = vcmask 130048  }
   0xc   : > { %v267_v1 = vld [vmem:[%s1025_s1] sm:$0x3]  ;;  %839 = vmatprep.subr.msk.bf16.mxu0 %vm350_vm0, %v284_v0  ;;  %v352_v2 = vsel %vm350_vm0, %v284_v0, 0  ;;  %s745_s25 = sshll.u32 %s1031_s24, 2  ;;  %s749_s9 = sshll.u32 %s1031_s24, 3 }
   0xd   : > { %840 = vmatprep.subr.msk.bf16.mxu1 %vm350_vm0, %v267_v1  ;;  %v516_v3 = vsel %vm350_vm0, %v267_v1, 0  ;;  %804 = vmatpush3.bf16.msra.mxu0 %v352_v2  ;;  %s923_s28 = scalar_lea.vmem %s1027_s3, %s745_s25  ;;  %s928_s6 = scalar_lea.vmem %s1024_s0, %s745_s25  ;;  %v965_v22 = vld [vmem:[%s1026_s2] ss:$0 sm:$0xff] }
   0xe   : > { %822 = vmatpush3.bf16.msra.mxu1 %v516_v3  ;;  %v849_v4 = vld [vmem:[%s923_s28] sm:$0xff]   ;;  %v851_v6 = vld [vmem:[%s923_s28 + $0x8] sm:$0xff]   ;;  %v853_v8 = vld [vmem:[%s923_s28 + $0x10] sm:$0xff]   ;;  %s972_s12 = scalar_lea.vmem %s1029_s5, %s749_s9 }
   0xf   : > { %v850_v5 = vld [vmem:[%s928_s6] sm:$0xff]   ;;  %805 = vmatprep.mubr.msk.bf16.mxu0 %vm325_vm1, %v849_v4  ;;  %v852_v7 = vld [vmem:[%s928_s6 + $0x8] sm:$0xff]   ;;  %v854_v9 = vld [vmem:[%s928_s6 + $0x10] sm:$0xff]  }
  0x10   : > { %823 = vmatprep.mubr.msk.bf16.mxu1 %vm325_vm1, %v850_v5  ;;  %806 = vmatmul.mubr.msk.bf16.vlgmr.msra.gmra.mxu0 %vm325_vm1, %v851_v6  ;;  %v855_v10 = vld [vmem:[%s923_s28 + $0x18] sm:$0xff]   ;;  %v857_v12 = vld [vmem:[%s923_s28 + $0x20] sm:$0xff]   ;;  %v859_v14 = vld [vmem:[%s923_s28 + $0x28] sm:$0xff]  }
  0x11   : > { %824 = vmatmul.mubr.msk.bf16.vlgmr.msra.gmra.mxu1 %vm325_vm1, %v852_v7  ;;  %809 = vmatprep.mubr.msk.bf16.mxu0 %vm325_vm1, %v853_v8  ;;  %v856_v11 = vld [vmem:[%s928_s6 + $0x18] sm:$0xff]   ;;  %v858_v13 = vld [vmem:[%s928_s6 + $0x20] sm:$0xff]   ;;  %v860_v15 = vld [vmem:[%s928_s6 + $0x28] sm:$0xff]  }
  0x12   : > { %827 = vmatprep.mubr.msk.bf16.mxu1 %vm325_vm1, %v854_v9  ;;  %v861_v16 = vld [vmem:[%s923_s28 + $0x30] sm:$0xff]   ;;  %v863_v18 = vld [vmem:[%s923_s28 + $0x38] sm:$0xff]  }
  0x13   : > { %v862_v17 = vld [vmem:[%s928_s6 + $0x30] sm:$0xff]   ;;  %v864_v19 = vld [vmem:[%s928_s6 + $0x38] sm:$0xff]  }
  0x18   : > { %810 = vmatmul.mubr.msk.bf16.gmra.mxu0 %vm325_vm1, %v855_v10 }
  0x19   : > { %828 = vmatmul.mubr.msk.bf16.gmra.mxu1 %vm325_vm1, %v856_v11  ;;  %813 = vmatprep.mubr.msk.bf16.mxu0 %vm325_vm1, %v857_v12 }
  0x1a   : > { %831 = vmatprep.mubr.msk.bf16.mxu1 %vm325_vm1, %v858_v13 }
  0x20   : > { %814 = vmatmul.mubr.msk.bf16.gmra.mxu0 %vm325_vm1, %v859_v14 }
  0x21   : > { %832 = vmatmul.mubr.msk.bf16.gmra.mxu1 %vm325_vm1, %v860_v15  ;;  %817 = vmatprep.mubr.msk.bf16.mxu0 %vm325_vm1, %v861_v16 }
  0x22   : > { %835 = vmatprep.mubr.msk.bf16.mxu1 %vm325_vm1, %v862_v17 }
  0x28   : > { %818 = vmatmul.mubr.msk.bf16.gmra.mxu0 %vm325_vm1, %v863_v18 }
  0x29   : > { %836 = vmatmul.mubr.msk.bf16.gmra.mxu1 %vm325_vm1, %v864_v19 }
  0xd0   : > { %v807_v20 = vpop.f32.mrf.mxu0 }
  0xd1   : > { %v825_v21 = vpop.f32.mrf.mxu1 }
  0xd2   : > { %v561_v23 = vadd.f32 %v825_v21, %v807_v20  ;;  %v388_v24 = vpop.f32.mrf.mxu0 }
  0xd3   : > { %v552_v25 = vpop.f32.mrf.mxu1 }
  0xd4   : > { %v624_v26 = vadd.f32 %v965_v22, %v561_v23  ;;  %v553_v27 = vadd.f32 %v552_v25, %v388_v24  ;;  %v808_v28 = vpop.f32.mrf.mxu0 }
  0xd5   : > { %v826_v29 = vpop.f32.mrf.mxu1 }
  0xd6   : > { %v640_v30 = vmax.f32 %v624_v26, 0.0  ;;  %v622_v31 = vadd.f32 %v965_v22, %v553_v27  ;;  %v564_v32 = vadd.f32 %v826_v29, %v808_v28  ;;  %v391_v33 = vpop.f32.mrf.mxu0 }
  0xd7   : > { %v555_v34 = vpop.f32.mrf.mxu1 }
  0xd8   : > { %657 = vst.msk [vmem:[%s972_s12 + $0x10] sm:$0xff] %vm654_vm2, %v640_v30  ;;  %v638_v35 = vmax.f32 %v622_v31, 0.0  ;;  %v625_v36 = vadd.f32 %v965_v22, %v564_v32  ;;  %v556_v37 = vadd.f32 %v555_v34, %v391_v33  ;;  %v811_v38 = vpop.f32.mrf.mxu0 }
  0xd9   : > { %v829_v39 = vpop.f32.mrf.mxu1 }
  0xda   : > { %655 = vst.msk [vmem:[%s972_s12] sm:$0xff] %vm654_vm2, %v638_v35  ;;  %v641_v40 = vmax.f32 %v625_v36, 0.0  ;;  %v623_v41 = vadd.f32 %v965_v22, %v556_v37  ;;  %v577_v42 = vadd.f32 %v829_v39, %v811_v38  ;;  %v404_v43 = vpop.f32.mrf.mxu0 }
  0xdb   : > { %v568_v44 = vpop.f32.mrf.mxu1 }
  0xdc   : > { %658 = vst.msk [vmem:[%s972_s12 + $0x18] sm:$0xff] %vm654_vm2, %v641_v40  ;;  %v639_v45 = vmax.f32 %v623_v41, 0.0  ;;  %v628_v46 = vadd.f32 %v965_v22, %v577_v42  ;;  %v569_v47 = vadd.f32 %v568_v44, %v404_v43  ;;  %v812_v48 = vpop.f32.mrf.mxu0 }
  0xdd   : > { %v830_v49 = vpop.f32.mrf.mxu1 }
  0xde   : > { %656 = vst.msk [vmem:[%s972_s12 + $0x8] sm:$0xff] %vm654_vm2, %v639_v45  ;;  %v644_v50 = vmax.f32 %v628_v46, 0.0  ;;  %v626_v51 = vadd.f32 %v965_v22, %v569_v47  ;;  %v580_v52 = vadd.f32 %v830_v49, %v812_v48  ;;  %v407_v53 = vpop.f32.mrf.mxu0 }
  0xdf   : > { %v571_v54 = vpop.f32.mrf.mxu1 }
  0xe0   : > { %661 = vst.msk [vmem:[%s972_s12 + $0x30] sm:$0xff] %vm654_vm2, %v644_v50  ;;  %v642_v55 = vmax.f32 %v626_v51, 0.0  ;;  %v629_v56 = vadd.f32 %v965_v22, %v580_v52  ;;  %v572_v57 = vadd.f32 %v571_v54, %v407_v53  ;;  %v815_v58 = vpop.f32.mrf.mxu0 }
  0xe1   : > { %v833_v59 = vpop.f32.mrf.mxu1 }
  0xe2   : > { %659 = vst.msk [vmem:[%s972_s12 + $0x20] sm:$0xff] %vm654_vm2, %v642_v55  ;;  %v645_v60 = vmax.f32 %v629_v56, 0.0  ;;  %v627_v61 = vadd.f32 %v965_v22, %v572_v57  ;;  %v593_v62 = vadd.f32 %v833_v59, %v815_v58  ;;  %v420_v63 = vpop.f32.mrf.mxu0 }
  0xe3   : > { %v584_v0 = vpop.f32.mrf.mxu1 }
  0xe4   : > { %662 = vst.msk [vmem:[%s972_s12 + $0x38] sm:$0xff] %vm654_vm2, %v645_v60  ;;  %v643_v1 = vmax.f32 %v627_v61, 0.0  ;;  %v632_v2 = vadd.f32 %v965_v22, %v593_v62  ;;  %v585_v3 = vadd.f32 %v584_v0, %v420_v63  ;;  %v816_v4 = vpop.f32.mrf.mxu0 }
  0xe5   : > { %v834_v5 = vpop.f32.mrf.mxu1 }
  0xe6   : > { %660 = vst.msk [vmem:[%s972_s12 + $0x28] sm:$0xff] %vm654_vm2, %v643_v1  ;;  %v648_v6 = vmax.f32 %v632_v2, 0.0  ;;  %v630_v7 = vadd.f32 %v965_v22, %v585_v3  ;;  %v596_v8 = vadd.f32 %v834_v5, %v816_v4  ;;  %v423_v9 = vpop.f32.mrf.mxu0 }
  0xe7   : > { %v587_v10 = vpop.f32.mrf.mxu1 }
  0xe8   : > { %665 = vst.msk [vmem:[%s972_s12 + $0x50] sm:$0xff] %vm654_vm2, %v648_v6  ;;  %v646_v11 = vmax.f32 %v630_v7, 0.0  ;;  %v633_v12 = vadd.f32 %v965_v22, %v596_v8  ;;  %v588_v13 = vadd.f32 %v587_v10, %v423_v9  ;;  %v819_v14 = vpop.f32.mrf.mxu0 }
  0xe9   : > { %v837_v15 = vpop.f32.mrf.mxu1 }
  0xea   : > { %663 = vst.msk [vmem:[%s972_s12 + $0x40] sm:$0xff] %vm654_vm2, %v646_v11  ;;  %v649_v16 = vmax.f32 %v633_v12, 0.0  ;;  %v631_v17 = vadd.f32 %v965_v22, %v588_v13  ;;  %v609_v18 = vadd.f32 %v837_v15, %v819_v14  ;;  %v436_v19 = vpop.f32.mrf.mxu0 }
  0xeb   : > { %v600_v20 = vpop.f32.mrf.mxu1 }
  0xec   : > { %666 = vst.msk [vmem:[%s972_s12 + $0x58] sm:$0xff] %vm654_vm2, %v649_v16  ;;  %v647_v21 = vmax.f32 %v631_v17, 0.0  ;;  %v636_v23 = vadd.f32 %v965_v22, %v609_v18  ;;  %v601_v24 = vadd.f32 %v600_v20, %v436_v19  ;;  %v820_v25 = vpop.f32.mrf.mxu0 }
  0xed   : > { %v838_v26 = vpop.f32.mrf.mxu1 }
  0xee   : > { %664 = vst.msk [vmem:[%s972_s12 + $0x48] sm:$0xff] %vm654_vm2, %v647_v21  ;;  %v652_v27 = vmax.f32 %v636_v23, 0.0  ;;  %v634_v28 = vadd.f32 %v965_v22, %v601_v24  ;;  %v612_v29 = vadd.f32 %v838_v26, %v820_v25  ;;  %v439_v30 = vpop.f32.mrf.mxu0 }
  0xef   : > { %v603_v31 = vpop.f32.mrf.mxu1 }
  0xf0   : > { %669 = vst.msk [vmem:[%s972_s12 + $0x70] sm:$0xff] %vm654_vm2, %v652_v27  ;;  %v650_v32 = vmax.f32 %v634_v28, 0.0  ;;  %v637_v33 = vadd.f32 %v965_v22, %v612_v29  ;;  %v604_v34 = vadd.f32 %v603_v31, %v439_v30 }
  0xf2   : > { %667 = vst.msk [vmem:[%s972_s12 + $0x60] sm:$0xff] %vm654_vm2, %v650_v32  ;;  %v653_v35 = vmax.f32 %v637_v33, 0.0  ;;  %v635_v36 = vadd.f32 %v965_v22, %v604_v34 }
  0xf4   : > { %670 = vst.msk [vmem:[%s972_s12 + $0x78] sm:$0xff] %vm654_vm2, %v653_v35  ;;  %v651_v37 = vmax.f32 %v635_v36, 0.0 }
  0xf6   : > { %668 = vst.msk [vmem:[%s972_s12 + $0x68] sm:$0xff] %vm654_vm2, %v651_v37 }
  0xf7 PF: > { %s15_s18 = sadd.s32 1, %s871_s18  }
  0xf8   : > { %p12_p4 = scmp.ge.s32.totalorder %s15_s18, 6  }
  0xfa   :  { %14 = sbr.rel (!%p12_p4) target bundleno = 1 (0x1), region = 73 }

// kernel: _lambda_.4
= control target key start
LH: loop header
LB: loop body
LE: loop exit
PB: predicated region body
PF: predicated region fallthrough
CT: control target
= control target key end

     0   :  { %s6188_s12 = smov 0   ;;  %s8865_s0 = inlined_call_operand.vmem [shape: bf16[2,18,18,4], index: 0, kind: input, shape index: {}]   ;;  %s8866_s1 = inlined_call_operand.vmem [shape: bf16[9,4,4], index: 1, kind: input, shape index: {}]   ;;  %s8867_s2 = inlined_call_operand.vmem [shape: f32[1,4], index: 2, kind: input, shape index: {}]   ;;  %s8868_s3 = inlined_call_operand.vmem [shape: bf16[2,256,4], index: 3, kind: output, shape index: {}]  }
   0x1 LB: > { %s5018_s13 = sadd.s32 4294967295, %s6166_s12   ;;  %p5022_p0 = scmp.ge.s32.totalorder %s6166_s12, 1  ;;  %s6166_s12 = sphi %s6188_s12, %s13_s12  }
   0x2   : > { %p137_p1 = scmp.lt.s32.totalorder %s6166_s12, 3 }
   0x4   : > { %p138_p2 = pnand %p5022_p0, %p137_p1 }
   0x6   : > { %141 = sbr.rel (%p138_p2) target bundleno = 558 (0x22e), region = 32 }
   0xb   : > { %v5026_v0 = vld [vmem:[%s8866_s1 + $0x2] sm:$0x3]  ;;  %vm707_vm0 = vcmask 1041408   ;;  %p161_p3 = scmp.lt.s32.totalorder %s5018_s13, 1  ;;  %v204_v2 = vld [vmem:[%s8866_s1] sm:$0x3] }
   0xc   : > { %6092 = vmatprep.subr.msk.bf16.mxu1 %vm707_vm0, %v5026_v0  ;;  %6091 = vmatprep.subr.msk.bf16.mxu0 %vm707_vm0, %v5026_v0  ;;  %v709_v1 = vsel %vm707_vm0, %v5026_v0, 0  ;;  %v5107_v3 = vld [vmem:[%s8866_s1 + $0x4] sm:$0x3]  ;;  %vm221_vm1 = vsmask.f32 3328  ;;  %v6219_v4 = vsel %vm707_vm0, %v204_v2, 0 }
   0xd   : > { %6090 = vmatpush3.bf16.msra.mxu1 %v709_v1  ;;  %5784 = vmatpush3.bf16.msra.mxu0 %v709_v1  ;;  %s9146_s13 = smov (!%p161_p3, %s5018_s13), 1  ;;  %vm222_vm2 = vsmask.f32 7440  ;;  %vm658_vm3 = vcmask 31744   ;;  %v6245_v16 = vsel %vm707_vm0, %v5107_v3, 0  ;;  %vm1212_vm5 = vcmask 1042432  }
   0xe   : > { %6093 = vmatprep.subr.msk.bf16.mxu1 %vm707_vm0, %v204_v2  ;;  %6094 = vmatprep.subr.msk.bf16.mxu0 %vm707_vm0, %v5107_v3  ;;  %s6101_s20 = smul.u32 216, %s9146_s13  ;;  %vm6260_vm4 = vmor %vm221_vm1, %vm222_vm2  ;;  %vm1213_vm6 = vcmask 1046532   ;;  %s5597_s11 = sshll.u32 %s9146_s13, 7  ;;  %vm4930_vm8 = vcmask 27648  }
   0xf   : > { %vm6546_vm7 = vmor %vm1212_vm5, %vm1213_vm6  ;;  %s8692_s15 = scalar_lea.vmem %s8868_s3, %s5597_s11 }
  0x10   : > { %s6216_s23 = scalar_lea.vmem %s8865_s0, %s6101_s20 }
  0x11   : > { %v6222_v5 = vld [vmem:[%s6216_s23] sm:$0xf]  ;;  %v6225_v6 = vld [vmem:[%s6216_s23 + $0x4] sm:$0xf]  ;;  %v6228_v7 = vld [vmem:[%s6216_s23 + $0x8] sm:$0x1] }
  0x12   : > { %v225_v8 = vshrl.u32 %v6222_v5, 16  ;;  %v228_v9 = vshll.u32 %v6222_v5, 16  ;;  %v234_v10 = vshll.u32 %v6225_v6, 16  ;;  %v238_v11 = vshrl.u32 %v6225_v6, 16  ;;  %v6235_v12 = vld [vmem:[%s6216_s23 + $0x60] sm:$0xf] }
  0x13   : > { %v244_v13 = vshll.u32 %v6228_v7, 16  ;;  %v6239_v14 = vld [vmem:[%s6216_s23 + $0x64] sm:$0xf]  ;;  %v6242_v15 = vld [vmem:[%s6216_s23 + $0x68] sm:$0x1]  ;;  %v417_v22 = vshrl.u32 %v6235_v12, 16 }
  0x14   : > { %v227_v17 = vrot.slane %v225_v8, 4  ;;  %v230_v18 = vrot.slane %v228_v9, 5  ;;  %v236_v19 = vrot.slane %v234_v10, 5  ;;  %v240_v20 = vrot.slane %v238_v11, 4  ;;  %v6253_v29 = vld [vmem:[%s6216_s23 + $0xc] sm:$0xf] }
  0x15   : > { %v246_v21 = vrot.slane %v244_v13, 5  ;;  %v420_v23 = vshll.u32 %v6235_v12, 16  ;;  %v426_v24 = vshll.u32 %v6239_v14, 16  ;;  %v430_v27 = vshrl.u32 %v6239_v14, 16  ;;  %v6256_v30 = vld [vmem:[%s6216_s23 + $0x10] sm:$0xf] }
  0x16   : > { %v231_v25 = vor.u32 %v230_v18, %v227_v17  ;;  %v241_v26 = vor.u32 %v240_v20, %v236_v19  ;;  %v436_v28 = vshll.u32 %v6242_v15, 16  ;;  %v419_v33 = vrot.slane %v417_v22, 4  ;;  %v6266_v41 = vld [vmem:[%s6216_s23 + $0x14] sm:$0x1]  ;;  %v6277_v53 = vld [vmem:[%s6216_s23 + $0x6c] sm:$0xf] }
  0x17   : > { %v422_v34 = vrot.slane %v420_v23, 5  ;;  %v428_v35 = vrot.slane %v426_v24, 5  ;;  %v432_v38 = vrot.slane %v430_v27, 4  ;;  %v249_v42 = vshrl.u32 %v6253_v29, 16  ;;  %v6281_v58 = vld [vmem:[%s6216_s23 + $0x70] sm:$0xf] }
  0x18   : > { %v232_v36 = vrot.slane %v231_v25, 4  ;;  %v242_v37 = vrot.slane %v241_v26, 4  ;;  %v438_v39 = vrot.slane %v436_v28, 5  ;;  %v252_v43 = vshll.u32 %v6253_v29, 16  ;;  %v6289_v63 = vld [vmem:[%s6216_s23 + $0x74] sm:$0x1] }
  0x19   : > { %v423_v40 = vor.u32 %v422_v34, %v419_v33  ;;  %v258_v44 = vshll.u32 %v6256_v30, 16  ;;  %v433_v47 = vor.u32 %v432_v38, %v428_v35  ;;  %v262_v48 = vshrl.u32 %v6256_v30, 16  ;;  %v6295_v8 = vld [vmem:[%s6216_s23 + $0x18] sm:$0xf]  ;;  %v6308_v25 = vld [vmem:[%s6216_s23 + $0x20] sm:$0x1] }
  0x1a   : > { %v237_v45 = vsel %vm6260_vm4, %v232_v36, %v236_v19  ;;  %v247_v46 = vsel %vm6260_vm4, %v242_v37, %v246_v21  ;;  %v251_v51 = vrot.slane %v249_v42, 4  ;;  %v254_v52 = vrot.slane %v252_v43, 5  ;;  %v6302_v21 = vld [vmem:[%s6216_s23 + $0x1c] sm:$0xf] }
  0x1b   : > { %v5027_v49 = vcombine.low %v237_v45, %v247_v46  ;;  %v424_v50 = vrot.slane %v423_v40, 4  ;;  %v434_v54 = vrot.slane %v433_v47, 4  ;;  %v260_v55 = vrot.slane %v258_v44, 5  ;;  %v6321_v40 = vld [vmem:[%s8866_s1 + $0x8] sm:$0x3] }
  0x1c   : > { %v264_v56 = vrot.slane %v262_v48, 4  ;;  %v268_v57 = vshll.u32 %v6266_v41, 16  ;;  %v255_v60 = vor.u32 %v254_v52, %v251_v51  ;;  %v441_v3 = vshrl.u32 %v6277_v53, 16  ;;  %v6326_v46 = vld [vmem:[%s6216_s23 + $0x7c] sm:$0xf] }
  0x1d   : > { %5785 = vmatprep.mubr.msk.bf16.mxu0 %vm658_vm3, %v5027_v49  ;;  %v429_v59 = vsel %vm6260_vm4, %v424_v50, %v428_v35  ;;  %v439_v0 = vsel %vm6260_vm4, %v434_v54, %v438_v39  ;;  %v444_v11 = vshll.u32 %v6277_v53, 16  ;;  %v450_v13 = vshll.u32 %v6281_v58, 16  ;;  %v6315_v35 = vld [vmem:[%s6216_s23 + $0x78] sm:$0xf] }
  0x1e   : > { %v265_v1 = vor.u32 %v264_v56, %v260_v55  ;;  %v270_v2 = vrot.slane %v268_v57, 5  ;;  %v5035_v9 = vcombine.low %v429_v59, %v439_v0  ;;  %v256_v10 = vrot.slane %v255_v60, 4  ;;  %v6333_v56 = vld [vmem:[%s6216_s23 + $0x80] sm:$0x1] }
  0x1f   : > { %v443_v18 = vrot.slane %v441_v3, 4  ;;  %v454_v19 = vshrl.u32 %v6281_v58, 16  ;;  %v460_v20 = vshll.u32 %v6289_v63, 16  ;;  %v446_v23 = vrot.slane %v444_v11, 5  ;;  %8904 = vst [vmem:[#allocation2_spill] sm:$0xff] %v6333_v56 }
  0x20   : > { %v266_v17 = vrot.slane %v265_v1, 4  ;;  %5801 = vmatprep.mubr.msk.bf16.mxu1 %vm658_vm3, %v5035_v9  ;;  %v261_v22 = vsel %vm6260_vm4, %v256_v10, %v260_v55  ;;  %v452_v24 = vrot.slane %v450_v13, 5  ;;  %v273_v26 = vshrl.u32 %v6295_v8, 16  ;;  %v6339_v1 = vld [vmem:[%s6216_s23 + $0x24] sm:$0xf] }
  0x21   : > { %v456_v28 = vrot.slane %v454_v19, 4  ;;  %v462_v33 = vrot.slane %v460_v20, 5  ;;  %v276_v34 = vshll.u32 %v6295_v8, 16  ;;  %v447_v37 = vor.u32 %v446_v23, %v443_v18  ;;  %v6347_v10 = vld [vmem:[%s6216_s23 + $0x28] sm:$0xf] }
  0x22   : > { %v271_v27 = vsel %vm6260_vm4, %v266_v17, %v270_v2  ;;  %v275_v38 = vrot.slane %v273_v26, 4  ;;  %v282_v39 = vshll.u32 %v6302_v21, 16  ;;  %v286_v44 = vshrl.u32 %v6302_v21, 16  ;;  %v6353_v19 = vld [vmem:[%s8866_s1 + $0x6] sm:$0x3] }
  0x23   : > { %v5028_v36 = vcombine.low %v261_v22, %v271_v27  ;;  %v457_v42 = vor.u32 %v456_v28, %v452_v24  ;;  %v278_v43 = vrot.slane %v276_v34, 5  ;;  %v292_v45 = vshll.u32 %v6308_v25, 16 }
  0x24   : > { %v448_v47 = vrot.slane %v447_v37, 4  ;;  %v284_v48 = vrot.slane %v282_v39, 5  ;;  %v465_v49 = vshrl.u32 %v6315_v35, 16  ;;  %v468_v50 = vshll.u32 %v6315_v35, 16 }
  0x25   : > { %5786 = vmatmul.mubr.msk.bf16.vlgmr.msra.gmra.mxu0 %vm658_vm3, %v5028_v36  ;;  %v458_v51 = vrot.slane %v457_v42, 4  ;;  %v279_v52 = vor.u32 %v278_v43, %v275_v38  ;;  %v288_v54 = vrot.slane %v286_v44, 4  ;;  %v294_v55 = vrot.slane %v292_v45, 5  ;;  %v6365_v36 = vld [vmem:[%s6216_s23 + $0x84] sm:$0xf] }
  0x26   : > { %5852 = vmatpush3.bf16.msra.mxu0 %v6245_v16  ;;  %v453_v57 = vsel %vm6260_vm4, %v448_v47, %v452_v24  ;;  %v467_v59 = vrot.slane %v465_v49, 4  ;;  %v470_v60 = vrot.slane %v468_v50, 5  ;;  %v474_v0 = vshll.u32 %v6326_v46, 16  ;;  %v6358_v24 = vld [vmem:[%s6216_s23 + $0x2c] sm:$0x1] }
  0x27   : > { %6096 = vmatprep.subr.msk.bf16.mxu0 %vm707_vm0, %v6321_v40  ;;  %v463_v16 = vsel %vm6260_vm4, %v458_v51, %v462_v33  ;;  %v280_v2 = vrot.slane %v279_v52, 4  ;;  %v289_v3 = vor.u32 %v288_v54, %v284_v48  ;;  %v478_v9 = vshrl.u32 %v6326_v46, 16  ;;  %v6372_v43 = vld [vmem:[%s6216_s23 + $0x88] sm:$0xf]  ;;  %v6380_v51 = vld [vmem:[%s6216_s23 + $0x8c] sm:$0x1] }
  0x28   : > { %v5036_v11 = vcombine.low %v453_v57, %v463_v16  ;;  %v471_v13 = vor.u32 %v470_v60, %v467_v59  ;;  %v476_v17 = vrot.slane %v474_v0, 5  ;;  %v484_v18 = vshll.u32 %v6333_v56, 16  ;;  %8905 = vst [vmem:[#allocation3_spill] sm:$0xff] %v6380_v51  ;;  %v6388_v60 = vld [vmem:[%s6216_s23 + $0x30] sm:$0xf] }
  0x29   : > { %v285_v20 = vsel %vm6260_vm4, %v280_v2, %v284_v48  ;;  %v290_v22 = vrot.slane %v289_v3, 4  ;;  %v480_v23 = vrot.slane %v478_v9, 4  ;;  %v297_v26 = vshrl.u32 %v6339_v1, 16  ;;  %v6393_v9 = vld [vmem:[%s6216_s23 + $0x34] sm:$0xf] }
  0x2a   : > { %5802 = vmatmul.mubr.msk.bf16.vlgmr.msra.gmra.mxu1 %vm658_vm3, %v5036_v11  ;;  %v472_v27 = vrot.slane %v471_v13, 4  ;;  %v486_v28 = vrot.slane %v484_v18, 5  ;;  %v300_v33 = vshll.u32 %v6339_v1, 16  ;;  %v306_v34 = vshll.u32 %v6347_v10, 16 }
  0x2b   : > { %5818 = vmatpush3.bf16.msra.mxu1 %v6219_v4  ;;  %v295_v37 = vsel %vm6260_vm4, %v290_v22, %v294_v55  ;;  %v481_v38 = vor.u32 %v480_v23, %v476_v17  ;;  %v299_v39 = vrot.slane %v297_v26, 4  ;;  %v310_v42 = vshrl.u32 %v6347_v10, 16 }
  0x2c   : > { %v5029_v44 = vcombine.low %v285_v20, %v295_v37  ;;  %v477_v45 = vsel %vm6260_vm4, %v472_v27, %v476_v17  ;;  %v302_v47 = vrot.slane %v300_v33, 5  ;;  %v308_v48 = vrot.slane %v306_v34, 5  ;;  %6095 = vmatprep.subr.msk.bf16.mxu1 %vm707_vm0, %v6353_v19  ;;  %v6401_v33 = vld [vmem:[%s6216_s23 + $0x38] sm:$0x1] }
  0x2d   : > { %v482_v4 = vrot.slane %v481_v38, 4  ;;  %v312_v49 = vrot.slane %v310_v42, 4  ;;  %v316_v50 = vshll.u32 %v6358_v24, 16  ;;  %v489_v52 = vshrl.u32 %v6365_v36, 16  ;;  %v6406_v38 = vld [vmem:[%s6216_s23 + $0x90] sm:$0xf] }
  0x2e   : > { %5789 = vmatprep.mubr.msk.bf16.mxu0 %vm658_vm3, %v5029_v44  ;;  %v303_v54 = vor.u32 %v302_v47, %v299_v39  ;;  %v492_v55 = vshll.u32 %v6365_v36, 16  ;;  %v498_v57 = vshll.u32 %v6372_v43, 16  ;;  %v502_v59 = vshrl.u32 %v6372_v43, 16  ;;  %8906 = vst [vmem:[#allocation4_spill] sm:$0xff] %v6406_v38  ;;  %v6411_v47 = vld [vmem:[%s6216_s23 + $0x94] sm:$0xf] }
  0x2f   : > { %v487_v0 = vsel %vm6260_vm4, %v482_v4, %v486_v28  ;;  %v313_v16 = vor.u32 %v312_v49, %v308_v48  ;;  %v318_v2 = vrot.slane %v316_v50, 5  ;;  %v491_v3 = vrot.slane %v489_v52, 4  ;;  %8907 = vst [vmem:[#allocation5_spill] sm:$0xff] %v6411_v47 }
  0x30   : > { %v5037_v11 = vcombine.low %v477_v45, %v487_v0  ;;  %v304_v13 = vrot.slane %v303_v54, 4  ;;  %v494_v17 = vrot.slane %v492_v55, 5  ;;  %v500_v18 = vrot.slane %v498_v57, 5 }
  0x31   : > { %v314_v20 = vrot.slane %v313_v16, 4  ;;  %v504_v22 = vrot.slane %v502_v59, 4  ;;  %v508_v23 = vshll.u32 %v6380_v51, 16  ;;  %v321_v26 = vshrl.u32 %v6388_v60, 16  ;;  %v6420_v16 = vld [vmem:[%s6216_s23 + $0x98] sm:$0x1] }
  0x32   : > { %5805 = vmatprep.mubr.msk.bf16.mxu1 %vm658_vm3, %v5037_v11  ;;  %v309_v27 = vsel %vm6260_vm4, %v304_v13, %v308_v48  ;;  %v495_v28 = vor.u32 %v494_v17, %v491_v3  ;;  %v324_v34 = vshll.u32 %v6388_v60, 16  ;;  %v330_v37 = vshll.u32 %v6393_v9, 16  ;;  %8908 = vst [vmem:[#allocation6_spill] sm:$0xff] %v6420_v16  ;;  %v6425_v11 = vld [vmem:[%s6216_s23 + $0x3c] sm:$0xf] }
  0x33   : > { %v319_v39 = vsel %vm6260_vm4, %v314_v20, %v318_v2  ;;  %v505_v42 = vor.u32 %v504_v22, %v500_v18  ;;  %v510_v44 = vrot.slane %v508_v23, 5  ;;  %v323_v45 = vrot.slane %v321_v26, 4  ;;  %v6430_v23 = vld [vmem:[%s6216_s23 + $0x40] sm:$0xf]  ;;  %v1165_v51 = vld [vmem:[%s6216_s23 + $0xc] sm:$0xe] }
  0x34   : > { %v5030_v48 = vcombine.low %v309_v27, %v319_v39  ;;  %v496_v4 = vrot.slane %v495_v28, 4  ;;  %v326_v49 = vrot.slane %v324_v34, 5  ;;  %v332_v50 = vrot.slane %v330_v37, 5 }
  0x35   : > { %v506_v52 = vrot.slane %v505_v42, 4  ;;  %v334_v54 = vshrl.u32 %v6393_v9, 16  ;;  %v340_v55 = vshll.u32 %v6401_v33, 16  ;;  %v513_v57 = vshrl.u32 %v6406_v38, 16 }
  0x36   : > { %5790 = vmatmul.mubr.msk.bf16.gmra.mxu0 %vm658_vm3, %v5030_v48  ;;  %v501_v59 = vsel %vm6260_vm4, %v496_v4, %v500_v18  ;;  %v327_v0 = vor.u32 %v326_v49, %v323_v45  ;;  %v516_v2 = vshll.u32 %v6406_v38, 16  ;;  %v522_v3 = vshll.u32 %v6411_v47, 16  ;;  %v6439_v48 = vld [vmem:[%s6216_s23 + $0x44] sm:$0x1] }
  0x37   : > { %v511_v13 = vsel %vm6260_vm4, %v506_v52, %v510_v44  ;;  %v336_v17 = vrot.slane %v334_v54, 4  ;;  %v342_v20 = vrot.slane %v340_v55, 5  ;;  %v515_v22 = vrot.slane %v513_v57, 4  ;;  %v6444_v52 = vld [vmem:[%s6216_s23 + $0x9c] sm:$0xf] }
  0x38   : > { %v5038_v18 = vcombine.low %v501_v59, %v511_v13  ;;  %v328_v26 = vrot.slane %v327_v0, 4  ;;  %v518_v27 = vrot.slane %v516_v2, 5  ;;  %v524_v28 = vrot.slane %v522_v3, 5  ;;  %8909 = vst [vmem:[#allocation7_spill] sm:$0xff] %v6444_v52  ;;  %v6448_v13 = vld [vmem:[%s6216_s23 + $0xa0] sm:$0xf] }
  0x39   : > { %v337_v34 = vor.u32 %v336_v17, %v332_v50  ;;  %v526_v37 = vshrl.u32 %v6411_v47, 16  ;;  %v532_v39 = vshll.u32 %v6420_v16, 16  ;;  %v345_v42 = vshrl.u32 %v6425_v11, 16  ;;  %8910 = vst [vmem:[#allocation8_spill] sm:$0xff] %v6448_v13 }
  0x3a   : > { %5806 = vmatmul.mubr.msk.bf16.gmra.mxu1 %vm658_vm3, %v5038_v18  ;;  %v333_v44 = vsel %vm6260_vm4, %v328_v26, %v332_v50  ;;  %v519_v45 = vor.u32 %v518_v27, %v515_v22  ;;  %v348_v4 = vshll.u32 %v6425_v11, 16  ;;  %v354_v49 = vshll.u32 %v6430_v23, 16  ;;  %v6454_v26 = vld [vmem:[%s6216_s23 + $0xa4] sm:$0x1] }
  0x3b   : > { %v338_v54 = vrot.slane %v337_v34, 4  ;;  %v528_v55 = vrot.slane %v526_v37, 4  ;;  %v534_v57 = vrot.slane %v532_v39, 5  ;;  %v347_v59 = vrot.slane %v345_v42, 4  ;;  %8911 = vst [vmem:[#allocation9_spill] sm:$0xff] %v6454_v26 }
  0x3c   : > { %v520_v0 = vrot.slane %v519_v45, 4  ;;  %v350_v2 = vrot.slane %v348_v4, 5  ;;  %v356_v3 = vrot.slane %v354_v49, 5  ;;  %v358_v50 = vshrl.u32 %v6430_v23, 16  ;;  %v6458_v34 = vld [vmem:[%s6216_s23 + $0x48] sm:$0xf] }
  0x3d   : > { %v343_v17 = vsel %vm6260_vm4, %v338_v54, %v342_v20  ;;  %v529_v22 = vor.u32 %v528_v55, %v524_v28  ;;  %v364_v18 = vshll.u32 %v6439_v48, 16  ;;  %v537_v27 = vshrl.u32 %v6444_v52, 16 }
  0x3e   : > { %v5031_v37 = vcombine.low %v333_v44, %v343_v17  ;;  %v525_v39 = vsel %vm6260_vm4, %v520_v0, %v524_v28  ;;  %v351_v42 = vor.u32 %v350_v2, %v347_v59  ;;  %v360_v45 = vrot.slane %v358_v50, 4  ;;  %v6467_v17 = vld [vmem:[%s6216_s23 + $0x4c] sm:$0xf]  ;;  %v6473_v2 = vld [vmem:[%s6216_s23 + $0x50] sm:$0x1] }
  0x3f   : > { %v530_v4 = vrot.slane %v529_v22, 4  ;;  %v366_v49 = vrot.slane %v364_v18, 5  ;;  %v539_v20 = vrot.slane %v537_v27, 4  ;;  %v540_v54 = vshll.u32 %v6444_v52, 16 }
  0x40   : > { %5793 = vmatprep.mubr.msk.bf16.mxu0 %vm658_vm3, %v5031_v37  ;;  %v352_v55 = vrot.slane %v351_v42, 4  ;;  %v361_v62 = vor.u32 %v360_v45, %v356_v3  ;;  %v546_v32 = vshll.u32 %v6448_v13, 16  ;;  %v550_v44 = vshrl.u32 %v6448_v13, 16  ;;  %v6479_v42 = vld [vmem:[%s6216_s23 + $0xa8] sm:$0xf] }
  0x41   : > { %v535_v28 = vsel %vm6260_vm4, %v530_v4, %v534_v57  ;;  %v542_v59 = vrot.slane %v540_v54, 5  ;;  %v556_v0 = vshll.u32 %v6454_v26, 16  ;;  %v369_v50 = vshrl.u32 %v6458_v34, 16  ;;  %8912 = vst [vmem:[#allocation10_spill] sm:$0xff] %v6479_v42 }
  0x42   : > { %v5039_v22 = vcombine.low %v525_v39, %v535_v28  ;;  %v357_v18 = vsel %vm6260_vm4, %v352_v55, %v356_v3  ;;  %v362_v27 = vrot.slane %v361_v62, 4  ;;  %v548_v37 = vrot.slane %v546_v32, 5 }
  0x43   : > { %v543_v45 = vor.u32 %v542_v59, %v539_v20  ;;  %v552_v61 = vrot.slane %v550_v44, 4  ;;  %v558_v57 = vrot.slane %v556_v0, 5  ;;  %v371_v4 = vrot.slane %v369_v50, 4  ;;  %v6489_v44 = vld [vmem:[%s6216_s23 + $0xac] sm:$0xf] }
  0x44   : > { %5809 = vmatprep.mubr.msk.bf16.mxu1 %vm658_vm3, %v5039_v22  ;;  %v367_v54 = vsel %vm6260_vm4, %v362_v27, %v366_v49  ;;  %v372_v39 = vshll.u32 %v6458_v34, 16  ;;  %v378_v28 = vshll.u32 %v6467_v17, 16  ;;  %v382_v62 = vshrl.u32 %v6467_v17, 16  ;;  %8913 = vst [vmem:[#allocation11_spill] sm:$0xff] %v6489_v44  ;;  %v6492_v22 = vld [vmem:[%s6216_s23 + $0xb0] sm:$0x1] }
  0x45   : > { %v5032_v3 = vcombine.low %v357_v18, %v367_v54  ;;  %v544_v32 = vrot.slane %v543_v45, 4  ;;  %v553_v55 = vor.u32 %v552_v61, %v548_v37  ;;  %v388_v20 = vshll.u32 %v6473_v2, 16  ;;  %8914 = vst [vmem:[#allocation12_spill] sm:$0xff] %v6492_v22 }
  0x46   : > { %v374_v59 = vrot.slane %v372_v39, 5  ;;  %v380_v0 = vrot.slane %v378_v28, 5  ;;  %v384_v50 = vrot.slane %v382_v62, 4  ;;  %v561_v49 = vshrl.u32 %v6479_v42, 16  ;;  %v6501_v62 = vld [vmem:[%s6216_s23 + $0x54] sm:$0xf] }
  0x47   : > { %5794 = vmatmul.mubr.msk.bf16.gmra.mxu0 %vm658_vm3, %v5032_v3  ;;  %v549_v18 = vsel %vm6260_vm4, %v544_v32, %v548_v37  ;;  %v554_v27 = vrot.slane %v553_v55, 4  ;;  %v390_v61 = vrot.slane %v388_v20, 5  ;;  %v564_v45 = vshll.u32 %v6479_v42, 16  ;;  %v6508_v55 = vld [vmem:[%s6216_s23 + $0x58] sm:$0xf] }
  0x48   : > { %v375_v54 = vor.u32 %v374_v59, %v371_v4  ;;  %v385_v56 = vor.u32 %v384_v50, %v380_v0  ;;  %v563_v39 = vrot.slane %v561_v49, 4  ;;  %v570_v28 = vshll.u32 %v6489_v44, 16  ;;  %v6511_v49 = vld [vmem:[%s6216_s23 + $0x5c] sm:$0x1] }
  0x49   : > { %v559_v3 = vsel %vm6260_vm4, %v554_v27, %v558_v57  ;;  %v566_v26 = vrot.slane %v564_v45, 5  ;;  %v574_v37 = vshrl.u32 %v6489_v44, 16  ;;  %v580_v32 = vshll.u32 %v6492_v22, 16  ;;  %v1164_v22 = vld [vmem:[%s6216_s23] sm:$0xe] }
  0x4a   : > { %v5040_v4 = vcombine.low %v549_v18, %v559_v3  ;;  %v376_v20 = vrot.slane %v375_v54, 4  ;;  %v386_v59 = vrot.slane %v385_v56, 4  ;;  %v572_v50 = vrot.slane %v570_v28, 5  ;;  %v6522_v54 = vld [vmem:[%s6216_s23 + $0xb4] sm:$0xf] }
  0x4b   : > { %v567_v42 = vor.u32 %v566_v26, %v563_v39  ;;  %v576_v52 = vrot.slane %v574_v37, 4  ;;  %v582_v13 = vrot.slane %v580_v32, 5  ;;  %v393_v57 = vshrl.u32 %v6501_v62, 16  ;;  %8915 = vst [vmem:[#allocation13_spill] sm:$0xff] %v6522_v54  ;;  %v6525_v37 = vld [vmem:[%s6216_s23 + $0xb8] sm:$0xf] }
  0x4c   : > { %5810 = vmatmul.mubr.msk.bf16.gmra.mxu1 %vm658_vm3, %v5040_v4  ;;  %v381_v27 = vsel %vm6260_vm4, %v376_v20, %v380_v0  ;;  %v391_v18 = vsel %vm6260_vm4, %v386_v59, %v390_v61  ;;  %v396_v56 = vshll.u32 %v6501_v62, 16  ;;  %v402_v45 = vshll.u32 %v6508_v55, 16  ;;  %v6530_v61 = vld [vmem:[%s6216_s23 + $0xbc] sm:$0x1] }
  0x4d   : > { %v5033_v26 = vcombine.low %v381_v27, %v391_v18  ;;  %v568_v39 = vrot.slane %v567_v42, 4  ;;  %v577_v28 = vor.u32 %v576_v52, %v572_v50  ;;  %v395_v3 = vrot.slane %v393_v57, 4 }
  0x4e   : > { %v398_v32 = vrot.slane %v396_v56, 5  ;;  %v404_v4 = vrot.slane %v402_v45, 5  ;;  %v406_v0 = vshrl.u32 %v6508_v55, 16  ;;  %v412_v20 = vshll.u32 %v6511_v49, 16 }
  0x4f   : > { %5797 = vmatprep.mubr.msk.bf16.mxu0 %vm658_vm3, %v5033_v26  ;;  %v573_v59 = vsel %vm6260_vm4, %v568_v39, %v572_v50  ;;  %v578_v27 = vrot.slane %v577_v28, 4  ;;  %v585_v52 = vshrl.u32 %v6522_v54, 16  ;;  %v588_v42 = vshll.u32 %v6522_v54, 16 }
  0x50   : > { %v399_v57 = vor.u32 %v398_v32, %v395_v3  ;;  %v408_v18 = vrot.slane %v406_v0, 4  ;;  %v414_v56 = vrot.slane %v412_v20, 5  ;;  %v594_v45 = vshll.u32 %v6525_v37, 16 }
  0x51   : > { %v583_v44 = vsel %vm6260_vm4, %v578_v27, %v582_v13  ;;  %v587_v16 = vrot.slane %v585_v52, 4  ;;  %v590_v26 = vrot.slane %v588_v42, 5  ;;  %v598_v38 = vshrl.u32 %v6525_v37, 16 }
  0x52   : > { %v5041_v50 = vcombine.low %v573_v59, %v583_v44  ;;  %v400_v39 = vrot.slane %v399_v57, 4  ;;  %v409_v28 = vor.u32 %v408_v18, %v404_v4  ;;  %v596_v47 = vrot.slane %v594_v45, 5  ;;  %v1166_v57 = vld [vmem:[%s6216_s23 + $0x18] sm:$0xe] }
  0x53   : > { %v591_v54 = vor.u32 %v590_v26, %v587_v16  ;;  %v600_v3 = vrot.slane %v598_v38, 4  ;;  %v604_v32 = vshll.u32 %v6530_v61, 16  ;;  %v5091_v13 = vrot.slane %v1164_v22, 9 }
  0x54   : > { %5813 = vmatprep.mubr.msk.bf16.mxu1 %vm658_vm3, %v5041_v50  ;;  %v405_v44 = vsel %vm6260_vm4, %v400_v39, %v404_v4  ;;  %v410_v20 = vrot.slane %v409_v28, 4  ;;  %v1217_v59 = vrot.slane %v6225_v6, 5  ;;  %v5060_v38 = vcombine.low %v6253_v29, %v6256_v30 }
  0x55   : > { %v592_v16 = vrot.slane %v591_v54, 4  ;;  %v601_v27 = vor.u32 %v600_v3, %v596_v47  ;;  %v606_v52 = vrot.slane %v604_v32, 5  ;;  %v5092_v42 = vrot.slane %v1165_v51, 9 }
  0x56   : > { %v415_v18 = vsel %vm6260_vm4, %v410_v20, %v414_v56  ;;  %v1218_v22 = vsel %vm6546_vm7, %v5091_v13, %v1217_v59  ;;  %v1219_v45 = vrot.slane %v1217_v59, 4  ;;  %v8918_v4 = vrot.slane %v6256_v30, 5 }
  0x57   : > { %v5034_v50 = vcombine.low %v405_v44, %v415_v18  ;;  %v597_v54 = vsel %vm6260_vm4, %v592_v16, %v596_v47  ;;  %v602_v39 = vrot.slane %v601_v27, 4  ;;  %v5059_v51 = vcombine.low %v6222_v5, %v6225_v6  ;;  %v1167_v27 = vld [vmem:[%s6216_s23 + $0x24] sm:$0xe] }
  0x58   : > { %v1226_v26 = vrot.slane %v8918_v4, 4  ;;  %v8919_v28 = vrot.slane %v6228_v7, 5  ;;  %v8920_v3 = vmov %v8918_v4  ;;  %v5061_v13 = vcombine.low %v6295_v8, %v6302_v21  ;;  %v1169_v4 = vld [vmem:[%s6216_s23 + $0x3c] sm:$0xe] }
  0x59   : > { %v1225_v32 = vsel %vm6546_vm7, %v5092_v42, %v8920_v3  ;;  %v5093_v44 = vrot.slane %v1166_v57, 9  ;;  %5798 = vmatmul.mubr.msk.bf16.gmra.mxu0 %vm658_vm3, %v5034_v50  ;;  %v607_v47 = vsel %vm6260_vm4, %v602_v39, %v606_v52  ;;  %v8921_v6 = vrot.slane %v6266_v41, 5  ;;  %v1168_v42 = vld [vmem:[%s6216_s23 + $0x30] sm:$0xe]  ;;  %v1170_v39 = vld [vmem:[%s6216_s23 + $0x48] sm:$0xe] }
  0x5a   : > { %v1221_v56 = vsel %vm6546_vm7, %v1219_v45, %v8919_v28  ;;  %v1231_v20 = vrot.slane %v6302_v21, 5  ;;  %v5042_v59 = vcombine.low %v597_v54, %v607_v47  ;;  %v1234_v16 = vrot.slane %v6308_v25, 5  ;;  %v1171_v47 = vld [vmem:[%s6216_s23 + $0x54] sm:$0xe]  ;;  %v6841_v21 = vld [vmem:[%s6216_s23 + $0x2c] sm:$0x1] }
  0x5b   : > { %v5108_v5 = vcombine.low %v1218_v22, %v1221_v56  ;;  %v1228_v7 = vsel %vm6546_vm7, %v1226_v26, %v8921_v6  ;;  %v1785_v52 = vsel %vm707_vm0, %v6353_v19, 0  ;;  %v1238_v18 = vrot.slane %v6347_v10, 5 }
  0x5c   : > { %v1232_v41 = vsel %vm6546_vm7, %v5093_v44, %v1231_v20  ;;  %v1233_v57 = vrot.slane %v1231_v20, 4  ;;  %5814 = vmatmul.mubr.msk.bf16.gmra.mxu1 %vm658_vm3, %v5042_v59  ;;  %v5109_v22 = vcombine.low %v1225_v32, %v1228_v7  ;;  %v2511_v25 = vsel %vm707_vm0, %v6321_v40, 0 }
  0x5d   : > { %5853 = vmatprep.mubr.msk.bf16.mxu0 %vm658_vm3, %v5108_v5  ;;  %v1245_v45 = vrot.slane %v6393_v9, 5  ;;  %5819 = vmatprep.mubr.msk.bf16.mxu1 %vm658_vm3, %v5059_v51  ;;  %v5094_v26 = vrot.slane %v1167_v27, 9  ;;  %v1241_v50 = vrot.slane %v6358_v24, 5  ;;  %v5095_v54 = vrot.slane %v1168_v42, 9  ;;  %v6613_v24 = vld [vmem:[%s8866_s1 + $0xc] sm:$0x3] }
  0x5e   : > { %v1235_v19 = vsel %vm6546_vm7, %v1233_v57, %v1234_v16  ;;  %v1240_v56 = vrot.slane %v1238_v18, 4  ;;  %v1248_v32 = vrot.slane %v6401_v33, 5  ;;  %v5096_v44 = vrot.slane %v1169_v4, 9 }
  0x5f   : > { %v5110_v28 = vcombine.low %v1232_v41, %v1235_v19  ;;  %v1247_v3 = vrot.slane %v1245_v45, 4  ;;  %v1252_v40 = vrot.slane %v6430_v23, 5  ;;  %v1276_v5 = vrot.slane %v6242_v15, 5 }
  0x60   : > { %v1255_v51 = vrot.slane %v6439_v48, 5  ;;  %v5097_v6 = vrot.slane %v1170_v39, 9  ;;  %v1259_v7 = vrot.slane %v6467_v17, 5  ;;  %v5062_v33 = vcombine.low %v6339_v1, %v6347_v10  ;;  %v1172_v1 = vld [vmem:[%s6216_s23 + $0x60] sm:$0xe] }
  0x61   : > { %5854 = vmatmul.mubr.msk.bf16.vlgmr.msra.gmra.mxu0 %vm658_vm3, %v5109_v22  ;;  %v1239_v20 = vsel %vm6546_vm7, %v5094_v26, %v1238_v18  ;;  %v1254_v59 = vrot.slane %v1252_v40, 4  ;;  %v1262_v16 = vrot.slane %v6473_v2, 5  ;;  %v1242_v48 = vsel %vm6546_vm7, %v1240_v56, %v1241_v50  ;;  %v6641_v22 = vld [vmem:[%s8866_s1 + $0xa] sm:$0x3]  ;;  %v6666_v50 = vld [vmem:[%s6216_s23 + $0x6c] sm:$0xe] }
  0x62   : > { %5920 = vmatpush3.bf16.msra.mxu0 %v2511_v25  ;;  %5857 = vmatprep.mubr.msk.bf16.mxu0 %vm658_vm3, %v5110_v28  ;;  %v1246_v27 = vsel %vm6546_vm7, %v5095_v54, %v1245_v45  ;;  %v1249_v42 = vsel %vm6546_vm7, %v1247_v3, %v1248_v32  ;;  %v1261_v41 = vrot.slane %v1259_v7, 4  ;;  %v6631_v10 = vsel %vm6546_vm7, %v5096_v44, %v1252_v40  ;;  %v1175_v39 = vld [vmem:[%s6216_s23 + $0x84] sm:$0xe]  ;;  %v6695_v44 = vld [vmem:[%s6216_s23 + $0x78] sm:$0xe] }
  0x63   : > { %v6635_v2 = vsel %vm6546_vm7, %v5097_v6, %v1259_v7  ;;  %v5098_v57 = vrot.slane %v1171_v47, 9  ;;  %v1266_v18 = vrot.slane %v6508_v55, 5  ;;  %6098 = vmatprep.subr.msk.bf16.mxu0 %vm707_vm0, %v6613_v24  ;;  %v6651_v25 = vsel %vm6546_vm7, %v1254_v59, %v1255_v51  ;;  %v1176_v40 = vld [vmem:[%s6216_s23 + $0x90] sm:$0xe] }
  0x64   : > { %5820 = vmatmul.mubr.msk.bf16.vlgmr.msra.gmra.mxu1 %vm658_vm3, %v5060_v38  ;;  %v6655_v45 = vsel %vm6546_vm7, %v1261_v41, %v1262_v16  ;;  %v1269_v4 = vrot.slane %v6511_v49, 5  ;;  %v1273_v19 = vrot.slane %v6239_v14, 5  ;;  %v5111_v29 = vcombine.low %v1239_v20, %v1242_v48  ;;  %v8922_v48 = vld [vmem:[#allocation3_spill] sm:$0xff] }
  0x65   : > { %5886 = vmatpush3.bf16.msra.mxu1 %v1785_v52  ;;  %5823 = vmatprep.mubr.msk.bf16.mxu1 %vm658_vm3, %v5061_v13  ;;  %v5063_v30 = vcombine.low %v6388_v60, %v6393_v9  ;;  %v1268_v38 = vrot.slane %v1266_v18, 4  ;;  %v5099_v26 = vrot.slane %v1172_v1, 9  ;;  %v5112_v49 = vcombine.low %v1246_v27, %v1249_v42  ;;  %v1177_v42 = vld [vmem:[%s6216_s23 + $0x9c] sm:$0xe] }
  0x66   : > { %v5064_v52 = vcombine.low %v6425_v11, %v6430_v23  ;;  %v5065_v8 = vcombine.low %v6458_v34, %v6467_v17  ;;  %6097 = vmatprep.subr.msk.bf16.mxu1 %vm707_vm0, %v6641_v22  ;;  %v5113_v60 = vcombine.low %v6631_v10, %v6651_v25  ;;  %v5114_v9 = vcombine.low %v6635_v2, %v6655_v45  ;;  %v8923_v10 = vld [vmem:[#allocation5_spill] sm:$0xff]  ;;  %v8924_v2 = vld [vmem:[#allocation4_spill] sm:$0xff] }
  0x67   : > { %v1275_v54 = vrot.slane %v1273_v19, 4  ;;  %v6685_v28 = vsel %vm6546_vm7, %v5098_v57, %v1266_v18  ;;  %v6689_v56 = vsel %vm6546_vm7, %v1268_v38, %v1269_v4  ;;  %v5100_v32 = vrot.slane %v6666_v50, 9  ;;  %v1178_v18 = vld [vmem:[%s6216_s23 + $0xa8] sm:$0xe]  ;;  %v8926_v38 = vld [vmem:[#allocation8_spill] sm:$0xff] }
  0x68   : > { %v6701_v47 = vsel %vm6546_vm7, %v5099_v26, %v1273_v19  ;;  %v1280_v51 = vrot.slane %v6281_v58, 5  ;;  %v1283_v6 = vrot.slane %v6289_v63, 5  ;;  %v5102_v59 = vrot.slane %v1175_v39, 9  ;;  %v8925_v19 = vld [vmem:[#allocation6_spill] sm:$0xff]  ;;  %v8927_v26 = vld [vmem:[#allocation7_spill] sm:$0xff] }
  0x69   : > { %5858 = vmatmul.mubr.msk.bf16.gmra.mxu0 %vm658_vm3, %v5111_v29  ;;  %v1294_v16 = vrot.slane %v6372_v43, 5  ;;  %v1297_v27 = vrot.slane %v8922_v48, 5  ;;  %v5115_v41 = vcombine.low %v6685_v28, %v6689_v56  ;;  %v6719_v63 = vsel %vm6546_vm7, %v1275_v54, %v1276_v5  ;;  %v8929_v48 = vld [vmem:[#allocation11_spill] sm:$0xff] }
  0x6a   : > { %5861 = vmatprep.mubr.msk.bf16.mxu0 %vm658_vm3, %v5112_v49  ;;  %v5101_v1 = vrot.slane %v6695_v44, 9  ;;  %v5103_v4 = vrot.slane %v1176_v40, 9  ;;  %v1301_v15 = vrot.slane %v8923_v10, 5  ;;  %v1282_v5 = vrot.slane %v1280_v51, 4  ;;  %v5205_v57 = vld [vmem:[%s6216_s23 + $0xc] sm:$0xf] }
  0x6b   : > { %v6728_v25 = vsel %vm6546_vm7, %v5102_v59, %v1294_v16  ;;  %v1296_v45 = vrot.slane %v1294_v16, 4  ;;  %v1304_v29 = vrot.slane %v8925_v19, 5  ;;  %v5104_v49 = vrot.slane %v1177_v42, 9  ;;  %v8928_v59 = vld [vmem:[#allocation9_spill] sm:$0xff]  ;;  %v8930_v42 = vld [vmem:[#allocation10_spill] sm:$0xff] }
  0x6c   : > { %5824 = vmatmul.mubr.msk.bf16.gmra.mxu1 %vm658_vm3, %v5062_v33  ;;  %v1287_v33 = vrot.slane %v6326_v46, 5  ;;  %v6742_v39 = vsel %vm6546_vm7, %v5103_v4, %v1301_v15  ;;  %v1303_v44 = vrot.slane %v1301_v15, 4  ;;  %v1308_v40 = vrot.slane %v8926_v38, 5  ;;  %v8931_v15 = vld [vmem:[#allocation12_spill] sm:$0xff] }
  0x6d   : > { %5827 = vmatprep.mubr.msk.bf16.mxu1 %vm658_vm3, %v5063_v30  ;;  %v6738_v54 = vsel %vm6546_vm7, %v1296_v45, %v1297_v27  ;;  %v1311_v16 = vrot.slane %v8928_v59, 5  ;;  %v5105_v45 = vrot.slane %v1178_v18, 9  ;;  %v1315_v4 = vrot.slane %v8929_v48, 5 }
  0x6e   : > { %v6752_v27 = vsel %vm6546_vm7, %v1303_v44, %v1304_v29  ;;  %v1318_v50 = vrot.slane %v8931_v15, 5  ;;  %v6762_v19 = vsel %vm6546_vm7, %v5104_v49, %v1308_v40  ;;  %v1310_v7 = vrot.slane %v1308_v40, 4  ;;  %v8932_v29 = vld [vmem:[#allocation13_spill] sm:$0xff]  ;;  %v8933_v15 = vld [vmem:[#allocation2_spill] sm:$0xff]  ;;  %v6777_v49 = vld [vmem:[%s6216_s23 + $0x10] sm:$0xf] }
  0x6f   : > { %v6769_v18 = vsel %vm6546_vm7, %v5100_v32, %v1280_v51  ;;  %v6774_v59 = vsel %vm6546_vm7, %v5105_v45, %v1315_v4  ;;  %v1317_v30 = vrot.slane %v1315_v4, 4  ;;  %v5208_v40 = vld [vmem:[%s6216_s23 + $0x18] sm:$0xf]  ;;  %v1289_v20 = vrot.slane %v1287_v33, 4 }
  0x70   : > { %v2029_v44 = vshrl.u32 %v5205_v57, 16  ;;  %v2032_v32 = vshll.u32 %v5205_v57, 16  ;;  %v5116_v51 = vcombine.low %v6701_v47, %v6719_v63  ;;  %v6792_v45 = vsel %vm6546_vm7, %v1282_v5, %v1283_v6  ;;  %v1179_v57 = vld [vmem:[%s6216_s23 + $0xb4] sm:$0xe]  ;;  %v6813_v47 = vld [vmem:[%s6216_s23 + $0x14] sm:$0x1] }
  0x71   : > { %5862 = vmatmul.mubr.msk.bf16.gmra.mxu0 %vm658_vm3, %v5113_v60  ;;  %v1290_v60 = vrot.slane %v8933_v15, 5  ;;  %v6807_v11 = vsel %vm6546_vm7, %v5101_v1, %v1287_v33  ;;  %v2038_v6 = vshll.u32 %v6777_v49, 16  ;;  %v5209_v63 = vld [vmem:[%s6216_s23 + $0x1c] sm:$0xf]  ;;  %v2042_v17 = vshrl.u32 %v6777_v49, 16 }
  0x72   : > { %5865 = vmatprep.mubr.msk.bf16.mxu0 %vm658_vm3, %v5114_v9  ;;  %v6782_v9 = vsel %vm6546_vm7, %v1310_v7, %v1311_v16  ;;  %v6798_v7 = vsel %vm6546_vm7, %v1317_v30, %v1318_v50  ;;  %v2031_v5 = vrot.slane %v2029_v44, 4  ;;  %v2034_v34 = vrot.slane %v2032_v32, 5  ;;  %v5211_v15 = vld [vmem:[%s6216_s23 + $0x24] sm:$0xf]  ;;  %v6826_v44 = vld [vmem:[%s6216_s23 + $0x28] sm:$0xf] }
  0x73   : > { %v2053_v50 = vshrl.u32 %v5208_v40, 16  ;;  %v1291_v1 = vsel %vm6546_vm7, %v1289_v20, %v1290_v60  ;;  %v5106_v33 = vrot.slane %v1179_v57, 9  ;;  %v6821_v30 = vrot.slane %v2038_v6, 5 }
  0x74   : > { %5828 = vmatmul.mubr.msk.bf16.gmra.mxu1 %vm658_vm3, %v5064_v52  ;;  %v1322_v52 = vrot.slane %v6525_v37, 5  ;;  %v2056_v16 = vshll.u32 %v5208_v40, 16  ;;  %v1325_v23 = vrot.slane %v6530_v61, 5  ;;  %v2044_v4 = vrot.slane %v2042_v17, 4 }
  0x75   : > { %5831 = vmatprep.mubr.msk.bf16.mxu1 %vm658_vm3, %v5065_v8  ;;  %v5210_v8 = vld [vmem:[%s6216_s23 + $0x20] sm:$0x1]  ;;  %v2055_v3 = vrot.slane %v2053_v50, 4  ;;  %v2062_v13 = vshll.u32 %v5209_v63, 16  ;;  %v2048_v20 = vshll.u32 %v6813_v47, 16  ;;  %v2066_v57 = vshrl.u32 %v5209_v63, 16 }
  0x76   : > { %v1324_v32 = vrot.slane %v1322_v52, 4  ;;  %v2058_v60 = vrot.slane %v2056_v16, 5  ;;  %v5117_v61 = vcombine.low %v6769_v18, %v6792_v45  ;;  %v5118_v40 = vcombine.low %v6807_v11, %v1291_v1 }
  0x77   : > { %v2035_v6 = vor.u32 %v2034_v34, %v2031_v5  ;;  %v6837_v17 = vrot.slane %v2062_v13, 5  ;;  %v2045_v28 = vor.u32 %v2044_v4, %v6821_v30  ;;  %v2072_v50 = vshll.u32 %v5210_v8, 16  ;;  %v6864_v5 = vld [vmem:[%s6216_s23 + $0x34] sm:$0xf] }
  0x78   : > { %v2059_v56 = vor.u32 %v2058_v60, %v2055_v3  ;;  %v6849_v18 = vsel %vm6546_vm7, %v5106_v33, %v1322_v52  ;;  %v2077_v13 = vshrl.u32 %v5211_v15, 16  ;;  %v2080_v45 = vshll.u32 %v5211_v15, 16  ;;  %v5214_v52 = vld [vmem:[%s6216_s23 + $0x30] sm:$0xf] }
  0x79   : > { %5866 = vmatmul.mubr.msk.bf16.gmra.mxu0 %vm658_vm3, %v5115_v41  ;;  %v2068_v41 = vrot.slane %v2066_v57, 4  ;;  %v2086_v11 = vshll.u32 %v6826_v44, 16  ;;  %v8935_v3 = vcombine.low %v6235_v12, %v6239_v14  ;;  %v6858_v4 = vsel %vm6546_vm7, %v1324_v32, %v1325_v23 }
  0x7a   : > { %5869 = vmatprep.mubr.msk.bf16.mxu0 %vm658_vm3, %v5116_v51  ;;  %v8934_v51 = vcombine.low %v6501_v62, %v6508_v55  ;;  %v2050_v62 = vrot.slane %v2048_v20, 5  ;;  %v2090_v63 = vshrl.u32 %v6826_v44, 16  ;;  %v2036_v34 = vrot.slane %v2035_v6, 4 }
  0x7b   : > { %v2069_v55 = vor.u32 %v2068_v41, %v6837_v17  ;;  %v2079_v8 = vrot.slane %v2077_v13, 4  ;;  %v2082_v1 = vrot.slane %v2080_v45, 5  ;;  %v6866_v33 = vrot.slane %v2086_v11, 5  ;;  %v6872_v41 = vld [vmem:[%s6216_s23 + $0x38] sm:$0x1] }
  0x7c   : > { %5832 = vmatmul.mubr.msk.bf16.gmra.mxu1 %vm658_vm3, %v8934_v51  ;;  %v2046_v12 = vrot.slane %v2045_v28, 4  ;;  %v2060_v14 = vrot.slane %v2059_v56, 4  ;;  %v2074_v16 = vrot.slane %v2072_v50, 5  ;;  %v2092_v23 = vrot.slane %v2090_v63, 4  ;;  %v5217_v13 = vld [vmem:[%s6216_s23 + $0x3c] sm:$0xf] }
  0x7d   : > { %5835 = vmatprep.mubr.msk.bf16.mxu1 %vm658_vm3, %v8935_v3  ;;  %v2070_v15 = vrot.slane %v2069_v55, 4  ;;  %v2096_v32 = vshll.u32 %v6841_v21, 16  ;;  %v2101_v20 = vshrl.u32 %v5214_v52, 16  ;;  %v2104_v60 = vshll.u32 %v5214_v52, 16 }
  0x7e   : > { %v2083_v57 = vor.u32 %v2082_v1, %v2079_v8  ;;  %v2093_v6 = vor.u32 %v2092_v23, %v6866_v33  ;;  %v2110_v28 = vshll.u32 %v6864_v5, 16  ;;  %v2114_v56 = vshrl.u32 %v6864_v5, 16  ;;  %v5220_v8 = vld [vmem:[%s6216_s23 + $0x48] sm:$0xf]  ;;  %v6899_v1 = vld [vmem:[%s6216_s23 + $0x4c] sm:$0xf] }
  0x7f   : > { %v2103_v50 = vrot.slane %v2101_v20, 4  ;;  %v2106_v51 = vrot.slane %v2104_v60, 5  ;;  %v8936_v3 = vcombine.low %v6277_v53, %v6281_v58  ;;  %v5123_v55 = vcombine.low %v6849_v18, %v6858_v4 }
  0x80   : > { %v6878_v45 = vrot.slane %v2110_v28, 5  ;;  %v2116_v11 = vrot.slane %v2114_v56, 4  ;;  %v2051_v63 = vsel %vm6260_vm4, %v2046_v12, %v2050_v62  ;;  %v2065_v52 = vsel %vm6260_vm4, %v2060_v14, %v6837_v17 }
  0x81   : > { %5870 = vmatmul.mubr.msk.bf16.gmra.mxu0 %vm658_vm3, %v5117_v61  ;;  %v6881_v61 = vld [vmem:[%s6216_s23 + $0x40] sm:$0xf]  ;;  %v8937_v53 = vcombine.low %v6315_v35, %v6326_v46  ;;  %v2075_v58 = vsel %vm6260_vm4, %v2070_v15, %v2074_v16  ;;  %v2084_v23 = vrot.slane %v2083_v57, 4  ;;  %v2107_v20 = vor.u32 %v2106_v51, %v2103_v50  ;;  %v6933_v50 = vld [vmem:[%s6216_s23 + $0x44] sm:$0x1] }
  0x82   : > { %5873 = vmatprep.mubr.msk.bf16.mxu0 %vm658_vm3, %v5118_v40  ;;  %v2041_v40 = vsel %vm6260_vm4, %v2036_v34, %v6821_v30  ;;  %v2094_v30 = vrot.slane %v2093_v6, 4  ;;  %v2098_v34 = vrot.slane %v2096_v32, 5  ;;  %v2120_v62 = vshll.u32 %v6872_v41, 16  ;;  %v5223_v51 = vld [vmem:[%s6216_s23 + $0x54] sm:$0xf] }
  0x83   : > { %v2125_v12 = vshrl.u32 %v5217_v13, 16  ;;  %v2128_v17 = vshll.u32 %v5217_v13, 16  ;;  %v6910_v14 = vsel %vm707_vm0, %v6641_v22, 0  ;;  %v2117_v35 = vor.u32 %v2116_v11, %v6878_v45 }
  0x84   : > { %5836 = vmatmul.mubr.msk.bf16.gmra.mxu1 %vm658_vm3, %v8936_v3  ;;  %v2134_v46 = vshll.u32 %v6881_v61, 16  ;;  %v2138_v16 = vshrl.u32 %v6881_v61, 16  ;;  %v6915_v15 = vcombine.low %v2041_v40, %v2051_v63  ;;  %v6919_v32 = vsel %vm707_vm0, %v6613_v24, 0  ;;  %v6942_v40 = vld [vmem:[%s6216_s23 + $0x58] sm:$0xf] }
  0x85   : > { %5839 = vmatprep.mubr.msk.bf16.mxu1 %vm658_vm3, %v8937_v53  ;;  %v2149_v60 = vshrl.u32 %v5220_v8, 16  ;;  %v2152_v57 = vshll.u32 %v5220_v8, 16  ;;  %v8938_v6 = vcombine.low %v6728_v25, %v6738_v54  ;;  %v6925_v22 = vcombine.low %v2065_v52, %v2075_v58  ;;  %v6947_v8 = vld [vmem:[%s6216_s23 + $0x50] sm:$0x1] }
  0x86   : > { %v2089_v28 = vsel %vm6260_vm4, %v2084_v23, %v6866_v33  ;;  %v2099_v56 = vsel %vm6260_vm4, %v2094_v30, %v2098_v34  ;;  %v2158_v24 = vshll.u32 %v6899_v1, 16  ;;  %v8939_v25 = vcombine.low %v6742_v39, %v6752_v27  ;;  %v5226_v34 = vld [vmem:[%s6216_s23 + $0x60] sm:$0xf] }
  0x87   : > { %v2108_v54 = vrot.slane %v2107_v20, 4  ;;  %v2122_v13 = vrot.slane %v2120_v62, 5  ;;  %v2127_v11 = vrot.slane %v2125_v12, 4  ;;  %v2130_v3 = vrot.slane %v2128_v17, 5 }
  0x88   : > { %v2118_v33 = vrot.slane %v2117_v35, 4  ;;  %v6944_v63 = vrot.slane %v2134_v46, 5  ;;  %v2140_v52 = vrot.slane %v2138_v16, 4  ;;  %v2162_v53 = vshrl.u32 %v6899_v1, 16  ;;  %v6964_v35 = vld [vmem:[%s6216_s23 + $0x5c] sm:$0x1] }
  0x89   : > { %5874 = vmatmul.mubr.msk.bf16.gmra.mxu0 %vm658_vm3, %v8938_v6  ;;  %v8940_v39 = vcombine.low %v6365_v36, %v6372_v43  ;;  %v2151_v27 = vrot.slane %v2149_v60, 4  ;;  %v2154_v58 = vrot.slane %v2152_v57, 5  ;;  %v2173_v23 = vshrl.u32 %v5223_v51, 16 }
  0x8a   : > { %5877 = vmatprep.mubr.msk.bf16.mxu0 %vm658_vm3, %v8939_v25  ;;  %v2176_v30 = vshll.u32 %v5223_v51, 16  ;;  %v8941_v20 = vcombine.low %v8924_v2, %v8923_v10  ;;  %v6959_v62 = vcombine.low %v2089_v28, %v2099_v56  ;;  %v6961_v12 = vrot.slane %v2158_v24, 5  ;;  %v6977_v28 = vld [vmem:[%s6216_s23 + $0x64] sm:$0xf] }
  0x8b   : > { %v2164_v17 = vrot.slane %v2162_v53, 4  ;;  %v2182_v36 = vshll.u32 %v6942_v40, 16  ;;  %v2144_v43 = vshll.u32 %v6933_v50, 16  ;;  %v2175_v46 = vrot.slane %v2173_v23, 4 }
  0x8c   : > { %5840 = vmatmul.mubr.msk.bf16.gmra.mxu1 %vm658_vm3, %v8940_v39  ;;  %v2178_v16 = vrot.slane %v2176_v30, 5  ;;  %v2186_v60 = vshrl.u32 %v6942_v40, 16  ;;  %v2113_v10 = vsel %vm6260_vm4, %v2108_v54, %v6878_v45  ;;  %v2123_v2 = vsel %vm6260_vm4, %v2118_v33, %v2122_v13  ;;  %v6999_v30 = vld [vmem:[%s6216_s23 + $0x68] sm:$0x1] }
  0x8d   : > { %5843 = vmatprep.mubr.msk.bf16.mxu1 %vm658_vm3, %v8941_v20  ;;  %v2131_v57 = vor.u32 %v2130_v3, %v2127_v11  ;;  %v6974_v6 = vrot.slane %v2182_v36, 5  ;;  %v2141_v56 = vor.u32 %v2140_v52, %v6944_v63  ;;  %v2155_v24 = vor.u32 %v2154_v58, %v2151_v27  ;;  %v5229_v3 = vld [vmem:[%s6216_s23 + $0x6c] sm:$0xf]  ;;  %v6996_v27 = vld [vmem:[%s6216_s23 + $0x70] sm:$0xf] }
  0x8e   : > { %v2168_v51 = vshll.u32 %v6947_v8, 16  ;;  %v2188_v25 = vrot.slane %v2186_v60, 4  ;;  %v8942_v53 = vcombine.low %v6762_v19, %v6782_v9  ;;  %v2165_v45 = vor.u32 %v2164_v17, %v6961_v12 }
  0x8f   : > { %v2179_v54 = vor.u32 %v2178_v16, %v2175_v46  ;;  %v2197_v13 = vshrl.u32 %v5226_v34, 16  ;;  %v2200_v11 = vshll.u32 %v5226_v34, 16  ;;  %v8943_v33 = vcombine.low %v6774_v59, %v6798_v7  ;;  %v5232_v16 = vld [vmem:[%s6216_s23 + $0x78] sm:$0xf] }
  0x90   : > { %v2189_v52 = vor.u32 %v2188_v25, %v6974_v6  ;;  %v2192_v39 = vshll.u32 %v6964_v35, 16  ;;  %v2206_v19 = vshll.u32 %v6977_v28, 16  ;;  %v2210_v9 = vshrl.u32 %v6977_v28, 16 }
  0x91   : > { %5878 = vmatmul.mubr.msk.bf16.gmra.mxu0 %vm658_vm3, %v8942_v53  ;;  %v2132_v58 = vrot.slane %v2131_v57, 4  ;;  %v2146_v23 = vrot.slane %v2144_v43, 5  ;;  %v2199_v34 = vrot.slane %v2197_v13, 4  ;;  %v2202_v20 = vrot.slane %v2200_v11, 5 }
  0x92   : > { %5881 = vmatprep.mubr.msk.bf16.mxu0 %vm658_vm3, %v8943_v33  ;;  %v8944_v59 = vcombine.low %v8927_v26, %v8926_v38  ;;  %v7005_v7 = vcombine.low %v2113_v10, %v2123_v2  ;;  %v2142_v17 = vrot.slane %v2141_v56, 4  ;;  %v2156_v36 = vrot.slane %v2155_v24, 4  ;;  %v7015_v2 = vld [vmem:[%s6216_s23 + $0x7c] sm:$0xf] }
  0x93   : > { %v7007_v46 = vrot.slane %v2206_v19, 5  ;;  %v8945_v43 = vcombine.low %v8930_v42, %v8929_v48  ;;  %v2166_v60 = vrot.slane %v2165_v45, 4  ;;  %v2170_v57 = vrot.slane %v2168_v51, 5  ;;  %8946 = vst [vmem:[#allocation3_spill] sm:$0xff] %v7015_v2  ;;  %v5235_v19 = vld [vmem:[%s6216_s23 + $0x84] sm:$0xf] }
  0x94   : > { %5844 = vmatmul.mubr.msk.bf16.gmra.mxu1 %vm658_vm3, %v8944_v59  ;;  %v2180_v25 = vrot.slane %v2179_v54, 4  ;;  %v2212_v38 = vrot.slane %v2210_v9, 4  ;;  %v2190_v26 = vrot.slane %v2189_v52, 4  ;;  %v2194_v53 = vrot.slane %v2192_v39, 5 }
  0x95   : > { %5847 = vmatprep.mubr.msk.bf16.mxu1 %vm658_vm3, %v8945_v43  ;;  %v2203_v13 = vor.u32 %v2202_v20, %v2199_v34  ;;  %v2221_v10 = vshrl.u32 %v5229_v3, 16  ;;  %v2137_v56 = vsel %vm6260_vm4, %v2132_v58, %v6944_v63  ;;  %v2224_v24 = vshll.u32 %v5229_v3, 16  ;;  %v6126_v63 = vld [vmem:[%s6216_s23 + $0xc] sm:$0xff]   ;;  %v7049_v34 = vld [vmem:[%s6216_s23 + $0x88] sm:$0xf] }
  0x96   : > { %v2230_v48 = vshll.u32 %v6996_v27, 16  ;;  %v2234_v42 = vshrl.u32 %v6996_v27, 16  ;;  %v2147_v51 = vsel %vm6260_vm4, %v2142_v17, %v2146_v23  ;;  %v2161_v45 = vsel %vm6260_vm4, %v2156_v36, %v6961_v12  ;;  %8947 = vst [vmem:[#allocation5_spill] sm:$0xff] %v7049_v34  ;;  %v7058_v36 = vld [vmem:[%s6216_s23 + $0x74] sm:$0x1] }
  0x97   : > { %v2213_v54 = vor.u32 %v2212_v38, %v7007_v46  ;;  %v2216_v11 = vshll.u32 %v6999_v30, 16  ;;  %v2171_v3 = vsel %vm6260_vm4, %v2166_v60, %v2170_v57  ;;  %v2185_v33 = vsel %vm6260_vm4, %v2180_v25, %v6974_v6  ;;  %8949 = vst [vmem:[#allocation4_spill] sm:$0xff] %v7058_v36  ;;  %v7068_v38 = vld [vmem:[%s6216_s23 + $0x80] sm:$0x1] }
  0x98   : > { %v2245_v52 = vshrl.u32 %v5232_v16, 16  ;;  %v2248_v12 = vshll.u32 %v5232_v16, 16  ;;  %v2195_v18 = vsel %vm6260_vm4, %v2190_v26, %v2194_v53  ;;  %v2204_v4 = vrot.slane %v2203_v13, 4  ;;  %8950 = vst [vmem:[#allocation6_spill] sm:$0xff] %v7068_v38  ;;  %v7071_v26 = vld [vmem:[%s6216_s23 + $0x8c] sm:$0x1] }
  0x99   : > { %5882 = vmatmul.mubr.msk.bf16.gmra.mxu0 %vm658_vm3, %v5123_v55  ;;  %v2223_v55 = vrot.slane %v2221_v10, 4  ;;  %v2254_v39 = vshll.u32 %v7015_v2, 16  ;;  %v2226_v9 = vrot.slane %v2224_v24, 5  ;;  %v7045_v58 = vrot.slane %v2230_v48, 5  ;;  %8951 = vst [vmem:[#allocation8_spill] sm:$0xff] %v7071_v26  ;;  %v6127_v10 = vld [vmem:[%s6216_s23 + $0x18] sm:$0xff]  }
  0x9a   : > { %5921 = vmatprep.mubr.msk.bf16.mxu0 %vm658_vm3, %v6915_v15  ;;  %v2236_v23 = vrot.slane %v2234_v42, 4  ;;  %v2258_v6 = vshrl.u32 %v7015_v2, 16  ;;  %v8948_v15 = vcombine.low %v8932_v29, %v6525_v37  ;;  %v7055_v20 = vcombine.low %v2137_v56, %v2147_v51  ;;  %v5238_v51 = vld [vmem:[%s6216_s23 + $0x90] sm:$0xf] }
  0x9b   : > { %v2214_v59 = vrot.slane %v2213_v54, 4  ;;  %v2218_v17 = vrot.slane %v2216_v11, 5  ;;  %v2247_v16 = vrot.slane %v2245_v52, 4  ;;  %v2250_v43 = vrot.slane %v2248_v12, 5 }
  0x9c   : > { %5848 = vmatmul.mubr.msk.bf16.gmra.mxu1 %vm658_vm3, %v8948_v15  ;;  %v7061_v60 = vrot.slane %v2254_v39, 5  ;;  %v2260_v57 = vrot.slane %v2258_v6, 4  ;;  %v2269_v25 = vshrl.u32 %v5235_v19, 16  ;;  %v7063_v37 = vcombine.low %v2161_v45, %v2171_v3  ;;  %v7082_v45 = vld [vmem:[%s6216_s23 + $0x94] sm:$0xf] }
  0x9d   : > { %5887 = vmatprep.mubr.msk.bf16.mxu1 %vm658_vm3, %v6126_v63  ;;  %v7065_v29 = vcombine.low %v2185_v33, %v2195_v18  ;;  %v2272_v53 = vshll.u32 %v5235_v19, 16  ;;  %v2278_v13 = vshll.u32 %v7049_v34, 16  ;;  %v2209_v56 = vsel %vm6260_vm4, %v2204_v4, %v7007_v46  ;;  %8952 = vst [vmem:[#allocation7_spill] sm:$0xff] %v7082_v45  ;;  %v7090_v33 = vld [vmem:[%s8866_s1 + $0x10] sm:$0x3]  ;;  %v6128_v46 = vld [vmem:[%s6216_s23 + $0x24] sm:$0xff]  }
  0x9e   : > { %v2227_v24 = vor.u32 %v2226_v9, %v2223_v55  ;;  %v2237_v48 = vor.u32 %v2236_v23, %v7045_v58  ;;  %v2240_v42 = vshll.u32 %v7058_v36, 16  ;;  %v2271_v54 = vrot.slane %v2269_v25, 4  ;;  %8953 = vst [vmem:[#allocation9_spill] sm:$0xff] %v7090_v33 }
  0x9f   : > { %v2274_v11 = vrot.slane %v2272_v53, 5  ;;  %v7084_v63 = vrot.slane %v2278_v13, 5  ;;  %v2282_v3 = vshrl.u32 %v7049_v34, 16  ;;  %v2219_v52 = vsel %vm6260_vm4, %v2214_v59, %v2218_v17 }
  0xa0   : > { %v2251_v12 = vor.u32 %v2250_v43, %v2247_v16  ;;  %v2261_v18 = vor.u32 %v2260_v57, %v7061_v60  ;;  %v2264_v4 = vshll.u32 %v7068_v38, 16  ;;  %v2293_v19 = vshrl.u32 %v5238_v51, 16  ;;  %v7124_v57 = vld [vmem:[%s6216_s23 + $0xa0] sm:$0xf] }
  0xa1   : > { %5922 = vmatmul.mubr.msk.bf16.vlgmr.msra.gmra.mxu0 %vm658_vm3, %v6925_v22  ;;  %v2275_v55 = vor.u32 %v2274_v11, %v2271_v54  ;;  %v2284_v39 = vrot.slane %v2282_v3, 4  ;;  %v2296_v9 = vshll.u32 %v5238_v51, 16  ;;  %v5241_v22 = vld [vmem:[%s6216_s23 + $0x9c] sm:$0xf]  ;;  %v7103_v23 = vrot.slane %v2227_v24, 4  ;;  %8955 = vst [vmem:[#allocation10_spill] sm:$0xff] %v7124_v57 }
  0xa2   : > { %5988 = vmatpush3.bf16.msra.mxu0 %v6919_v32  ;;  %5925 = vmatprep.mubr.msk.bf16.mxu0 %vm658_vm3, %v6959_v62  ;;  %v7105_v6 = vrot.slane %v2240_v42, 5  ;;  %v2288_v15 = vshll.u32 %v7071_v26, 16  ;;  %v2302_v59 = vshll.u32 %v7082_v45, 16  ;;  %v7112_v32 = vld [vmem:[%s8866_s1 + $0xe] sm:$0x3]  ;;  %v7117_v62 = vcombine.low %v2209_v56, %v2219_v52 }
  0xa3   : > { %8954 = vst [vmem:[#allocation11_spill] sm:$0xff] %v7112_v32  ;;  %6100 = vmatprep.subr.msk.bf16.mxu0 %vm707_vm0, %v7090_v33  ;;  %v7119_v17 = vrot.slane %v2237_v48, 4  ;;  %v2285_v16 = vor.u32 %v2284_v39, %v7084_v63  ;;  %v2306_v43 = vshrl.u32 %v7082_v45, 16  ;;  %v7128_v25 = vrot.slane %v2251_v12, 4  ;;  %v7137_v56 = vld [vmem:[%s6216_s23 + $0x98] sm:$0x1] }
  0xa4   : > { %5888 = vmatmul.mubr.msk.bf16.vlgmr.msra.gmra.mxu1 %vm658_vm3, %v6127_v10  ;;  %v7130_v53 = vrot.slane %v2261_v18, 4  ;;  %v7132_v13 = vrot.slane %v2264_v4, 5  ;;  %v7134_v10 = vrot.slane %v2275_v55, 4  ;;  %8956 = vst [vmem:[#allocation12_spill] sm:$0xff] %v7137_v56  ;;  %v2295_v24 = vrot.slane %v2293_v19, 4  ;;  %v6130_v19 = vld [vmem:[%s6216_s23 + $0x3c] sm:$0xff]  }
  0xa5   : > { %5954 = vmatpush3.bf16.msra.mxu1 %v6910_v14  ;;  %5891 = vmatprep.mubr.msk.bf16.mxu1 %vm658_vm3, %v6128_v46  ;;  %v2298_v48 = vrot.slane %v2296_v9, 5  ;;  %v2317_v42 = vshrl.u32 %v5241_v22, 16  ;;  %v2320_v51 = vshll.u32 %v5241_v22, 16  ;;  %v6129_v14 = vld [vmem:[%s6216_s23 + $0x30] sm:$0xff]   ;;  %v7146_v11 = vrot.slane %v2288_v15, 5 }
  0xa6   : > { %6099 = vmatprep.subr.msk.bf16.mxu1 %vm707_vm0, %v7112_v32  ;;  %v7148_v3 = vrot.slane %v2302_v59, 5  ;;  %v2326_v46 = vshll.u32 %v7124_v57, 16  ;;  %v5244_v52 = vld [vmem:[%s6216_s23 + $0xa8] sm:$0xf]  ;;  %v7152_v12 = vrot.slane %v2285_v16, 4  ;;  %v2308_v18 = vrot.slane %v2306_v43, 4 }
  0xa7   : > { %v2312_v4 = vshll.u32 %v7137_v56, 16  ;;  %v2330_v55 = vshrl.u32 %v7124_v57, 16  ;;  %v7157_v39 = vld [vmem:[%s6216_s23 + $0xac] sm:$0xf]  ;;  %v2299_v59 = vor.u32 %v2298_v48, %v2295_v24  ;;  %v7181_v16 = vld [vmem:[%s6216_s23 + $0xa4] sm:$0x1] }
  0xa8   : > { %8957 = vst [vmem:[#allocation13_spill] sm:$0xff] %v7157_v39  ;;  %8958 = vst [vmem:[#allocation2_spill] sm:$0xff] %v7181_v16  ;;  %v2319_v43 = vrot.slane %v2317_v42, 4  ;;  %v2322_v22 = vrot.slane %v2320_v51, 5  ;;  %v2341_v54 = vshrl.u32 %v5244_v52, 16  ;;  %v7183_v9 = vrot.slane %v2326_v46, 5 }
  0xa9   : > { %5926 = vmatmul.mubr.msk.bf16.gmra.mxu0 %vm658_vm3, %v7005_v7  ;;  %v2332_v32 = vrot.slane %v2330_v55, 4  ;;  %v2344_v15 = vshll.u32 %v5244_v52, 16  ;;  %v2350_v33 = vshll.u32 %v7157_v39, 16  ;;  %v5247_v57 = vld [vmem:[%s6216_s23 + $0xb4] sm:$0xf]  ;;  %v2309_v24 = vor.u32 %v2308_v18, %v7148_v3 }
  0xaa   : > { %5929 = vmatprep.mubr.msk.bf16.mxu0 %vm658_vm3, %v7055_v20  ;;  %v2291_v20 = vsel %vm6260_vm4, %v7152_v12, %v7146_v11  ;;  %v7193_v48 = vrot.slane %v2312_v4, 5  ;;  %v7196_v42 = vld [vmem:[%s6216_s23 + $0xb0] sm:$0x1]  ;;  %v2343_v51 = vrot.slane %v2341_v54, 4  ;;  %v7199_v46 = vld [vmem:[%s6216_s23 + $0xb8] sm:$0xf]  ;;  %v2323_v18 = vor.u32 %v2322_v22, %v2319_v43 }
  0xab   : > { %8959 = vst [vmem:[#allocation14_spill] sm:$0xff] %v7196_v42  ;;  %8960 = vst [vmem:[#allocation15_spill] sm:$0xff] %v7199_v46  ;;  %v2346_v52 = vrot.slane %v2344_v15, 5  ;;  %v7203_v55 = vrot.slane %v2350_v33, 5  ;;  %v2354_v11 = vshrl.u32 %v7157_v39, 16  ;;  %v7206_v12 = vrot.slane %v2299_v59, 4 }
  0xac   : > { %5892 = vmatmul.mubr.msk.bf16.gmra.mxu1 %vm658_vm3, %v6129_v14  ;;  %v2336_v14 = vshll.u32 %v7181_v16, 16  ;;  %v7209_v4 = vld [vmem:[%s6216_s23 + $0xbc] sm:$0x1]  ;;  %v2365_v54 = vshrl.u32 %v5247_v57, 16  ;;  %v2368_v7 = vshll.u32 %v5247_v57, 16  ;;  %v2333_v56 = vor.u32 %v2332_v32, %v7183_v9  ;;  %v6131_v16 = vld [vmem:[%s6216_s23 + $0x48] sm:$0xff]  }
  0xad   : > { %5895 = vmatprep.mubr.msk.bf16.mxu1 %vm658_vm3, %v6130_v19  ;;  %v2356_v45 = vrot.slane %v2354_v11, 4  ;;  %v2360_v19 = vshll.u32 %v7196_v42, 16  ;;  %v2374_v15 = vshll.u32 %v7199_v46, 16  ;;  %v5250_v33 = vld [vmem:[%s6216_s23 + $0xc0] sm:$0xf]  ;;  %v2347_v26 = vor.u32 %v2346_v52, %v2343_v51  ;;  %v6132_v57 = vld [vmem:[%s6216_s23 + $0x54] sm:$0xff]  }
  0xae   : > { %v2367_v39 = vrot.slane %v2365_v54, 4  ;;  %v2370_v34 = vrot.slane %v2368_v7, 5  ;;  %v2378_v59 = vshrl.u32 %v7199_v46, 16  ;;  %v7218_v22 = vld [vmem:[%s6216_s23 + $0xc4] sm:$0xf]  ;;  %v2310_v43 = vrot.slane %v2309_v24, 4 }
  0xaf   : > { %v2338_v32 = vrot.slane %v2336_v14, 5  ;;  %v2357_v11 = vor.u32 %v2356_v45, %v7203_v55  ;;  %v2376_v42 = vrot.slane %v2374_v15, 5  ;;  %v2384_v7 = vshll.u32 %v7209_v4, 16  ;;  %v7230_v45 = vld [vmem:[%s6216_s23 + $0xc8] sm:$0x1] }
  0xb0   : > { %v2371_v51 = vor.u32 %v2370_v34, %v2367_v39  ;;  %v2380_v52 = vrot.slane %v2378_v59, 4  ;;  %v2389_v54 = vshrl.u32 %v5250_v33, 16  ;;  %v2324_v46 = vrot.slane %v2323_v18, 4 }
  0xb1   : > { %5930 = vmatmul.mubr.msk.bf16.gmra.mxu0 %vm658_vm3, %v7063_v37  ;;  %v2334_v38 = vrot.slane %v2333_v56, 4  ;;  %v2392_v2 = vshll.u32 %v5250_v33, 16  ;;  %v2398_v37 = vshll.u32 %v7218_v22, 16  ;;  %v2348_v24 = vrot.slane %v2347_v26, 4 }
  0xb2   : > { %5933 = vmatprep.mubr.msk.bf16.mxu0 %vm658_vm3, %v7065_v29  ;;  %v2362_v14 = vrot.slane %v2360_v19, 5  ;;  %v2381_v36 = vor.u32 %v2380_v52, %v2376_v42  ;;  %v2391_v15 = vrot.slane %v2389_v54, 4  ;;  %v2358_v34 = vrot.slane %v2357_v11, 4 }
  0xb3   : > { %v2394_v29 = vrot.slane %v2392_v2, 5  ;;  %v7233_v39 = vrot.slane %v2398_v37, 5  ;;  %v2402_v56 = vshrl.u32 %v7218_v22, 16  ;;  %v8961_v26 = vsel %vm6260_vm4, %v7119_v17, %v7105_v6 }
  0xb4   : > { %5896 = vmatmul.mubr.msk.bf16.gmra.mxu1 %vm658_vm3, %v6131_v16  ;;  %v8962_v16 = vsel %vm6260_vm4, %v7103_v23, %v7045_v58  ;;  %v2372_v19 = vrot.slane %v2371_v51, 4  ;;  %v2382_v33 = vrot.slane %v2381_v36, 4  ;;  %v2386_v2 = vrot.slane %v2384_v7, 5  ;;  %v6133_v23 = vld [vmem:[%s6216_s23 + $0x60] sm:$0xff]  }
  0xb5   : > { %5899 = vmatprep.mubr.msk.bf16.mxu1 %vm658_vm3, %v6132_v57  ;;  %v5262_v18 = vcombine.low %v8962_v16, %v8961_v26  ;;  %v8963_v59 = vsel %vm6260_vm4, %v7130_v53, %v7132_v13  ;;  %v8964_v6 = vsel %vm6260_vm4, %v7128_v25, %v7061_v60  ;;  %v2395_v57 = vor.u32 %v2394_v29, %v2391_v15  ;;  %v5288_v13 = vld [vmem:[%s6216_s23 + $0x24] sm:$0xe]  ;;  %v5291_v26 = vld [vmem:[%s6216_s23 + $0x48] sm:$0xe] }
  0xb6   : > { %v5263_v17 = vcombine.low %v8964_v6, %v8963_v59  ;;  %v2404_v11 = vrot.slane %v2402_v56, 4  ;;  %v2408_v58 = vshll.u32 %v7230_v45, 16  ;;  %v8965_v36 = vsel %vm6260_vm4, %v7134_v10, %v7084_v63  ;;  %v6134_v63 = vld [vmem:[%s6216_s23 + $0x6c] sm:$0xff]   ;;  %v5292_v6 = vld [vmem:[%s6216_s23 + $0x54] sm:$0xe] }
  0xb7   : > { %v5264_v51 = vcombine.low %v8965_v36, %v2291_v20  ;;  %v2305_v53 = vsel %vm6260_vm4, %v7206_v12, %v7148_v3  ;;  %v2315_v60 = vsel %vm6260_vm4, %v2310_v43, %v7193_v48  ;;  %v2329_v25 = vsel %vm6260_vm4, %v2324_v46, %v7183_v9  ;;  %v7286_v12 = vld [vmem:[%s6216_s23 + $0xc] sm:$0xe] }
  0xb8   : > { %v2339_v10 = vsel %vm6260_vm4, %v2334_v38, %v2338_v32  ;;  %v2353_v3 = vsel %vm6260_vm4, %v2348_v24, %v7203_v55  ;;  %v2363_v20 = vsel %vm6260_vm4, %v2358_v34, %v2362_v14  ;;  %v2405_v48 = vor.u32 %v2404_v11, %v7233_v39  ;;  %v5289_v55 = vld [vmem:[%s6216_s23 + $0x30] sm:$0xe]  ;;  %v5290_v14 = vld [vmem:[%s6216_s23 + $0x3c] sm:$0xe] }
  0xb9   : > { %5934 = vmatmul.mubr.msk.bf16.gmra.mxu0 %vm658_vm3, %v7117_v62  ;;  %v2377_v62 = vsel %vm6260_vm4, %v2372_v19, %v2376_v42  ;;  %v2387_v38 = vsel %vm6260_vm4, %v2382_v33, %v2386_v2  ;;  %v7293_v9 = vrot.slane %v2395_v57, 4  ;;  %v2772_v46 = vrot.slane %v6777_v49, 5  ;;  %v6135_v57 = vld [vmem:[%s6216_s23 + $0x78] sm:$0xff]  }
  0xba   : > { %5937 = vmatprep.mubr.msk.bf16.mxu0 %vm658_vm3, %v5262_v18  ;;  %v7297_v43 = vcombine.low %v2305_v53, %v2315_v60  ;;  %v7299_v32 = vrot.slane %v2405_v48, 4  ;;  %v7301_v52 = vrot.slane %v2408_v58, 5  ;;  %v5304_v7 = vrot.slane %v5288_v13, 9  ;;  %v6136_v53 = vld [vmem:[%s6216_s23 + $0x84] sm:$0xff]   ;;  %v5293_v13 = vld [vmem:[%s6216_s23 + $0x60] sm:$0xe] }
  0xbb   : > { %v7304_v54 = vcombine.low %v2329_v25, %v2339_v10  ;;  %v7306_v42 = vcombine.low %v2353_v3, %v2363_v20  ;;  %v5302_v37 = vrot.slane %v7286_v12, 9  ;;  %v2786_v24 = vrot.slane %v6826_v44, 5  ;;  %v6142_v49 = vld [vmem:[%s6216_s23 + $0x18] sm:$0xff]  }
  0xbc   : > { %5900 = vmatmul.mubr.msk.bf16.gmra.mxu1 %vm658_vm3, %v6133_v23  ;;  %v7312_v15 = vcombine.low %v2377_v62, %v2387_v38  ;;  %v2775_v34 = vrot.slane %v6813_v47, 5  ;;  %v2789_v29 = vrot.slane %v6841_v21, 5  ;;  %v5305_v56 = vrot.slane %v5289_v55, 9  ;;  %v5295_v55 = vld [vmem:[%s6216_s23 + $0x78] sm:$0xe] }
  0xbd   : > { %5903 = vmatprep.mubr.msk.bf16.mxu1 %vm658_vm3, %v6134_v63  ;;  %v2401_v16 = vsel %vm6260_vm4, %v7293_v9, %v7233_v39  ;;  %v7323_v44 = vrot.slane %v2772_v46, 4  ;;  %v7327_v18 = vsel %vm6546_vm7, %v5304_v7, %v2786_v24  ;;  %v2788_v19 = vrot.slane %v2786_v24, 4 }
  0xbe   : > { %v2411_v21 = vsel %vm6260_vm4, %v7299_v32, %v7301_v52  ;;  %v2793_v33 = vrot.slane %v6864_v5, 5  ;;  %v2796_v2 = vrot.slane %v6872_v41, 5  ;;  %v5306_v59 = vrot.slane %v5290_v14, 9  ;;  %v6141_v52 = vld [vmem:[%s6216_s23 + $0xc0] sm:$0xff]  }
  0xbf   : > { %v7339_v11 = vsel %vm6546_vm7, %v2788_v19, %v2789_v29  ;;  %v2800_v58 = vrot.slane %v6881_v61, 5  ;;  %v2803_v23 = vrot.slane %v6933_v50, 5  ;;  %v5307_v36 = vrot.slane %v5291_v26, 9  ;;  %v5296_v19 = vld [vmem:[%s6216_s23 + $0x84] sm:$0xe] }
  0xc0   : > { %v5321_v5 = vcombine.low %v7327_v18, %v7339_v11  ;;  %v7349_v41 = vsel %vm6546_vm7, %v5305_v56, %v2793_v33  ;;  %v2795_v60 = vrot.slane %v2793_v33, 4  ;;  %v2807_v25 = vrot.slane %v6899_v1, 5 }
  0xc1   : > { %5938 = vmatmul.mubr.msk.bf16.gmra.mxu0 %vm658_vm3, %v5263_v17  ;;  %v7356_v61 = vsel %vm6546_vm7, %v5306_v59, %v2800_v58  ;;  %v2802_v50 = vrot.slane %v2800_v58, 4  ;;  %v2810_v17 = vrot.slane %v6947_v8, 5  ;;  %v5308_v63 = vrot.slane %v5292_v6, 9  ;;  %v8966_v59 = vld [vmem:[#allocation4_spill] sm:$0xff] }
  0xc2   : > { %5941 = vmatprep.mubr.msk.bf16.mxu0 %vm658_vm3, %v5264_v51  ;;  %v7361_v10 = vsel %vm6546_vm7, %v2795_v60, %v2796_v2  ;;  %v7365_v3 = vsel %vm6546_vm7, %v5307_v36, %v2807_v25  ;;  %v2809_v1 = vrot.slane %v2807_v25, 4  ;;  %v2814_v20 = vrot.slane %v6942_v40, 5  ;;  %v5294_v51 = vld [vmem:[%s6216_s23 + $0x6c] sm:$0xe]  ;;  %v6137_v58 = vld [vmem:[%s6216_s23 + $0x90] sm:$0xff]  }
  0xc3   : > { %v5322_v48 = vcombine.low %v7349_v41, %v7361_v10  ;;  %v7374_v8 = vsel %vm6546_vm7, %v2802_v50, %v2803_v23  ;;  %v2817_v62 = vrot.slane %v6964_v35, 5  ;;  %v5309_v38 = vrot.slane %v5293_v13, 9  ;;  %v8967_v36 = vld [vmem:[#allocation3_spill] sm:$0xff]  ;;  %v5297_v60 = vld [vmem:[%s6216_s23 + $0x90] sm:$0xe]  ;;  %v8968_v50 = vld [vmem:[#allocation6_spill] sm:$0xff] }
  0xc4   : > { %5904 = vmatmul.mubr.msk.bf16.gmra.mxu1 %vm658_vm3, %v6135_v57  ;;  %v5323_v40 = vcombine.low %v7356_v61, %v7374_v8  ;;  %v7383_v7 = vsel %vm6546_vm7, %v2809_v1, %v2810_v17  ;;  %v7387_v24 = vsel %vm6546_vm7, %v5308_v63, %v2814_v20  ;;  %v2816_v14 = vrot.slane %v2814_v20, 4 }
  0xc5   : > { %5907 = vmatprep.mubr.msk.bf16.mxu1 %vm658_vm3, %v6136_v53  ;;  %v5324_v35 = vcombine.low %v7365_v3, %v7383_v7  ;;  %v2821_v29 = vrot.slane %v6977_v28, 5  ;;  %v2824_v56 = vrot.slane %v6999_v30, 5  ;;  %v5310_v26 = vrot.slane %v5294_v51, 9  ;;  %v8969_v51 = vld [vmem:[#allocation5_spill] sm:$0xff]  ;;  %v5428_v3 = vld [vmem:[%s6216_s23 + $0x48] sm:$0xf] }
  0xc6   : > { %v7396_v33 = vsel %vm6546_vm7, %v2816_v14, %v2817_v62  ;;  %v2828_v2 = vrot.slane %v6996_v27, 5  ;;  %v2831_v6 = vrot.slane %v8966_v59, 5  ;;  %v5311_v57 = vrot.slane %v5295_v55, 9  ;;  %v6138_v27 = vld [vmem:[%s6216_s23 + $0x9c] sm:$0xff]   ;;  %v8977_v55 = vld [vmem:[#allocation15_spill] sm:$0xff] }
  0xc7   : > { %v5325_v23 = vcombine.low %v7387_v24, %v7396_v33  ;;  %v7405_v28 = vsel %vm6546_vm7, %v5309_v38, %v2821_v29  ;;  %v2823_v30 = vrot.slane %v2821_v29, 4  ;;  %v2835_v53 = vrot.slane %v8967_v36, 5  ;;  %v5298_v38 = vld [vmem:[%s6216_s23 + $0x9c] sm:$0xe]  ;;  %v8972_v36 = vld [vmem:[#allocation12_spill] sm:$0xff] }
  0xc8   : > { %v7414_v25 = vsel %vm6546_vm7, %v5310_v26, %v2828_v2  ;;  %v2830_v13 = vrot.slane %v2828_v2, 4  ;;  %v2838_v17 = vrot.slane %v8968_v50, 5  ;;  %v5312_v63 = vrot.slane %v5296_v19, 9  ;;  %v5299_v26 = vld [vmem:[%s6216_s23 + $0xa8] sm:$0xe] }
  0xc9   : > { %5942 = vmatmul.mubr.msk.bf16.gmra.mxu0 %vm658_vm3, %v7297_v43  ;;  %v7421_v1 = vsel %vm6546_vm7, %v2823_v30, %v2824_v56  ;;  %v7425_v43 = vsel %vm6546_vm7, %v5311_v57, %v2835_v53  ;;  %v2837_v20 = vrot.slane %v2835_v53, 4  ;;  %v2842_v62 = vrot.slane %v8969_v51, 5  ;;  %v5301_v57 = vld [vmem:[%s6216_s23 + $0xc0] sm:$0xe]  ;;  %v6139_v19 = vld [vmem:[%s6216_s23 + $0xa8] sm:$0xff]  }
  0xca   : > { %5945 = vmatprep.mubr.msk.bf16.mxu0 %vm658_vm3, %v7304_v54  ;;  %v7433_v14 = vsel %vm6546_vm7, %v2830_v13, %v2831_v6  ;;  %v8970_v54 = vld [vmem:[#allocation8_spill] sm:$0xff]  ;;  %v5313_v56 = vrot.slane %v5297_v60, 9  ;;  %v2852_v53 = vrot.slane %v8972_v36, 5  ;;  %v5314_v60 = vrot.slane %v5298_v38, 9  ;;  %v8975_v38 = vld [vmem:[#allocation13_spill] sm:$0xff] }
  0xcb   : > { %v2845_v29 = vrot.slane %v8970_v54, 5  ;;  %v7442_v2 = vsel %vm6546_vm7, %v2837_v20, %v2838_v17  ;;  %v7446_v59 = vsel %vm6546_vm7, %v5312_v63, %v2842_v62  ;;  %v2844_v6 = vrot.slane %v2842_v62, 4  ;;  %v5300_v13 = vld [vmem:[%s6216_s23 + $0xb4] sm:$0xe]  ;;  %v8973_v17 = vld [vmem:[#allocation10_spill] sm:$0xff] }
  0xcc   : > { %5908 = vmatmul.mubr.msk.bf16.gmra.mxu1 %vm658_vm3, %v6137_v58  ;;  %v8971_v58 = vld [vmem:[#allocation7_spill] sm:$0xff]  ;;  %v2856_v63 = vrot.slane %v8973_v17, 5  ;;  %v8974_v20 = vld [vmem:[#allocation2_spill] sm:$0xff]  ;;  %v5315_v62 = vrot.slane %v5299_v26, 9  ;;  %v2863_v36 = vrot.slane %v8975_v38, 5  ;;  %v5316_v26 = vrot.slane %v5300_v13, 9 }
  0xcd   : > { %5911 = vmatprep.mubr.msk.bf16.mxu1 %vm658_vm3, %v6138_v27  ;;  %v2849_v30 = vrot.slane %v8971_v58, 5  ;;  %v7456_v50 = vsel %vm6546_vm7, %v2844_v6, %v2845_v29  ;;  %v2859_v51 = vrot.slane %v8974_v20, 5  ;;  %v8976_v17 = vld [vmem:[#allocation14_spill] sm:$0xff]  ;;  %v6140_v27 = vld [vmem:[%s6216_s23 + $0xb4] sm:$0xff]   ;;  %v2776_v39 = vsel %vm6546_vm7, %v7323_v44, %v2775_v34  ;;  %v7673_v7 = vld [vmem:[%s6216_s23 + $0x4c] sm:$0xf] }
  0xce   : > { %v7471_v29 = vsel %vm6546_vm7, %v5314_v60, %v2856_v63  ;;  %v2858_v6 = vrot.slane %v2856_v63, 4  ;;  %v2866_v20 = vrot.slane %v8976_v17, 5  ;;  %v2865_v38 = vrot.slane %v2863_v36, 4  ;;  %v6159_v44 = vld [vmem:[%s6216_s23 + $0x20] sm:$0x1] }
  0xcf   : > { %v7464_v54 = vsel %vm6546_vm7, %v5313_v56, %v2849_v30  ;;  %v2851_v58 = vrot.slane %v2849_v30, 4  ;;  %v7483_v30 = vsel %vm6546_vm7, %v5315_v62, %v2863_v36  ;;  %v2870_v60 = vrot.slane %v8977_v55, 5 }
  0xd0   : > { %v5317_v63 = vrot.slane %v5301_v57, 9  ;;  %v7499_v55 = vsel %vm6546_vm7, %v2865_v38, %v2866_v20  ;;  %v2877_v57 = vrot.slane %v7218_v22, 5  ;;  %v2773_v22 = vsel %vm6546_vm7, %v5302_v37, %v2772_v46  ;;  %v6144_v38 = vld [vmem:[%s6216_s23 + $0x30] sm:$0xff]  }
  0xd1   : > { %5946 = vmatmul.mubr.msk.bf16.gmra.mxu0 %vm658_vm3, %v7306_v42  ;;  %v7479_v56 = vsel %vm6546_vm7, %v2851_v58, %v2852_v53  ;;  %v7492_v42 = vsel %vm6546_vm7, %v2858_v6, %v2859_v51  ;;  %v2873_v53 = vrot.slane %v7209_v4, 5  ;;  %v2872_v58 = vrot.slane %v2870_v60, 4 }
  0xd2   : > { %5949 = vmatprep.mubr.msk.bf16.mxu0 %vm658_vm3, %v7312_v15  ;;  %v7503_v15 = vsel %vm6546_vm7, %v5316_v26, %v2870_v60  ;;  %v2880_v51 = vrot.slane %v7230_v45, 5  ;;  %v5287_v45 = vld [vmem:[%s6216_s23 + $0x18] sm:$0xe]  ;;  %v7543_v9 = vsel %vm6546_vm7, %v5317_v63, %v2877_v57  ;;  %v2879_v46 = vrot.slane %v2877_v57, 4  ;;  %v6143_v26 = vld [vmem:[%s6216_s23 + $0x24] sm:$0xff]  }
  0xd3   : > { %v7531_v32 = vsel %vm6546_vm7, %v2872_v58, %v2873_v53  ;;  %v5303_v37 = vrot.slane %v5287_v45, 9  ;;  %v5319_v34 = vcombine.low %v2773_v22, %v2776_v39  ;;  %v8978_v60 = vld [vmem:[#allocation9_spill] sm:$0xff] }
  0xd4   : > { %5912 = vmatmul.mubr.msk.bf16.gmra.mxu1 %vm658_vm3, %v6139_v19  ;;  %v5269_v19 = vcombine.low %v2401_v16, %v2411_v21  ;;  %v7548_v47 = vsel %vm6546_vm7, %v2879_v46, %v2880_v51  ;;  %v2782_v21 = vrot.slane %v6159_v44, 5  ;;  %v4536_v53 = vsel %vm707_vm0, %v8978_v60, 0  ;;  %v5416_v63 = vld [vmem:[%s6216_s23 + $0x18] sm:$0xf]  ;;  %v5417_v57 = vld [vmem:[%s6216_s23 + $0x1c] sm:$0xf] }
  0xd5   : > { %5915 = vmatprep.mubr.msk.bf16.mxu1 %vm658_vm3, %v6140_v27  ;;  %v6158_v27 = vld [vmem:[%s6216_s23 + $0x1c] sm:$0xf]  ;;  %v5419_v51 = vld [vmem:[%s6216_s23 + $0x24] sm:$0xf]  ;;  %v3584_v45 = vshrl.u32 %v5416_v63, 16  ;;  %v3593_v39 = vshll.u32 %v5417_v57, 16 }
  0xd6   : > { %v2779_v36 = vrot.slane %v6158_v27, 5  ;;  %v3587_v27 = vshll.u32 %v5416_v63, 16  ;;  %v3608_v46 = vshrl.u32 %v5419_v51, 16  ;;  %v6146_v44 = vld [vmem:[%s6216_s23 + $0x48] sm:$0xff]   ;;  %v5497_v60 = vld [vmem:[%s6216_s23 + $0x18] sm:$0xe] }
  0xd7   : > { %v7589_v63 = vld [vmem:[%s6216_s23 + $0x2c] sm:$0x1] }
  0xd8   : > { %v2781_v16 = vrot.slane %v2779_v36, 4  ;;  %v2780_v17 = vsel %vm6546_vm7, %v5303_v37, %v2779_v36  ;;  %v7573_v36 = vld [vmem:[%s6216_s23 + $0x28] sm:$0xf]  ;;  %v6145_v37 = vld [vmem:[%s6216_s23 + $0x3c] sm:$0xff]   ;;  %v3610_v18 = vrot.slane %v3608_v46, 4 }
  0xd9   : > { %5950 = vmatmul.mubr.msk.bf16.gmra.mxu0 %vm658_vm3, %v5269_v19  ;;  %v8979_v19 = vld [vmem:[#allocation11_spill] sm:$0xff] }
  0xda   : > { %5989 = vmatprep.mubr.msk.bf16.mxu0 %vm658_vm3, %v6142_v49  ;;  %v2783_v20 = vsel %vm6546_vm7, %v2781_v16, %v2782_v21  ;;  %v4066_v22 = vsel %vm707_vm0, %v8979_v19, 0  ;;  %v3597_v49 = vshrl.u32 %v5417_v57, 16  ;;  %v3621_v16 = vshrl.u32 %v7573_v36, 16  ;;  %v5418_v21 = vld [vmem:[%s6216_s23 + $0x20] sm:$0x1] }
  0xdb   : > { %v5320_v58 = vcombine.low %v2780_v17, %v2783_v20  ;;  %v3586_v17 = vrot.slane %v3584_v45, 4  ;;  %v3589_v20 = vrot.slane %v3587_v27, 5  ;;  %v5422_v19 = vld [vmem:[%s6216_s23 + $0x30] sm:$0xf]  ;;  %v3603_v45 = vshll.u32 %v5418_v21, 16 }
  0xdc   : > { %5916 = vmatmul.mubr.msk.bf16.gmra.mxu1 %vm658_vm3, %v6141_v52  ;;  %v3611_v52 = vshll.u32 %v5419_v51, 16  ;;  %v3623_v51 = vrot.slane %v3621_v16, 4  ;;  %v5513_v27 = vrot.slane %v5497_v60, 9  ;;  %v4330_v46 = vrot.slane %v5418_v21, 5  ;;  %v5498_v16 = vld [vmem:[%s6216_s23 + $0x24] sm:$0xe] }
  0xdd   : > { %5955 = vmatprep.mubr.msk.bf16.mxu1 %vm658_vm3, %v5319_v34  ;;  %v3617_v34 = vshll.u32 %v7573_v36, 16  ;;  %v6147_v21 = vld [vmem:[%s6216_s23 + $0x54] sm:$0xff]   ;;  %v3635_v10 = vshll.u32 %v5422_v19, 16  ;;  %v6148_v60 = vld [vmem:[%s6216_s23 + $0x60] sm:$0xff]  }
  0xde   : > { %v3613_v11 = vrot.slane %v3611_v52, 5  ;;  %v3627_v52 = vshll.u32 %v7589_v63, 16 }
  0xe1   : > { %5990 = vmatmul.mubr.msk.bf16.vlgmr.msra.gmra.mxu0 %vm658_vm3, %v6143_v26  ;;  %v7585_v26 = vrot.slane %v3593_v39, 5 }
  0xe2   : > { %6056 = vmatpush3.bf16.msra.mxu0 %v4536_v53  ;;  %5993 = vmatprep.mubr.msk.bf16.mxu0 %vm658_vm3, %v6144_v38  ;;  %v3599_v38 = vrot.slane %v3597_v49, 4  ;;  %v4327_v53 = vrot.slane %v5417_v57, 5  ;;  %v7599_v57 = vld [vmem:[%s6216_s23 + $0x34] sm:$0xf] }
  0xe4   : > { %5956 = vmatmul.mubr.msk.bf16.vlgmr.msra.gmra.mxu1 %vm658_vm3, %v5320_v58  ;;  %v7594_v58 = vrot.slane %v3617_v34, 5  ;;  %v3600_v39 = vor.u32 %v3599_v38, %v7585_v26  ;;  %v4329_v49 = vrot.slane %v4327_v53, 4  ;;  %v3614_v34 = vor.u32 %v3613_v11, %v3610_v18 }
  0xe5   : > { %6022 = vmatpush3.bf16.msra.mxu1 %v4066_v22  ;;  %5959 = vmatprep.mubr.msk.bf16.mxu1 %vm658_vm3, %v5321_v5  ;;  %v7592_v5 = vpop.f32.mrf.mxu0  ;;  %v3590_v22 = vor.u32 %v3589_v20, %v3586_v17  ;;  %v3632_v17 = vshrl.u32 %v5422_v19, 16  ;;  %v3645_v38 = vshrl.u32 %v7599_v57, 16  ;;  %v7624_v61 = vsel %vm6546_vm7, %v5513_v27, %v4327_v53  ;;  %v5425_v19 = vld [vmem:[%s6216_s23 + $0x3c] sm:$0xf] }
  0xe6   : > { %v3624_v41 = vor.u32 %v3623_v51, %v7594_v58  ;;  %v3601_v8 = vrot.slane %v3600_v39, 4  ;;  %v3629_v11 = vrot.slane %v3627_v52, 5  ;;  %v5514_v51 = vrot.slane %v5498_v16, 9  ;;  %v7638_v39 = vld [vmem:[%s6216_s23 + $0x38] sm:$0x1] }
  0xe7   : > { %v7616_v20 = vpop.f32.mrf.mxu0  ;;  %v3591_v18 = vrot.slane %v3590_v22, 4  ;;  %v3615_v12 = vrot.slane %v3614_v34, 4  ;;  %v4337_v22 = vrot.slane %v7589_v63, 5  ;;  %v3647_v52 = vrot.slane %v3645_v38, 4 }
  0xe8   : > { %v3625_v27 = vrot.slane %v3624_v41, 4  ;;  %v3656_v34 = vshrl.u32 %v5425_v19, 16  ;;  %v3659_v16 = vshll.u32 %v5425_v19, 16  ;;  %v7651_v41 = vld [vmem:[%s6216_s23 + $0x40] sm:$0xf] }
  0xe9   : > { %5994 = vmatmul.mubr.msk.bf16.gmra.mxu0 %vm658_vm3, %v6145_v37  ;;  %v7635_v53 = vpop.f32.mrf.mxu0  ;;  %v3596_v63 = vsel %vm6260_vm4, %v3591_v18, %v7585_v26  ;;  %v3620_v26 = vsel %vm6260_vm4, %v3615_v12, %v7594_v58  ;;  %v5499_v18 = vld [vmem:[%s6216_s23 + $0x30] sm:$0xe]  ;;  %v3665_v24 = vshll.u32 %v7651_v41, 16  ;;  %v3669_v33 = vshrl.u32 %v7651_v41, 16 }
  0xea   : > { %5997 = vmatprep.mubr.msk.bf16.mxu0 %vm658_vm3, %v6146_v44  ;;  %v7607_v37 = vpop.f32.mrf.mxu1  ;;  %v4334_v44 = vrot.slane %v7573_v36, 5  ;;  %v3605_v36 = vrot.slane %v3603_v45, 5  ;;  %v3634_v45 = vrot.slane %v3632_v17, 4  ;;  %v3630_v58 = vsel %vm6260_vm4, %v3625_v27, %v3629_v11 }
  0xeb   : > { %8980 = vst [vmem:[#allocation4_spill] sm:$0xff] %v7607_v37  ;;  %v7680_v12 = vpop.f32.mrf.mxu0  ;;  %v3661_v19 = vrot.slane %v3659_v16, 5  ;;  %v3693_v11 = vshrl.u32 %v7673_v7, 16 }
  0xec   : > { %5960 = vmatmul.mubr.msk.bf16.gmra.mxu1 %vm658_vm3, %v5322_v48  ;;  %v3641_v48 = vshll.u32 %v7599_v57, 16  ;;  %v7631_v6 = vpop.f32.mrf.mxu1  ;;  %v4336_v4 = vrot.slane %v4334_v44, 4  ;;  %v3606_v17 = vsel %vm6260_vm4, %v3601_v8, %v3605_v36  ;;  %v4341_v36 = vrot.slane %v7599_v57, 5  ;;  %v6150_v8 = vld [vmem:[%s6216_s23 + $0x78] sm:$0xff]  }
  0xed   : > { %5963 = vmatprep.mubr.msk.bf16.mxu1 %vm658_vm3, %v5323_v40  ;;  %v7628_v40 = vsel %vm6546_vm7, %v4329_v49, %v4330_v46  ;;  %8981 = vst [vmem:[#allocation3_spill] sm:$0xff] %v7631_v6  ;;  %v3637_v49 = vrot.slane %v3635_v10, 5  ;;  %v7694_v27 = vcombine.low %v3596_v63, %v3606_v17  ;;  %v7696_v57 = vcombine.low %v3620_v26, %v3630_v58  ;;  %v7710_v17 = vld [vmem:[%s6216_s23 + $0x58] sm:$0xf]  ;;  %v7716_v58 = vld [vmem:[%s6216_s23 + $0x44] sm:$0x1] }
  0xee   : > { %v7640_v46 = vrot.slane %v3641_v48, 5  ;;  %v7657_v10 = vpop.f32.mrf.mxu1  ;;  %v7664_v48 = vsel %vm6546_vm7, %v5514_v51, %v4334_v44  ;;  %v7668_v38 = vsel %vm6546_vm7, %v4336_v4, %v4337_v22  ;;  %v3658_v51 = vrot.slane %v3656_v34, 4  ;;  %v5431_v34 = vld [vmem:[%s6216_s23 + $0x54] sm:$0xf] }
  0xef   : > { %8982 = vst [vmem:[#allocation6_spill] sm:$0xff] %v7657_v10  ;;  %v3638_v44 = vor.u32 %v3637_v49, %v3634_v45  ;;  %v3683_v22 = vshll.u32 %v5428_v3, 16  ;;  %v4343_v13 = vrot.slane %v4341_v36, 4  ;;  %v4344_v63 = vrot.slane %v7638_v39, 5  ;;  %v5500_v49 = vld [vmem:[%s6216_s23 + $0x3c] sm:$0xe] }
  0xf0   : > { %v3648_v4 = vor.u32 %v3647_v52, %v7640_v46  ;;  %v7692_v45 = vpop.f32.mrf.mxu1  ;;  %v5515_v52 = vrot.slane %v5499_v18, 9  ;;  %v3662_v18 = vor.u32 %v3661_v19, %v3658_v51  ;;  %v8985_v6 = vcombine.low %v7405_v28, %v7421_v1 }
  0xf1   : > { %5998 = vmatmul.mubr.msk.bf16.gmra.mxu0 %vm658_vm3, %v6147_v21  ;;  %v3689_v21 = vshll.u32 %v7673_v7, 16  ;;  %8983 = vst [vmem:[#allocation5_spill] sm:$0xff] %v7692_v45  ;;  %v3685_v45 = vrot.slane %v3683_v22, 5  ;;  %v3704_v51 = vshrl.u32 %v5431_v34, 16  ;;  %v3707_v19 = vshll.u32 %v5431_v34, 16 }
  0xf2   : > { %6001 = vmatprep.mubr.msk.bf16.mxu0 %vm658_vm3, %v6148_v60  ;;  %v3651_v60 = vshll.u32 %v7638_v39, 16  ;;  %v7713_v26 = vrot.slane %v3648_v4, 4  ;;  %v3695_v39 = vrot.slane %v3693_v11, 4  ;;  %v7751_v22 = vsel %vm6546_vm7, %v4343_v13, %v4344_v63 }
  0xf3   : > { %v7721_v10 = vrot.slane %v3689_v21, 5  ;;  %v8987_v21 = vcombine.low %v7414_v25, %v7433_v14  ;;  %v4348_v25 = vrot.slane %v7651_v41, 5  ;;  %v6152_v14 = vld [vmem:[%s6216_s23 + $0x90] sm:$0xff]   ;;  %v5516_v1 = vrot.slane %v5500_v49, 9  ;;  %v5434_v41 = vld [vmem:[%s6216_s23 + $0x60] sm:$0xf] }
  0xf4   : > { %5964 = vmatmul.mubr.msk.bf16.gmra.mxu1 %vm658_vm3, %v5324_v35  ;;  %v6149_v35 = vld [vmem:[%s6216_s23 + $0x6c] sm:$0xff]   ;;  %v7706_v62 = vrot.slane %v3651_v60, 5  ;;  %v3706_v37 = vrot.slane %v3704_v51, 4 }
  0xf5   : > { %5967 = vmatprep.mubr.msk.bf16.mxu1 %vm658_vm3, %v5325_v23  ;;  %v3680_v23 = vshrl.u32 %v5428_v3, 16  ;;  %v7704_v3 = vrot.slane %v3638_v44, 4  ;;  %v3671_v44 = vrot.slane %v3669_v33, 4  ;;  %v3717_v33 = vshrl.u32 %v7710_v17, 16 }
  0xf6   : > { %v7702_v16 = vpop.f32.mrf.mxu0  ;;  %v3696_v13 = vor.u32 %v3695_v39, %v7721_v10  ;;  %v4355_v39 = vrot.slane %v7673_v7, 5  ;;  %v8991_v7 = vcombine.low %v7425_v43, %v7442_v2  ;;  %v8993_v43 = vcombine.low %v7446_v59, %v7456_v50  ;;  %v6153_v2 = vld [vmem:[%s6216_s23 + $0x9c] sm:$0xff]  }
  0xf7   : > { %8984 = vst [vmem:[#allocation8_spill] sm:$0xff] %v7702_v16  ;;  %v3682_v60 = vrot.slane %v3680_v23, 4  ;;  %v6151_v23 = vld [vmem:[%s6216_s23 + $0x84] sm:$0xff]   ;;  %v7778_v16 = vld [vmem:[%s6216_s23 + $0x5c] sm:$0x1]  ;;  %v4362_v59 = vrot.slane %v7710_v17, 5 }
  0xf8   : > { %v7739_v28 = vpop.f32.mrf.mxu0 }
  0xf9   : > { %6002 = vmatmul.mubr.msk.bf16.gmra.mxu0 %vm658_vm3, %v6149_v35  ;;  %v7718_v35 = vrot.slane %v3665_v24, 5  ;;  %v3713_v24 = vshll.u32 %v7710_v17, 16  ;;  %8988 = vst [vmem:[#allocation12_spill] sm:$0xff] %v7739_v28  ;;  %v3709_v28 = vrot.slane %v3707_v19, 5 }
  0xfa   : > { %6005 = vmatprep.mubr.msk.bf16.mxu0 %vm658_vm3, %v6150_v8  ;;  %v7727_v4 = vpop.f32.mrf.mxu1  ;;  %v7730_v8 = vld [vmem:[%s6216_s23 + $0x50] sm:$0x1]  ;;  %v7771_v49 = vpop.f32.mrf.mxu0 }
  0xfb   : > { %8986 = vst [vmem:[#allocation7_spill] sm:$0xff] %v7727_v4  ;;  %v3672_v34 = vor.u32 %v3671_v44, %v7718_v35  ;;  %v7761_v4 = vrot.slane %v3662_v18, 4  ;;  %v7768_v11 = vrot.slane %v3713_v24, 5  ;;  %v3719_v44 = vrot.slane %v3717_v33, 4  ;;  %8990 = vst [vmem:[#allocation2_spill] sm:$0xff] %v7771_v49 }
  0xfc   : > { %5968 = vmatmul.mubr.msk.bf16.gmra.mxu1 %vm658_vm3, %v8985_v6  ;;  %v7747_v6 = vsel %vm6546_vm7, %v5515_v52, %v4341_v36  ;;  %v3686_v36 = vor.u32 %v3685_v45, %v3682_v60  ;;  %v3699_v52 = vshll.u32 %v7730_v8, 16  ;;  %v7766_v63 = vpop.f32.mrf.mxu1  ;;  %v4350_v18 = vrot.slane %v4348_v25, 4  ;;  %v5501_v24 = vld [vmem:[%s6216_s23 + $0x48] sm:$0xe] }
  0xfd   : > { %5971 = vmatprep.mubr.msk.bf16.mxu1 %vm658_vm3, %v8987_v21  ;;  %v3675_v21 = vshll.u32 %v7716_v58, 16  ;;  %8989 = vst [vmem:[#allocation10_spill] sm:$0xff] %v7766_v63  ;;  %v4351_v60 = vrot.slane %v7716_v58, 5  ;;  %v3673_v51 = vrot.slane %v3672_v34, 4  ;;  %v3728_v33 = vshrl.u32 %v5434_v41, 16 }
  0xfe   : > { %v7784_v63 = vsel %vm6546_vm7, %v5516_v1, %v4348_v25  ;;  %v3687_v45 = vrot.slane %v3686_v36, 4  ;;  %v3697_v49 = vrot.slane %v3696_v13, 4  ;;  %v3701_v58 = vrot.slane %v3699_v52, 5  ;;  %v7799_v36 = vld [vmem:[%s6216_s23 + $0x64] sm:$0xf]  ;;  %v7806_v13 = vpop.f32.mrf.mxu0 }
  0xff   : > { %v3677_v19 = vrot.slane %v3675_v21, 5  ;;  %v3668_v34 = vsel %vm6260_vm4, %v7761_v4, %v7718_v35  ;;  %v3710_v21 = vor.u32 %v3709_v28, %v3706_v37  ;;  %v3720_v1 = vor.u32 %v3719_v44, %v7768_v11  ;;  %8994 = vst [vmem:[#allocation14_spill] sm:$0xff] %v7806_v13  ;;  %v5502_v28 = vld [vmem:[%s6216_s23 + $0x54] sm:$0xe]  ;;  %v6157_v13 = vld [vmem:[%s6216_s23 + $0xcc] sm:$0xff]  }
 0x100   : > { %v3723_v25 = vshll.u32 %v7778_v16, 16  ;;  %v7810_v52 = vsel %vm6546_vm7, %v4350_v18, %v4351_v60  ;;  %v5517_v35 = vrot.slane %v5501_v24, 9  ;;  %v4357_v37 = vrot.slane %v4355_v39, 4 }
 0x101   : > { %6006 = vmatmul.mubr.msk.bf16.gmra.mxu0 %vm658_vm3, %v6151_v23  ;;  %v3731_v23 = vshll.u32 %v5434_v41, 16  ;;  %v4358_v4 = vrot.slane %v7730_v8, 5  ;;  %v6154_v41 = vld [vmem:[%s6216_s23 + $0xa8] sm:$0xff]   ;;  %v3678_v44 = vsel %vm6260_vm4, %v3673_v51, %v3677_v19  ;;  %v3730_v50 = vrot.slane %v3728_v33, 4 }
 0x102   : > { %6009 = vmatprep.mubr.msk.bf16.mxu0 %vm658_vm3, %v6152_v14  ;;  %v7790_v14 = vpop.f32.mrf.mxu1  ;;  %v3702_v18 = vsel %vm6260_vm4, %v3697_v49, %v3701_v58  ;;  %v3737_v60 = vshll.u32 %v7799_v36, 16  ;;  %v3741_v8 = vshrl.u32 %v7799_v36, 16  ;;  %v3721_v51 = vrot.slane %v3720_v1, 4  ;;  %v7828_v33 = vld [vmem:[%s6216_s23 + $0x68] sm:$0x1] }
 0x103   : > { %8992 = vst [vmem:[#allocation13_spill] sm:$0xff] %v7790_v14  ;;  %v3711_v14 = vrot.slane %v3710_v21, 4  ;;  %v3725_v17 = vrot.slane %v3723_v25, 5  ;;  %v5518_v19 = vrot.slane %v5502_v28, 9  ;;  %v8997_v49 = vsel %vm6260_vm4, %v7713_v26, %v7706_v62  ;;  %v5437_v25 = vld [vmem:[%s6216_s23 + $0x6c] sm:$0xf] }
 0x104   : > { %5972 = vmatmul.mubr.msk.bf16.gmra.mxu1 %vm658_vm3, %v8991_v7  ;;  %v3733_v7 = vrot.slane %v3731_v23, 5  ;;  %v7825_v24 = vpop.f32.mrf.mxu1  ;;  %v7849_v21 = vsel %vm6546_vm7, %v5517_v35, %v4355_v39  ;;  %v7853_v1 = vsel %vm6546_vm7, %v4357_v37, %v4358_v4  ;;  %v7856_v62 = vcombine.low %v3668_v34, %v3678_v44  ;;  %v5503_v4 = vld [vmem:[%s6216_s23 + $0x60] sm:$0xe]  ;;  %v5443_v44 = vld [vmem:[%s6216_s23 + $0x84] sm:$0xf] }
 0x105   : > { %5975 = vmatprep.mubr.msk.bf16.mxu1 %vm658_vm3, %v8993_v43  ;;  %v3692_v43 = vsel %vm6260_vm4, %v3687_v45, %v7721_v10  ;;  %8995 = vst [vmem:[#allocation15_spill] sm:$0xff] %v7825_v24  ;;  %v8998_v45 = vsel %vm6260_vm4, %v7704_v3, %v7640_v46  ;;  %v4364_v46 = vrot.slane %v4362_v59, 4  ;;  %v4365_v3 = vrot.slane %v7778_v16, 5 }
 0x106   : > { %v7843_v23 = vcombine.low %v8998_v45, %v8997_v49  ;;  %8999 = vst [vmem:[#allocation11_spill] sm:$0xff] %v7856_v62  ;;  %v3734_v26 = vor.u32 %v3733_v7, %v3730_v50  ;;  %v7863_v28 = vcombine.low %v3692_v43, %v3702_v18  ;;  %v7865_v39 = vrot.slane %v3737_v60, 5 }
 0x107   : > { %v7831_v10 = vpop.f32.mrf.mxu0  ;;  %v7867_v35 = vrot.slane %v3741_v8, 4  ;;  %v3747_v37 = vshll.u32 %v7828_v33, 16  ;;  %v9001_v34 = vcombine.low %v7464_v54, %v7479_v56  ;;  %v3716_v50 = vsel %vm6260_vm4, %v3711_v14, %v7768_v11  ;;  %v5440_v54 = vld [vmem:[%s6216_s23 + $0x78] sm:$0xf] }
 0x108   : > { %8996 = vst [vmem:[#allocation9_spill] sm:$0xff] %v7831_v10  ;;  %9000 = vst [vmem:[#allocation16_spill] sm:$0xff] %v7863_v28  ;;  %v3726_v7 = vsel %vm6260_vm4, %v3721_v51, %v3725_v17  ;;  %v7887_v43 = vsel %vm6546_vm7, %v5518_v19, %v4362_v59  ;;  %v9003_v56 = vcombine.low %v7471_v29, %v7492_v42  ;;  %v3752_v60 = vshrl.u32 %v5437_v25, 16  ;;  %v7899_v51 = vld [vmem:[%s6216_s23 + $0x7c] sm:$0xf]  ;;  %v6156_v59 = vld [vmem:[%s6216_s23 + $0xc0] sm:$0xff]  }
 0x109   : > { %6010 = vmatmul.mubr.msk.bf16.gmra.mxu0 %vm658_vm3, %v6153_v2  ;;  %v7861_v2 = vld [vmem:[%s6216_s23 + $0x70] sm:$0xf]  ;;  %v7894_v18 = vpop.f32.mrf.mxu0  ;;  %v3755_v8 = vshll.u32 %v5437_v25, 16  ;;  %v7904_v17 = vsel %vm6546_vm7, %v4364_v46, %v4365_v3  ;;  %v7906_v29 = vrot.slane %v3734_v26, 4  ;;  %v5519_v42 = vrot.slane %v5503_v4, 9 }
 0x10a   : > { %6013 = vmatprep.mubr.msk.bf16.mxu0 %vm658_vm3, %v6154_v41  ;;  %v6155_v41 = vld [vmem:[%s6216_s23 + $0xb4] sm:$0xff]   ;;  %9004 = vst [vmem:[#allocation18_spill] sm:$0xff] %v7894_v18  ;;  %v3761_v11 = vshll.u32 %v7861_v2, 16  ;;  %v3765_v14 = vshrl.u32 %v7861_v2, 16  ;;  %v4369_v19 = vrot.slane %v7799_v36, 5  ;;  %v7909_v49 = vcombine.low %v3716_v50, %v3726_v7 }
 0x10b   : > { %v3744_v45 = vor.u32 %v7867_v35, %v7865_v39  ;;  %v7913_v25 = vrot.slane %v3747_v37, 5  ;;  %v3776_v46 = vshrl.u32 %v5440_v54, 16  ;;  %v3779_v3 = vshll.u32 %v5440_v54, 16  ;;  %v7925_v4 = vld [vmem:[%s6216_s23 + $0x88] sm:$0xf]  ;;  %v7928_v35 = vpop.f32.mrf.mxu0 }
 0x10c   : > { %5976 = vmatmul.mubr.msk.bf16.gmra.mxu1 %vm658_vm3, %v9001_v34  ;;  %v7875_v16 = vpop.f32.mrf.mxu1  ;;  %9005 = vst [vmem:[#allocation19_spill] sm:$0xff] %v7909_v49  ;;  %v4372_v34 = vrot.slane %v7828_v33, 5  ;;  %v3785_v36 = vshll.u32 %v7899_v51, 16  ;;  %v3789_v26 = vshrl.u32 %v7899_v51, 16  ;;  %9007 = vst [vmem:[#allocation21_spill] sm:$0xff] %v7928_v35  ;;  %v3754_v33 = vrot.slane %v3752_v60, 4 }
 0x10d   : > { %9002 = vst [vmem:[#allocation17_spill] sm:$0xff] %v7875_v16  ;;  %5979 = vmatprep.mubr.msk.bf16.mxu1 %vm658_vm3, %v9003_v56  ;;  %v7917_v56 = vld [vmem:[%s6216_s23 + $0x74] sm:$0x1]  ;;  %v3757_v37 = vrot.slane %v3755_v8, 5  ;;  %v7930_v50 = vrot.slane %v3761_v11, 5  ;;  %v3767_v7 = vrot.slane %v3765_v14, 4  ;;  %v9008_v54 = vcombine.low %v7483_v30, %v7499_v55  ;;  %v7958_v49 = vpop.f32.mrf.mxu0 }
 0x10e   : > { %v7920_v58 = vpop.f32.mrf.mxu1  ;;  %v4371_v16 = vrot.slane %v4369_v19, 4  ;;  %v7943_v60 = vld [vmem:[%s6216_s23 + $0x80] sm:$0x1]  ;;  %v7946_v8 = vld [vmem:[%s6216_s23 + $0x6c] sm:$0xe]  ;;  %v3800_v11 = vshrl.u32 %v5443_v44, 16 }
 0x10f   : > { %9006 = vst [vmem:[#allocation20_spill] sm:$0xff] %v7920_v58  ;;  %v7939_v58 = vsel %vm6546_vm7, %v5519_v42, %v4369_v19  ;;  %v3803_v14 = vshll.u32 %v5443_v44, 16  ;;  %v3813_v24 = vshrl.u32 %v7925_v4, 16  ;;  %v3778_v19 = vrot.slane %v3776_v46, 4  ;;  %9010 = vst [vmem:[#allocation23_spill] sm:$0xff] %v7958_v49 }
 0x110   : > { %v7954_v42 = vpop.f32.mrf.mxu1  ;;  %v3781_v35 = vrot.slane %v3779_v3, 5  ;;  %v7956_v18 = vrot.slane %v3785_v36, 5  ;;  %v3791_v10 = vrot.slane %v3789_v26, 4  ;;  %v9011_v44 = vcombine.low %v7503_v15, %v7531_v32  ;;  %v7977_v32 = vld [vmem:[%s6216_s23 + $0x8c] sm:$0x1] }
 0x111   : > { %6014 = vmatmul.mubr.msk.bf16.gmra.mxu0 %vm658_vm3, %v6155_v41  ;;  %v3771_v41 = vshll.u32 %v7917_v56, 16  ;;  %9009 = vst [vmem:[#allocation22_spill] sm:$0xff] %v7954_v42  ;;  %v3758_v30 = vor.u32 %v3757_v37, %v3754_v33  ;;  %v3768_v55 = vor.u32 %v3767_v7, %v7930_v50  ;;  %v3795_v46 = vshll.u32 %v7943_v60, 16  ;;  %v5505_v33 = vld [vmem:[%s6216_s23 + $0x78] sm:$0xe] }
 0x112   : > { %6017 = vmatprep.mubr.msk.bf16.mxu0 %vm658_vm3, %v6156_v59  ;;  %v3809_v59 = vshll.u32 %v7925_v4, 16  ;;  %v7968_v3 = vrot.slane %v3744_v45, 4  ;;  %v7972_v36 = vsel %vm6546_vm7, %v4371_v16, %v4372_v34  ;;  %v5520_v26 = vrot.slane %v7946_v8, 9  ;;  %v7982_v42 = vpop.f32.mrf.mxu1  ;;  %v5446_v8 = vld [vmem:[%s6216_s23 + $0x90] sm:$0xf] }
 0x113   : > { %v4383_v15 = vrot.slane %v7899_v51, 5  ;;  %v3802_v37 = vrot.slane %v3800_v11, 4  ;;  %v3805_v7 = vrot.slane %v3803_v14, 5  ;;  %9012 = vst [vmem:[#allocation24_spill] sm:$0xff] %v7982_v42  ;;  %v3773_v45 = vrot.slane %v3771_v41, 5 }
 0x114   : > { %5980 = vmatmul.mubr.msk.bf16.gmra.mxu1 %vm658_vm3, %v9008_v54  ;;  %v4376_v54 = vrot.slane %v7861_v2, 5  ;;  %v7980_v2 = vrot.slane %v3809_v59, 5  ;;  %v4379_v49 = vrot.slane %v7917_v56, 5  ;;  %v3782_v16 = vor.u32 %v3781_v35, %v3778_v19  ;;  %v7991_v59 = vld [vmem:[%s6216_s23 + $0x94] sm:$0xf] }
 0x115   : > { %5983 = vmatprep.mubr.msk.bf16.mxu1 %vm658_vm3, %v9011_v44  ;;  %v3815_v44 = vrot.slane %v3813_v24, 4  ;;  %v3792_v34 = vor.u32 %v3791_v10, %v7956_v18  ;;  %v3759_v51 = vrot.slane %v3758_v30, 4  ;;  %v3769_v11 = vrot.slane %v3768_v55, 4 }
 0x116   : > { %v4378_v62 = vrot.slane %v4376_v54, 4  ;;  %v3797_v14 = vrot.slane %v3795_v46, 5  ;;  %v9013_v24 = vcombine.low %v7624_v61, %v7628_v40  ;;  %v5521_v56 = vrot.slane %v5505_v33, 9 }
 0x117   : > { %v4385_v35 = vrot.slane %v4383_v15, 4  ;;  %v4386_v10 = vrot.slane %v7943_v60, 5  ;;  %v3819_v41 = vshll.u32 %v7977_v32, 16  ;;  %v3816_v30 = vor.u32 %v3815_v44, %v7980_v2 }
 0x118   : > { %v3824_v55 = vshrl.u32 %v5446_v8, 16  ;;  %v3827_v46 = vshll.u32 %v5446_v8, 16  ;;  %v9015_v61 = vcombine.low %v7543_v9, %v7548_v47  ;;  %v3783_v40 = vrot.slane %v3782_v16, 4 }
 0x119   : > { %v7987_v28 = vpop.f32.mrf.mxu0  ;;  %6018 = vmatmul.mubr.msk.bf16.gmra.mxu0 %vm658_vm3, %v6157_v13  ;;  %v3806_v13 = vor.u32 %v3805_v7, %v3802_v37  ;;  %v3793_v33 = vrot.slane %v3792_v34, 4  ;;  %v3833_v60 = vshll.u32 %v7991_v59, 16  ;;  %v3750_v37 = vsel %vm6260_vm4, %v7968_v3, %v7913_v25 }
 0x11a   : > { %6057 = vmatprep.mubr.msk.bf16.mxu0 %vm658_vm3, %v9013_v24  ;;  %v3837_v24 = vshrl.u32 %v7991_v59, 16  ;;  %v3764_v9 = vsel %vm6260_vm4, %v3759_v51, %v7930_v50  ;;  %v8023_v47 = vsel %vm6546_vm7, %v5520_v26, %v4376_v54  ;;  %v8027_v7 = vsel %vm6546_vm7, %v4378_v62, %v4379_v49  ;;  %v5506_v54 = vld [vmem:[%s6216_s23 + $0x84] sm:$0xe]  ;;  %v9054_v31 = vld [vmem:[#allocation24_spill] sm:$0xff] }
 0x11b   : > { %v7999_v19 = vpop.f32.mrf.mxu0  ;;  %v8035_v25 = vsel %vm6546_vm7, %v5521_v56, %v4383_v15  ;;  %v8039_v50 = vsel %vm6546_vm7, %v4385_v35, %v4386_v10  ;;  %v3821_v3 = vrot.slane %v3819_v41, 5  ;;  %v3807_v62 = vrot.slane %v3806_v13, 4  ;;  %v8063_v13 = vld [vmem:[%s6216_s23 + $0x98] sm:$0x1] }
 0x11c   : > { %9014 = vst [vmem:[#allocation25_spill] sm:$0xff] %v7999_v19  ;;  %v8002_v42 = vpop.f32.mrf.mxu1  ;;  %5984 = vmatmul.mubr.msk.bf16.gmra.mxu1 %vm658_vm3, %v9015_v61  ;;  %v3817_v49 = vrot.slane %v3816_v30, 4  ;;  %v3826_v16 = vrot.slane %v3824_v55, 4  ;;  %v3829_v34 = vrot.slane %v3827_v46, 5  ;;  %v3788_v15 = vsel %vm6260_vm4, %v3783_v40, %v7956_v18  ;;  %v5449_v30 = vld [vmem:[%s6216_s23 + $0x9c] sm:$0xf] }
 0x11d   : > { %v8010_v19 = vpop.f32.mrf.mxu0  ;;  %6023 = vmatprep.mubr.msk.bf16.mxu1 %vm658_vm3, %v7694_v27  ;;  %v3774_v27 = vsel %vm6260_vm4, %v3769_v11, %v3773_v45  ;;  %v3798_v45 = vsel %vm6260_vm4, %v3793_v33, %v3797_v14  ;;  %v8051_v51 = vrot.slane %v3833_v60, 5  ;;  %v3839_v11 = vrot.slane %v3837_v24, 4  ;;  %v8094_v24 = vld [vmem:[%s6216_s23 + $0xa0] sm:$0xf] }
 0x11e   : > { %v8029_v44 = vpop.f32.mrf.mxu1  ;;  %v9016_v35 = vcombine.low %v7664_v48, %v7668_v38  ;;  %v5535_v10 = vcombine.low %v7887_v43, %v7904_v17  ;;  %v5536_v41 = vcombine.low %v7939_v58, %v7972_v36  ;;  %v5522_v18 = vrot.slane %v5506_v54, 9 }
 0x11f   : > { %v8042_v26 = vpop.f32.mrf.mxu0  ;;  %v4390_v14 = vrot.slane %v7925_v4, 5  ;;  %v9017_v48 = vcombine.low %v7747_v6, %v7751_v22  ;;  %v9018_v38 = vsel %vm6260_vm4, %v7906_v29, %v7865_v39  ;;  %v8079_v61 = vcombine.low %v3764_v9, %v3774_v27  ;;  %v5507_v29 = vld [vmem:[%s6216_s23 + $0x90] sm:$0xe]  ;;  %v9025_v4 = vld [vmem:[#allocation2_spill] sm:$0xff] }
 0x120   : > { %v8044_v8 = vpop.f32.mrf.mxu1  ;;  %v8077_v46 = vcombine.low %v9018_v38, %v3750_v37  ;;  %v8085_v60 = vcombine.low %v3788_v15, %v3798_v45  ;;  %v3812_v6 = vsel %vm6260_vm4, %v3807_v62, %v7980_v2  ;;  %v3822_v22 = vsel %vm6260_vm4, %v3817_v49, %v3821_v3 }
 0x121   : > { %v5855_v56 = vpop.f32.mrf.mxu0  ;;  %6058 = vmatmul.mubr.msk.bf16.vlgmr.msra.gmra.mxu0 %vm658_vm3, %v9016_v35  ;;  %v3830_v39 = vor.u32 %v3829_v34, %v3826_v16  ;;  %v3840_v9 = vor.u32 %v3839_v11, %v8051_v51  ;;  %v3843_v27 = vshll.u32 %v8063_v13, 16  ;;  %v3848_v54 = vshrl.u32 %v5449_v30, 16 }
 0x122   : > { %v8066_v55 = vpop.f32.mrf.mxu1  ;;  %6061 = vmatprep.mubr.msk.bf16.mxu0 %vm658_vm3, %v9017_v48  ;;  %v3851_v15 = vshll.u32 %v5449_v30, 16  ;;  %v8105_v3 = vsel %vm6546_vm7, %v5522_v18, %v4390_v14  ;;  %v4392_v62 = vrot.slane %v4390_v14, 4  ;;  %v4393_v49 = vrot.slane %v7977_v32, 5 }
 0x123   : > { %v1462_v33 = vpop.f32.mrf.mxu0  ;;  %v5523_v16 = vrot.slane %v5507_v29, 9  ;;  %v4397_v34 = vrot.slane %v7991_v59, 5  ;;  %v3857_v11 = vshll.u32 %v8094_v24, 16  ;;  %v3861_v35 = vshrl.u32 %v8094_v24, 16 }
 0x124   : > { %v5821_v37 = vpop.f32.mrf.mxu1  ;;  %6024 = vmatmul.mubr.msk.bf16.vlgmr.msra.gmra.mxu1 %vm658_vm3, %v7696_v57  ;;  %v8114_v48 = vcombine.low %v3812_v6, %v3822_v22  ;;  %v8116_v18 = vrot.slane %v3830_v39, 4  ;;  %v3841_v32 = vrot.slane %v3840_v9, 4  ;;  %v3845_v38 = vrot.slane %v3843_v27, 5  ;;  %v5452_v22 = vld [vmem:[%s6216_s23 + $0xa8] sm:$0xf] }
 0x125   : > { %v1046_v45 = vadd.f32 %v5821_v37, %v7592_v5  ;;  %v5856_v2 = vpop.f32.mrf.mxu0  ;;  %6027 = vmatprep.mubr.msk.bf16.mxu1 %vm658_vm3, %v7843_v23  ;;  %v3850_v29 = vrot.slane %v3848_v54, 4  ;;  %v3853_v59 = vrot.slane %v3851_v15, 5  ;;  %v4400_v6 = vrot.slane %v8063_v13, 5  ;;  %v8142_v27 = vld [vmem:[%s6216_s23 + $0xac] sm:$0xf] }
 0x126   : > { %v1037_v57 = vpop.f32.mrf.mxu1  ;;  %v3863_v9 = vrot.slane %v3861_v35, 4  ;;  %v9022_v35 = vld [vmem:[#allocation8_spill] sm:$0xff] }
 0x127   : > { %v8111_v5 = vadd.f32 %v5855_v56, %v1046_v45  ;;  %v1038_v23 = vadd.f32 %v1037_v57, %v7616_v20  ;;  %v1465_v30 = vpop.f32.mrf.mxu0  ;;  %v9019_v45 = vcombine.low %v7784_v63, %v7810_v52  ;;  %v8127_v20 = vsel %vm6546_vm7, %v4392_v62, %v4393_v49  ;;  %v5508_v62 = vld [vmem:[%s6216_s23 + $0x9c] sm:$0xe] }
 0x128   : > { %v5822_v14 = vpop.f32.mrf.mxu1  ;;  %v4399_v63 = vrot.slane %v4397_v34, 4  ;;  %v8139_v52 = vrot.slane %v3857_v11, 5  ;;  %v4404_v49 = vrot.slane %v8094_v24, 5  ;;  %v3881_v24 = vshll.u32 %v8142_v27, 16 }
 0x129   : > { %v8118_v37 = vadd.f32 %v1462_v33, %v1038_v23  ;;  %v1049_v40 = vadd.f32 %v5822_v14, %v7635_v53  ;;  %v5859_v56 = vpop.f32.mrf.mxu0  ;;  %6062 = vmatmul.mubr.msk.bf16.gmra.mxu0 %vm658_vm3, %v9019_v45  ;;  %v9020_v33 = vcombine.low %v7849_v21, %v7853_v1  ;;  %v8137_v53 = vsel %vm6546_vm7, %v5523_v16, %v4397_v34  ;;  %v5451_v1 = vld [vmem:[%s6216_s23 + $0xa4] sm:$0x1]  ;;  %v9021_v16 = vld [vmem:[#allocation11_spill] sm:$0xff] }
 0x12a   : > { %v1040_v39 = vpop.f32.mrf.mxu1  ;;  %v3836_v21 = vsel %vm6260_vm4, %v8116_v18, %v8051_v51  ;;  %v3872_v34 = vshrl.u32 %v5452_v22, 16  ;;  %v9023_v51 = vld [vmem:[#allocation16_spill] sm:$0xff]  ;;  %v3885_v18 = vshrl.u32 %v8142_v27, 16 }
 0x12b   : > { %6065 = vmatprep.mubr.msk.bf16.mxu0 %vm658_vm3, %v9020_v33  ;;  %v8144_v54 = vadd.f32 %v5856_v2, %v1049_v40  ;;  %v1041_v13 = vadd.f32 %v1040_v39, %v7680_v12  ;;  %v1478_v15 = vpop.f32.mrf.mxu0  ;;  %v3846_v40 = vsel %vm6260_vm4, %v3841_v32, %v3845_v38  ;;  %v3854_v2 = vor.u32 %v3853_v59, %v3850_v29  ;;  %v9024_v59 = vld [vmem:[#allocation12_spill] sm:$0xff] }
 0x12c   : > { %v5825_v57 = vpop.f32.mrf.mxu1  ;;  %6028 = vmatmul.mubr.msk.bf16.gmra.mxu1 %vm658_vm3, %v9021_v16  ;;  %v3875_v12 = vshll.u32 %v5452_v22, 16  ;;  %v8167_v39 = vsel %vm6546_vm7, %v4399_v63, %v4400_v6  ;;  %v3864_v32 = vor.u32 %v3863_v9, %v8139_v52  ;;  %v3867_v38 = vshll.u32 %v5451_v1, 16 }
 0x12d   : > { %v8158_v11 = vadd.f32 %v1465_v30, %v1041_v13  ;;  %v1062_v23 = vadd.f32 %v5825_v57, %v9022_v35  ;;  %v5860_v14 = vpop.f32.mrf.mxu0  ;;  %6031 = vmatprep.mubr.msk.bf16.mxu1 %vm658_vm3, %v9023_v51  ;;  %v5524_v30 = vrot.slane %v5508_v62, 9  ;;  %v4406_v13 = vrot.slane %v4404_v49, 4 }
 0x12e   : > { %v1053_v45 = vpop.f32.mrf.mxu1  ;;  %v4407_v57 = vrot.slane %v5451_v1, 5  ;;  %v8175_v51 = vrot.slane %v3854_v2, 4  ;;  %v3874_v6 = vrot.slane %v3872_v34, 4  ;;  %v3877_v63 = vrot.slane %v3875_v12, 5  ;;  %v8185_v1 = vld [vmem:[%s6216_s23 + $0xb0] sm:$0x1] }
 0x12f   : > { %v8170_v29 = vadd.f32 %v5859_v56, %v1062_v23  ;;  %v1054_v22 = vadd.f32 %v1053_v45, %v9024_v59  ;;  %v1481_v33 = vpop.f32.mrf.mxu0  ;;  %v8187_v23 = vrot.slane %v3881_v24, 5  ;;  %v3887_v2 = vrot.slane %v3885_v18, 4  ;;  %v9026_v12 = vld [vmem:[#allocation14_spill] sm:$0xff] }
 0x130   : > { %v5826_v16 = vpop.f32.mrf.mxu1  ;;  %v8197_v43 = vrot.slane %v3864_v32, 4  ;;  %v8199_v17 = vrot.slane %v3867_v38, 5  ;;  %v8207_v58 = vsel %vm6546_vm7, %v5524_v30, %v4404_v49  ;;  %v8211_v36 = vsel %vm6546_vm7, %v4406_v13, %v4407_v57  ;;  %v8223_v30 = vld [vmem:[%s6216_s23 + $0xb8] sm:$0xf] }
 0x131   : > { %v8177_v9 = vadd.f32 %v1478_v15, %v1054_v22  ;;  %v1065_v62 = vadd.f32 %v5826_v16, %v9025_v4  ;;  %v5863_v56 = vpop.f32.mrf.mxu0  ;;  %6066 = vmatmul.mubr.msk.bf16.gmra.mxu0 %vm658_vm3, %v5535_v10  ;;  %v8193_v15 = vcombine.low %v3836_v21, %v3846_v40  ;;  %v5509_v10 = vld [vmem:[%s6216_s23 + $0xa8] sm:$0xe]  ;;  %v3878_v32 = vor.u32 %v3877_v63, %v3874_v6  ;;  %v9028_v22 = vld [vmem:[#allocation9_spill] sm:$0xff] }
 0x132   : > { %v1056_v45 = vpop.f32.mrf.mxu1  ;;  %6069 = vmatprep.mubr.msk.bf16.mxu0 %vm658_vm3, %v5536_v41  ;;  %v5455_v41 = vld [vmem:[%s6216_s23 + $0xb4] sm:$0xf]  ;;  %v9027_v40 = vld [vmem:[#allocation19_spill] sm:$0xff]  ;;  %v3891_v38 = vshll.u32 %v8185_v1, 16  ;;  %v4411_v49 = vrot.slane %v8142_v27, 5  ;;  %v3888_v16 = vor.u32 %v3887_v2, %v8187_v23  ;;  %v3870_v27 = vsel %vm6260_vm4, %v8197_v43, %v8199_v17 }
 0x133   : > { %v8202_v34 = vadd.f32 %v5860_v14, %v1065_v62  ;;  %v1057_v24 = vadd.f32 %v1056_v45, %v9026_v12  ;;  %v1494_v18 = vpop.f32.mrf.mxu0  ;;  %v5525_v62 = vrot.slane %v5509_v10, 9  ;;  %v3896_v6 = vshrl.u32 %v5455_v41, 16 }
 0x134   : > { %v5829_v21 = vpop.f32.mrf.mxu1  ;;  %6032 = vmatmul.mubr.msk.bf16.gmra.mxu1 %vm658_vm3, %v9027_v40  ;;  %v3899_v63 = vshll.u32 %v5455_v41, 16  ;;  %v3905_v2 = vshll.u32 %v8223_v30, 16  ;;  %v3909_v10 = vshrl.u32 %v8223_v30, 16  ;;  %v5458_v40 = vld [vmem:[%s6216_s23 + $0xc0] sm:$0xf]  ;;  %v3879_v4 = vrot.slane %v3878_v32, 4 }
 0x135   : > { %v8225_v59 = vadd.f32 %v1481_v33, %v1057_v24  ;;  %v1078_v13 = vadd.f32 %v5829_v21, %v9028_v22  ;;  %v5864_v57 = vpop.f32.mrf.mxu0  ;;  %6035 = vmatprep.mubr.msk.bf16.mxu1 %vm658_vm3, %v8077_v46  ;;  %v9030_v24 = vld [vmem:[#allocation18_spill] sm:$0xff]  ;;  %v3893_v43 = vrot.slane %v3891_v38, 5  ;;  %v4413_v17 = vrot.slane %v4411_v49, 4 }
 0x136   : > { %v1069_v45 = vpop.f32.mrf.mxu1  ;;  %v4414_v33 = vrot.slane %v8185_v1, 5  ;;  %v8253_v14 = vsel %vm6546_vm7, %v5525_v62, %v4411_v49  ;;  %v8256_v32 = vld [vmem:[%s6216_s23 + $0xc4] sm:$0xf]  ;;  %v9034_v1 = vcombine.low %v8035_v25, %v8039_v50  ;;  %v8268_v62 = vrot.slane %v3905_v2, 5 }
 0x137   : > { %v8237_v12 = vadd.f32 %v5863_v56, %v1078_v13  ;;  %v1070_v21 = vadd.f32 %v1069_v45, %v9030_v24  ;;  %v1497_v46 = vpop.f32.mrf.mxu0  ;;  %v9032_v56 = vld [vmem:[#allocation21_spill] sm:$0xff]  ;;  %v9033_v45 = vcombine.low %v8023_v47, %v8027_v7  ;;  %v3889_v24 = vrot.slane %v3888_v16, 4  ;;  %v9035_v16 = vld [vmem:[#allocation23_spill] sm:$0xff] }
 0x138   : > { %v5830_v22 = vpop.f32.mrf.mxu1  ;;  %v3920_v47 = vshrl.u32 %v5458_v40, 16  ;;  %v3923_v7 = vshll.u32 %v5458_v40, 16  ;;  %v3884_v25 = vsel %vm6260_vm4, %v3879_v4, %v8187_v23  ;;  %v8277_v50 = vsel %vm6546_vm7, %v4413_v17, %v4414_v33  ;;  %v5510_v40 = vld [vmem:[%s6216_s23 + $0xb4] sm:$0xe] }
 0x139   : > { %9029 = vst [vmem:[#allocation11_spill] sm:$0xff] %v8237_v12  ;;  %v8244_v35 = vadd.f32 %v1494_v18, %v1070_v21  ;;  %v1081_v41 = vadd.f32 %v5830_v22, %v9032_v56  ;;  %v5867_v13 = vpop.f32.mrf.mxu0  ;;  %6070 = vmatmul.mubr.msk.bf16.gmra.mxu0 %vm658_vm3, %v9033_v45  ;;  %v8263_v18 = vld [vmem:[%s6216_s23 + $0xbc] sm:$0x1]  ;;  %v3898_v21 = vrot.slane %v3896_v6, 4  ;;  %v3901_v22 = vrot.slane %v3899_v63, 5 }
 0x13a   : > { %v1072_v38 = vpop.f32.mrf.mxu1  ;;  %6073 = vmatprep.mubr.msk.bf16.mxu0 %vm658_vm3, %v9034_v1  ;;  %v3933_v6 = vshrl.u32 %v8256_v32, 16  ;;  %v3915_v23 = vshll.u32 %v8263_v18, 16  ;;  %v4418_v17 = vrot.slane %v8223_v30, 5  ;;  %v9036_v1 = vld [vmem:[#allocation25_spill] sm:$0xff] }
 0x13b   : > { %9031 = vst [vmem:[#allocation8_spill] sm:$0xff] %v8244_v35  ;;  %v8265_v56 = vadd.f32 %v5864_v57, %v1081_v41  ;;  %v1073_v45 = vadd.f32 %v1072_v38, %v9035_v16  ;;  %v1510_v49 = vpop.f32.mrf.mxu0  ;;  %v3911_v35 = vrot.slane %v3909_v10, 4  ;;  %v3929_v57 = vshll.u32 %v8256_v32, 16 }
 0x13c   : > { %v5833_v12 = vpop.f32.mrf.mxu1  ;;  %6036 = vmatmul.mubr.msk.bf16.gmra.mxu1 %vm658_vm3, %v8079_v61  ;;  %v3894_v61 = vsel %vm6260_vm4, %v3889_v24, %v3893_v43  ;;  %v3902_v33 = vor.u32 %v3901_v22, %v3898_v21  ;;  %v3922_v41 = vrot.slane %v3920_v47, 4  ;;  %v3925_v38 = vrot.slane %v3923_v7, 5 }
 0x13d   : > { %v8281_v63 = vadd.f32 %v1497_v46, %v1073_v45  ;;  %v1094_v2 = vadd.f32 %v5833_v12, %v7987_v28  ;;  %v5868_v10 = vpop.f32.mrf.mxu0  ;;  %6039 = vmatprep.mubr.msk.bf16.mxu1 %vm658_vm3, %v8085_v60  ;;  %v9037_v60 = vsel %vm6260_vm4, %v8175_v51, %v8139_v52  ;;  %v3912_v24 = vor.u32 %v3911_v35, %v8268_v62 }
 0x13e   : > { %v1085_v4 = vpop.f32.mrf.mxu1  ;;  %v8299_v43 = vcombine.low %v9037_v60, %v3870_v27  ;;  %v8302_v30 = vcombine.low %v3884_v25, %v3894_v61  ;;  %v8306_v22 = vrot.slane %v3929_v57, 5  ;;  %v3935_v47 = vrot.slane %v3933_v6, 4  ;;  %v5460_v27 = vld [vmem:[%s6216_s23 + $0xc8] sm:$0x1] }
 0x13f   : > { %v8291_v46 = vadd.f32 %v5867_v13, %v1094_v2  ;;  %v1086_v28 = vadd.f32 %v1085_v4, %v9036_v1  ;;  %v1513_v12 = vpop.f32.mrf.mxu0  ;;  %v5542_v13 = vcombine.low %v8253_v14, %v8277_v50  ;;  %v9038_v52 = vcombine.low %v8105_v3, %v8127_v20  ;;  %v5461_v14 = vld [vmem:[%s6216_s23 + $0xcc] sm:$0xf]  ;;  %v8327_v20 = vld [vmem:[%s6216_s23 + $0xd0] sm:$0xf]  ;;  %v5511_v4 = vld [vmem:[%s6216_s23 + $0xc0] sm:$0xe] }
 0x140   : > { %v5834_v21 = vpop.f32.mrf.mxu1  ;;  %v8315_v35 = vrot.slane %v3915_v23, 5  ;;  %v5526_v51 = vrot.slane %v5510_v40, 9  ;;  %v9039_v50 = vcombine.low %v8137_v53, %v8167_v39  ;;  %v4421_v57 = vrot.slane %v8263_v18, 5 }
 0x141   : > { %v8308_v7 = vadd.f32 %v1510_v49, %v1086_v28  ;;  %v1097_v16 = vadd.f32 %v5834_v21, %v8010_v19  ;;  %v5871_v45 = vpop.f32.mrf.mxu0  ;;  %6074 = vmatmul.mubr.msk.bf16.gmra.mxu0 %vm658_vm3, %v9038_v52  ;;  %v8323_v49 = vrot.slane %v3902_v33, 4  ;;  %v4420_v19 = vrot.slane %v4418_v17, 4 }
 0x142   : > { %v1088_v25 = vpop.f32.mrf.mxu1  ;;  %6077 = vmatprep.mubr.msk.bf16.mxu0 %vm658_vm3, %v9039_v50  ;;  %v3926_v3 = vor.u32 %v3925_v38, %v3922_v41  ;;  %v8332_v23 = vrot.slane %v3912_v24, 4  ;;  %v4425_v53 = vrot.slane %v8256_v32, 5  ;;  %v3936_v33 = vor.u32 %v3935_v47, %v8306_v22 }
 0x143   : > { %v8329_v6 = vadd.f32 %v5868_v10, %v1097_v16  ;;  %v1089_v2 = vadd.f32 %v1088_v25, %v8042_v26  ;;  %v1526_v61 = vpop.f32.mrf.mxu0  ;;  %v3939_v18 = vshll.u32 %v5460_v27, 16  ;;  %v3944_v40 = vshrl.u32 %v5461_v14, 16  ;;  %v9042_v10 = vld [vmem:[#allocation4_spill] sm:$0xff]  ;;  %v9043_v16 = vld [vmem:[#allocation3_spill] sm:$0xff] }
 0x144   : > { %v5837_v39 = vpop.f32.mrf.mxu1  ;;  %6040 = vmatmul.mubr.msk.bf16.gmra.mxu1 %vm658_vm3, %v8114_v48  ;;  %v3947_v41 = vshll.u32 %v5461_v14, 16  ;;  %v3953_v28 = vshll.u32 %v8327_v20, 16  ;;  %v3957_v32 = vshrl.u32 %v8327_v20, 16  ;;  %v4419_v48 = vsel %vm6546_vm7, %v5526_v51, %v4418_v17  ;;  %v9044_v17 = vld [vmem:[#allocation6_spill] sm:$0xff] }
 0x145   : > { %9040 = vst [vmem:[#allocation16_spill] sm:$0xff] %v8329_v6  ;;  %v8339_v38 = vadd.f32 %v1513_v12, %v1089_v2  ;;  %v1110_v1 = vadd.f32 %v5837_v39, %v9042_v10  ;;  %v5872_v26 = vpop.f32.mrf.mxu0  ;;  %6043 = vmatprep.mubr.msk.bf16.mxu1 %vm658_vm3, %v8193_v15  ;;  %v4422_v24 = vsel %vm6546_vm7, %v4420_v19, %v4421_v57  ;;  %v3927_v21 = vrot.slane %v3926_v3, 4 }
 0x146   : > { %v1101_v60 = vpop.f32.mrf.mxu1  ;;  %v5527_v12 = vrot.slane %v5511_v4, 9  ;;  %v4427_v25 = vrot.slane %v4425_v53, 4  ;;  %v4428_v15 = vrot.slane %v5460_v27, 5  ;;  %v3937_v2 = vrot.slane %v3936_v33, 4  ;;  %v5463_v33 = vld [vmem:[%s6216_s23 + $0xd4] sm:$0x1] }
 0x147   : > { %9041 = vst [vmem:[#allocation12_spill] sm:$0xff] %v8339_v38  ;;  %v8350_v47 = vadd.f32 %v5871_v45, %v1110_v1  ;;  %v1102_v52 = vadd.f32 %v1101_v60, %v9043_v16  ;;  %v1529_v14 = vpop.f32.mrf.mxu0  ;;  %v3941_v39 = vrot.slane %v3939_v18, 5  ;;  %v3946_v10 = vrot.slane %v3944_v40, 4  ;;  %v9046_v18 = vld [vmem:[#allocation5_spill] sm:$0xff] }
 0x148   : > { %v5838_v50 = vpop.f32.mrf.mxu1  ;;  %v3949_v38 = vrot.slane %v3947_v41, 5  ;;  %v9045_v45 = vcombine.low %v8207_v58, %v8211_v36  ;;  %v8360_v57 = vrot.slane %v3953_v28, 5  ;;  %v3959_v27 = vrot.slane %v3957_v32, 4 }
 0x149   : > { %v8353_v6 = vadd.f32 %v1526_v61, %v1102_v52  ;;  %v1113_v51 = vadd.f32 %v5838_v50, %v9044_v17  ;;  %v5875_v19 = vpop.f32.mrf.mxu0  ;;  %v3908_v61 = vsel %vm6260_vm4, %v8323_v49, %v8268_v62  ;;  %v3918_v4 = vsel %vm6260_vm4, %v8332_v23, %v8315_v35  ;;  %v5512_v62 = vld [vmem:[%s6216_s23 + $0xcc] sm:$0xe] }
 0x14a   : > { %6078 = vmatmul.mubr.msk.bf16.gmra.mxu0 %vm658_vm3, %v9045_v45  ;;  %v1104_v3 = vpop.f32.mrf.mxu1  ;;  %v4432_v58 = vrot.slane %v8327_v20, 5  ;;  %v4429_v1 = vsel %vm6546_vm7, %v4427_v25, %v4428_v15  ;;  %v5543_v35 = vcombine.low %v4419_v48, %v4422_v24  ;;  %v3932_v20 = vsel %vm6260_vm4, %v3927_v21, %v8306_v22  ;;  %v9048_v25 = vld [vmem:[#allocation10_spill] sm:$0xff] }
 0x14b   : > { %6081 = vmatprep.mubr.msk.bf16.mxu0 %vm658_vm3, %v5542_v13  ;;  %v8373_v36 = vadd.f32 %v5872_v26, %v1113_v51  ;;  %v1105_v40 = vadd.f32 %v1104_v3, %v9046_v18  ;;  %v1542_v41 = vpop.f32.mrf.mxu0  ;;  %v4426_v13 = vsel %vm6546_vm7, %v5527_v12, %v4425_v53  ;;  %v3942_v23 = vsel %vm6260_vm4, %v3937_v2, %v3941_v39  ;;  %v9047_v53 = vld [vmem:[#allocation7_spill] sm:$0xff] }
 0x14c   : > { %v5841_v49 = vpop.f32.mrf.mxu1  ;;  %6044 = vmatmul.mubr.msk.bf16.gmra.mxu1 %vm658_vm3, %v8299_v43  ;;  %v3950_v26 = vor.u32 %v3949_v38, %v3946_v10  ;;  %v3960_v12 = vor.u32 %v3959_v27, %v8360_v57  ;;  %v3963_v43 = vshll.u32 %v5463_v33, 16  ;;  %v5544_v24 = vcombine.low %v4426_v13, %v4429_v1 }
 0x14d   : > { %v8388_v28 = vadd.f32 %v1529_v14, %v1105_v40  ;;  %v1126_v32 = vadd.f32 %v5841_v49, %v9047_v53  ;;  %v5876_v60 = vpop.f32.mrf.mxu0  ;;  %6047 = vmatprep.mubr.msk.bf16.mxu1 %vm658_vm3, %v8302_v30  ;;  %v5528_v16 = vrot.slane %v5512_v62, 9  ;;  %v4434_v52 = vrot.slane %v4432_v58, 4  ;;  %v9049_v30 = vld [vmem:[#allocation13_spill] sm:$0xff] }
 0x14e   : > { %v1117_v48 = vpop.f32.mrf.mxu1  ;;  %v4435_v22 = vrot.slane %v5463_v33, 5  ;;  %v5478_v50 = vcombine.low %v3908_v61, %v3918_v4  ;;  %v5479_v2 = vcombine.low %v3932_v20, %v3942_v23  ;;  %v3951_v39 = vrot.slane %v3950_v26, 4  ;;  %v9050_v33 = vld [vmem:[#allocation15_spill] sm:$0xff]  ;;  %v9051_v62 = vld [vmem:[#allocation17_spill] sm:$0xff]  ;;  %v9052_v26 = vld [vmem:[#allocation20_spill] sm:$0xff] }
 0x14f   : > { %v8394_v21 = vadd.f32 %v5875_v19, %v1126_v32  ;;  %v1118_v38 = vadd.f32 %v1117_v48, %v9048_v25  ;;  %v1545_v14 = vpop.f32.mrf.mxu0  ;;  %v3961_v45 = vrot.slane %v3960_v12, 4  ;;  %v3965_v27 = vrot.slane %v3963_v43, 5  ;;  %v9053_v43 = vld [vmem:[#allocation22_spill] sm:$0xff] }
 0x150   : > { %v5842_v15 = vpop.f32.mrf.mxu1  ;;  %v4433_v19 = vsel %vm6546_vm7, %v5528_v16, %v4432_v58  ;;  %v4436_v61 = vsel %vm6546_vm7, %v4434_v52, %v4435_v22  ;;  %v3956_v13 = vsel %vm6260_vm4, %v3951_v39, %v8360_v57 }
 0x151   : > { %v8397_v10 = vadd.f32 %v1542_v41, %v1118_v38  ;;  %v1129_v17 = vadd.f32 %v5842_v15, %v9049_v30  ;;  %v5879_v51 = vpop.f32.mrf.mxu0  ;;  %v3966_v0 = vsel %vm6260_vm4, %v3961_v45, %v3965_v27 }
 0x152   : > { %6082 = vmatmul.mubr.msk.bf16.gmra.mxu0 %vm658_vm3, %v5543_v35  ;;  %v1120_v3 = vpop.f32.mrf.mxu1  ;;  %v5545_v35 = vcombine.low %v4433_v19, %v4436_v61  ;;  %v5480_v12 = vcombine.low %v3956_v13, %v3966_v0 }
 0x153   : > { %6085 = vmatprep.mubr.msk.bf16.mxu0 %vm658_vm3, %v5544_v24  ;;  %v8406_v4 = vadd.f32 %v5876_v60, %v1129_v17  ;;  %v1121_v18 = vadd.f32 %v1120_v3, %v9050_v33  ;;  %v1558_v40 = vpop.f32.mrf.mxu0 }
 0x154   : > { %v5845_v41 = vpop.f32.mrf.mxu1  ;;  %6048 = vmatmul.mubr.msk.bf16.gmra.mxu1 %vm658_vm3, %v5478_v50 }
 0x155   : > { %v8413_v1 = vadd.f32 %v1545_v14, %v1121_v18  ;;  %v1142_v49 = vadd.f32 %v5845_v41, %v9051_v62  ;;  %v5880_v58 = vpop.f32.mrf.mxu0  ;;  %6051 = vmatprep.mubr.msk.bf16.mxu1 %vm658_vm3, %v5479_v2 }
 0x156   : > { %v1133_v20 = vpop.f32.mrf.mxu1 }
 0x157   : > { %v8419_v23 = vadd.f32 %v5879_v51, %v1142_v49  ;;  %v1134_v53 = vadd.f32 %v1133_v20, %v9052_v26  ;;  %v1561_v32 = vpop.f32.mrf.mxu0 }
 0x158   : > { %v5846_v60 = vpop.f32.mrf.mxu1 }
 0x159   : > { %v8422_v57 = vadd.f32 %v1558_v40, %v1134_v53  ;;  %v1145_v48 = vadd.f32 %v5846_v60, %v9053_v43  ;;  %v5883_v24 = vpop.f32.mrf.mxu0 }
 0x15a   : > { %6086 = vmatmul.mubr.msk.bf16.gmra.mxu0 %vm658_vm3, %v5545_v35  ;;  %v1136_v16 = vpop.f32.mrf.mxu1 }
 0x15b   : > { %v8426_v52 = vadd.f32 %v5880_v58, %v1145_v48  ;;  %v1137_v22 = vadd.f32 %v1136_v16, %v9054_v31  ;;  %v1574_v25 = vpop.f32.mrf.mxu0 }
 0x15c   : > { %v5849_v38 = vpop.f32.mrf.mxu1  ;;  %6052 = vmatmul.mubr.msk.bf16.gmra.mxu1 %vm658_vm3, %v5480_v12 }
 0x15d   : > { %v8430_v14 = vadd.f32 %v1561_v32, %v1137_v22  ;;  %v1158_v15 = vadd.f32 %v5849_v38, %v8002_v42  ;;  %v5884_v50 = vpop.f32.mrf.mxu0 }
 0x15e   : > { %v1149_v2 = vpop.f32.mrf.mxu1 }
 0x15f   : > { %v8433_v39 = vadd.f32 %v5883_v24, %v1158_v15  ;;  %v1150_v30 = vadd.f32 %v1149_v2, %v8029_v44  ;;  %v1577_v17 = vpop.f32.mrf.mxu0 }
 0x160   : > { %v5850_v51 = vpop.f32.mrf.mxu1 }
 0x161   : > { %v8436_v45 = vadd.f32 %v1574_v25, %v1150_v30  ;;  %v1161_v27 = vadd.f32 %v5850_v51, %v8044_v8  ;;  %v5923_v3 = vpop.f32.mrf.mxu0  ;;  %v9055_v30 = vld [vmem:[#allocation11_spill] sm:$0xff] }
 0x162   : > { %v1152_v19 = vpop.f32.mrf.mxu1 }
 0x163   : > { %v8439_v61 = vadd.f32 %v5884_v50, %v1161_v27  ;;  %v1153_v33 = vadd.f32 %v1152_v19, %v8066_v55  ;;  %v2547_v18 = vpop.f32.mrf.mxu0 }
 0x164   : > { %v5889_v42 = vpop.f32.mrf.mxu1 }
 0x165   : > { %v8442_v40 = vadd.f32 %v1577_v17, %v1153_v33  ;;  %v1950_v41 = vadd.f32 %v5889_v42, %v8111_v5  ;;  %v5924_v13 = vpop.f32.mrf.mxu0 }
 0x166   : > { %v1821_v44 = vpop.f32.mrf.mxu1 }
 0x167   : > { %v8445_v62 = vadd.f32 %v5923_v3, %v1950_v41  ;;  %v1948_v49 = vadd.f32 %v1821_v44, %v8118_v37  ;;  %v2550_v58 = vpop.f32.mrf.mxu0  ;;  %v9056_v3 = vld [vmem:[#allocation8_spill] sm:$0xff] }
 0x168   : > { %v5890_v8 = vpop.f32.mrf.mxu1 }
 0x169   : > { %v8448_v0 = vadd.f32 %v2547_v18, %v1948_v49  ;;  %v1951_v35 = vadd.f32 %v5890_v8, %v8144_v54  ;;  %v5927_v20 = vpop.f32.mrf.mxu0 }
 0x16a   : > { %v1824_v55 = vpop.f32.mrf.mxu1 }
 0x16b   : > { %v8451_v26 = vadd.f32 %v5924_v13, %v1951_v35  ;;  %v1949_v53 = vadd.f32 %v1824_v55, %v8158_v11  ;;  %v2563_v32 = vpop.f32.mrf.mxu0 }
 0x16c   : > { %v5893_v5 = vpop.f32.mrf.mxu1 }
 0x16d   : > { %v8454_v60 = vadd.f32 %v2550_v58, %v1949_v53  ;;  %v1954_v12 = vadd.f32 %v5893_v5, %v8170_v29  ;;  %v5928_v43 = vpop.f32.mrf.mxu0 }
 0x16e   : > { %v1837_v37 = vpop.f32.mrf.mxu1 }
 0x16f   : > { %v8457_v48 = vadd.f32 %v5927_v20, %v1954_v12  ;;  %v1952_v24 = vadd.f32 %v1837_v37, %v8177_v9  ;;  %v2566_v16 = vpop.f32.mrf.mxu0 }
 0x170   : > { %v5894_v54 = vpop.f32.mrf.mxu1 }
 0x171   : > { %v8460_v31 = vadd.f32 %v2563_v32, %v1952_v24  ;;  %v1955_v22 = vadd.f32 %v5894_v54, %v8202_v34  ;;  %v5931_v25 = vpop.f32.mrf.mxu0  ;;  %v9058_v54 = vld [vmem:[#allocation12_spill] sm:$0xff] }
 0x172   : > { %v1840_v11 = vpop.f32.mrf.mxu1 }
 0x173   : > { %v8463_v38 = vadd.f32 %v5928_v43, %v1955_v22  ;;  %v1953_v15 = vadd.f32 %v1840_v11, %v8225_v59  ;;  %v2579_v50 = vpop.f32.mrf.mxu0  ;;  %v9057_v43 = vld [vmem:[#allocation16_spill] sm:$0xff] }
 0x174   : > { %v5897_v29 = vpop.f32.mrf.mxu1 }
 0x175   : > { %v8466_v2 = vadd.f32 %v2566_v16, %v1953_v15  ;;  %v1958_v17 = vadd.f32 %v5897_v29, %v9055_v30  ;;  %v5932_v51 = vpop.f32.mrf.mxu0 }
 0x176   : > { %v1853_v9 = vpop.f32.mrf.mxu1 }
 0x177   : > { %v8469_v27 = vadd.f32 %v5931_v25, %v1958_v17  ;;  %v1956_v19 = vadd.f32 %v1853_v9, %v9056_v3  ;;  %v2582_v33 = vpop.f32.mrf.mxu0 }
 0x178   : > { %v5898_v34 = vpop.f32.mrf.mxu1 }
 0x179   : > { %v8472_v18 = vadd.f32 %v2579_v50, %v1956_v19  ;;  %v1959_v42 = vadd.f32 %v5898_v34, %v8265_v56  ;;  %v5935_v41 = vpop.f32.mrf.mxu0 }
 0x17a   : > { %v1856_v59 = vpop.f32.mrf.mxu1 }
 0x17b   : > { %v8475_v13 = vadd.f32 %v5932_v51, %v1959_v42  ;;  %v1957_v44 = vadd.f32 %v1856_v59, %v8281_v63  ;;  %v2595_v49 = vpop.f32.mrf.mxu0 }
 0x17c   : > { %v5901_v58 = vpop.f32.mrf.mxu1 }
 0x17d   : > { %v8478_v8 = vadd.f32 %v2582_v33, %v1957_v44  ;;  %v1962_v35 = vadd.f32 %v5901_v58, %v8291_v46  ;;  %v5936_v20 = vpop.f32.mrf.mxu0 }
 0x17e   : > { %v1869_v55 = vpop.f32.mrf.mxu1 }
 0x17f   : > { %v8481_v53 = vadd.f32 %v5935_v41, %v1962_v35  ;;  %v1960_v32 = vadd.f32 %v1869_v55, %v8308_v7  ;;  %v2598_v5 = vpop.f32.mrf.mxu0 }
 0x180   : > { %v5902_v56 = vpop.f32.mrf.mxu1 }
 0x181   : > { %v8484_v12 = vadd.f32 %v2595_v49, %v1960_v32  ;;  %v1963_v37 = vadd.f32 %v5902_v56, %v9057_v43  ;;  %v5939_v24 = vpop.f32.mrf.mxu0 }
 0x182   : > { %v1872_v63 = vpop.f32.mrf.mxu1 }
 0x183   : > { %v8487_v16 = vadd.f32 %v5936_v20, %v1963_v37  ;;  %v1961_v22 = vadd.f32 %v1872_v63, %v9058_v54  ;;  %v2611_v25 = vpop.f32.mrf.mxu0 }
 0x184   : > { %v5905_v46 = vpop.f32.mrf.mxu1 }
 0x185   : > { %v8490_v11 = vadd.f32 %v2598_v5, %v1961_v22  ;;  %v1966_v15 = vadd.f32 %v5905_v46, %v8350_v47  ;;  %v5940_v50 = vpop.f32.mrf.mxu0 }
 0x186   : > { %v1885_v7 = vpop.f32.mrf.mxu1 }
 0x187   : > { %v8493_v29 = vadd.f32 %v5939_v24, %v1966_v15  ;;  %v1964_v30 = vadd.f32 %v1885_v7, %v8353_v6  ;;  %v2614_v17 = vpop.f32.mrf.mxu0 }
 0x188   : > { %v5906_v51 = vpop.f32.mrf.mxu1 }
 0x189   : > { %v8496_v9 = vadd.f32 %v2611_v25, %v1964_v30  ;;  %v1967_v3 = vadd.f32 %v5906_v51, %v8373_v36  ;;  %v5943_v19 = vpop.f32.mrf.mxu0 }
 0x18a   : > { %v1888_v33 = vpop.f32.mrf.mxu1 }
 0x18b   : > { %v8499_v34 = vadd.f32 %v5940_v50, %v1967_v3  ;;  %v1965_v42 = vadd.f32 %v1888_v33, %v8388_v28  ;;  %v2627_v41 = vpop.f32.mrf.mxu0 }
 0x18c   : > { %v5909_v47 = vpop.f32.mrf.mxu1 }
 0x18d   : > { %9059 = vst [vmem:[#allocation2_spill] sm:$0xff] %v8499_v34  ;;  %v8502_v59 = vadd.f32 %v2614_v17, %v1965_v42  ;;  %v1970_v44 = vadd.f32 %v5909_v47, %v8394_v21  ;;  %v5944_v49 = vpop.f32.mrf.mxu0 }
 0x18e   : > { %v1901_v6 = vpop.f32.mrf.mxu1 }
 0x18f   : > { %9060 = vst [vmem:[#allocation14_spill] sm:$0xff] %v8502_v59  ;;  %v8505_v58 = vadd.f32 %v5943_v19, %v1970_v44  ;;  %v1968_v35 = vadd.f32 %v1901_v6, %v8397_v10  ;;  %v2630_v20 = vpop.f32.mrf.mxu0 }
 0x190   : > { %v5910_v36 = vpop.f32.mrf.mxu1 }
 0x191   : > { %9061 = vst [vmem:[#allocation19_spill] sm:$0xff] %v8505_v58  ;;  %v8508_v55 = vadd.f32 %v2627_v41, %v1968_v35  ;;  %v1971_v32 = vadd.f32 %v5910_v36, %v8406_v4  ;;  %v5947_v5 = vpop.f32.mrf.mxu0 }
 0x192   : > { %v1904_v28 = vpop.f32.mrf.mxu1 }
 0x193   : > { %9062 = vst [vmem:[#allocation9_spill] sm:$0xff] %v8508_v55  ;;  %v8511_v56 = vadd.f32 %v5944_v49, %v1971_v32  ;;  %v1969_v43 = vadd.f32 %v1904_v28, %v8413_v1  ;;  %v2643_v37 = vpop.f32.mrf.mxu0 }
 0x194   : > { %v5913_v21 = vpop.f32.mrf.mxu1 }
 0x195   : > { %9063 = vst [vmem:[#allocation18_spill] sm:$0xff] %v8511_v56  ;;  %v8514_v24 = vadd.f32 %v2630_v20, %v1969_v43  ;;  %v1974_v63 = vadd.f32 %v5913_v21, %v8419_v23  ;;  %v5948_v54 = vpop.f32.mrf.mxu0 }
 0x196   : > { %v1917_v10 = vpop.f32.mrf.mxu1 }
 0x197   : > { %9064 = vst [vmem:[#allocation21_spill] sm:$0xff] %v8514_v24  ;;  %v8517_v22 = vadd.f32 %v5947_v5, %v1974_v63  ;;  %v1972_v25 = vadd.f32 %v1917_v10, %v8422_v57  ;;  %v2646_v46 = vpop.f32.mrf.mxu0 }
 0x198   : > { %v5914_v4 = vpop.f32.mrf.mxu1 }
 0x199   : > { %9065 = vst [vmem:[#allocation23_spill] sm:$0xff] %v8517_v22  ;;  %v8520_v15 = vadd.f32 %v2643_v37, %v1972_v25  ;;  %v1975_v50 = vadd.f32 %v5914_v4, %v8426_v52  ;;  %v5951_v7 = vpop.f32.mrf.mxu0 }
 0x19a   : > { %v1920_v1 = vpop.f32.mrf.mxu1 }
 0x19b   : > { %9066 = vst [vmem:[#allocation25_spill] sm:$0xff] %v8520_v15  ;;  %v8523_v30 = vadd.f32 %v5948_v54, %v1975_v50  ;;  %v1973_v17 = vadd.f32 %v1920_v1, %v8430_v14  ;;  %v2659_v51 = vpop.f32.mrf.mxu0 }
 0x19c   : > { %v5917_v23 = vpop.f32.mrf.mxu1 }
 0x19d   : > { %9067 = vst [vmem:[#allocation4_spill] sm:$0xff] %v8523_v30  ;;  %v8526_v3 = vadd.f32 %v2646_v46, %v1973_v17  ;;  %v1978_v19 = vadd.f32 %v5917_v23, %v8433_v39  ;;  %v5952_v33 = vpop.f32.mrf.mxu0 }
 0x19e   : > { %v1933_v57 = vpop.f32.mrf.mxu1 }
 0x19f   : > { %9068 = vst [vmem:[#allocation3_spill] sm:$0xff] %v8526_v3  ;;  %v8529_v42 = vadd.f32 %v5951_v7, %v1978_v19  ;;  %v1976_v41 = vadd.f32 %v1933_v57, %v8436_v45  ;;  %v2662_v47 = vpop.f32.mrf.mxu0 }
 0x1a0   : > { %v5918_v52 = vpop.f32.mrf.mxu1 }
 0x1a1   : > { %9069 = vst [vmem:[#allocation6_spill] sm:$0xff] %v8529_v42  ;;  %v8532_v44 = vadd.f32 %v2659_v51, %v1976_v41  ;;  %v1979_v49 = vadd.f32 %v5918_v52, %v8439_v61  ;;  %v8535_v6 = vpop.f32.mrf.mxu0 }
 0x1a2   : > { %v1936_v14 = vpop.f32.mrf.mxu1 }
 0x1a3   : > { %9070 = vst [vmem:[#allocation5_spill] sm:$0xff] %v8532_v44  ;;  %v8537_v35 = vadd.f32 %v5952_v33, %v1979_v49  ;;  %v1977_v20 = vadd.f32 %v1936_v14, %v8442_v40  ;;  %v8540_v39 = vpop.f32.mrf.mxu0 }
 0x1a4   : > { %v5957_v36 = vpop.f32.mrf.mxu1 }
 0x1a5   : > { %9071 = vst [vmem:[#allocation7_spill] sm:$0xff] %v8537_v35  ;;  %v8542_v32 = vadd.f32 %v2662_v47, %v1977_v20  ;;  %v8544_v5 = vpop.f32.mrf.mxu0 }
 0x1a6   : > { %v3017_v45 = vpop.f32.mrf.mxu1 }
 0x1a7   : > { %9072 = vst [vmem:[#allocation10_spill] sm:$0xff] %v8542_v32  ;;  %v8546_v28 = vpop.f32.mrf.mxu0 }
 0x1a8   : > { %v5958_v43 = vpop.f32.mrf.mxu1 }
 0x1a9   : > { %v8548_v37 = vpop.f32.mrf.mxu0 }
 0x1aa   : > { %v8550_v61 = vpop.f32.mrf.mxu1 }
 0x1ab   : > { %v8552_v21 = vpop.f32.mrf.mxu0 }
 0x1ac   : > { %v8554_v63 = vpop.f32.mrf.mxu1 }
 0x1ad   : > { %v8556_v40 = vpop.f32.mrf.mxu0 }
 0x1ae   : > { %v8558_v54 = vpop.f32.mrf.mxu1 }
 0x1af   : > { %v8560_v10 = vpop.f32.mrf.mxu0 }
 0x1b0   : > { %v8562_v25 = vpop.f32.mrf.mxu1 }
 0x1b1   : > { %v8564_v46 = vpop.f32.mrf.mxu0 }
 0x1b2   : > { %v8566_v4 = vpop.f32.mrf.mxu1 }
 0x1b3   : > { %v8568_v50 = vpop.f32.mrf.mxu0 }
 0x1b4   : > { %v8570_v7 = vpop.f32.mrf.mxu1 }
 0x1b5   : > { %v8572_v1 = vpop.f32.mrf.mxu0 }
 0x1b6   : > { %v8574_v17 = vpop.f32.mrf.mxu1 }
 0x1b7   : > { %v8576_v51 = vpop.f32.mrf.mxu0 }
 0x1b8   : > { %v8578_v23 = vpop.f32.mrf.mxu1 }
 0x1b9   : > { %v8580_v19 = vpop.f32.mrf.mxu0 }
 0x1ba   : > { %v8582_v33 = vpop.f32.mrf.mxu1 }
 0x1bb   : > { %v8584_v57 = vpop.f32.mrf.mxu0 }
 0x1bc   : > { %v8586_v41 = vpop.f32.mrf.mxu1 }
 0x1bd   : > { %v8588_v47 = vpop.f32.mrf.mxu0 }
 0x1be   : > { %v8590_v52 = vpop.f32.mrf.mxu1 }
 0x1bf   : > { %v8592_v49 = vpop.f32.mrf.mxu0 }
 0x1c0   : > { %v8594_v14 = vpop.f32.mrf.mxu1 }
 0x1c1   : > { %v8596_v20 = vpop.f32.mrf.mxu0 }
 0x1c2   : > { %v8598_v32 = vpop.f32.mrf.mxu1 }
 0x1c3   : > { %v8600_v35 = vpop.f32.mrf.mxu0 }
 0x1c4   : > { %9073 = vst [vmem:[#allocation13_spill] sm:$0xff] %v8600_v35  ;;  %v8602_v44 = vpop.f32.mrf.mxu1 }
 0x1c5   : > { %v8604_v42 = vpop.f32.mrf.mxu0 }
 0x1c6   : > { %9074 = vst [vmem:[#allocation15_spill] sm:$0xff] %v8604_v42  ;;  %v8606_v3 = vpop.f32.mrf.mxu1 }
 0x1c7   : > { %v8608_v30 = vpop.f32.mrf.mxu0 }
 0x1c8   : > { %9075 = vst [vmem:[#allocation17_spill] sm:$0xff] %v8608_v30  ;;  %v8610_v15 = vpop.f32.mrf.mxu1 }
 0x1c9   : > { %9076 = vst [vmem:[#allocation20_spill] sm:$0xff] %v8610_v15  ;;  %v8612_v22 = vpop.f32.mrf.mxu0 }
 0x1ca   : > { %9077 = vst [vmem:[#allocation22_spill] sm:$0xff] %v8612_v22  ;;  %v8614_v24 = vpop.f32.mrf.mxu1 }
 0x1cb   : > { %9078 = vst [vmem:[#allocation24_spill] sm:$0xff] %v8614_v24  ;;  %v8616_v56 = vpop.f32.mrf.mxu0 }
 0x1cc   : > { %9079 = vst [vmem:[#allocation11_spill] sm:$0xff] %v8616_v56  ;;  %v8618_v55 = vpop.f32.mrf.mxu1 }
 0x1cd   : > { %9080 = vst [vmem:[#allocation8_spill] sm:$0xff] %v8618_v55  ;;  %v8620_v58 = vpop.f32.mrf.mxu0 }
 0x1ce   : > { %9081 = vst [vmem:[#allocation16_spill] sm:$0xff] %v8620_v58  ;;  %v8622_v59 = vpop.f32.mrf.mxu1 }
 0x1cf   : > { %9082 = vst [vmem:[#allocation12_spill] sm:$0xff] %v8622_v59  ;;  %v8624_v35 = vpop.f32.mrf.mxu0 }
 0x1d0   : > { %9083 = vst [vmem:[#allocation26_spill] sm:$0xff] %v8624_v35  ;;  %v8626_v42 = vpop.f32.mrf.mxu1 }
 0x1d1   : > { %9084 = vst [vmem:[#allocation27_spill] sm:$0xff] %v8626_v42  ;;  %v8628_v34 = vpop.f32.mrf.mxu0 }
 0x1d2   : > { %9085 = vst [vmem:[#allocation28_spill] sm:$0xff] %v8628_v34  ;;  %v8630_v30 = vpop.f32.mrf.mxu1 }
 0x1d3   : > { %9086 = vst [vmem:[#allocation29_spill] sm:$0xff] %v8630_v30  ;;  %v8632_v15 = vpop.f32.mrf.mxu0 }
 0x1d4   : > { %9087 = vst [vmem:[#allocation30_spill] sm:$0xff] %v8632_v15  ;;  %v8634_v22 = vpop.f32.mrf.mxu1 }
 0x1d5   : > { %9088 = vst [vmem:[#allocation31_spill] sm:$0xff] %v8634_v22  ;;  %v8636_v24 = vpop.f32.mrf.mxu0 }
 0x1d6   : > { %9089 = vst [vmem:[#allocation32_spill] sm:$0xff] %v8636_v24  ;;  %v8638_v56 = vpop.f32.mrf.mxu1  ;;  %v3146_v24 = vadd.f32 %v5957_v36, %v8445_v62  ;;  %v3145_v62 = vadd.f32 %v8550_v61, %v8454_v60 }
 0x1d7   : > { %9090 = vst [vmem:[#allocation33_spill] sm:$0xff] %v8638_v56  ;;  %v8640_v55 = vpop.f32.mrf.mxu0 }
 0x1d8   : > { %9091 = vst [vmem:[#allocation34_spill] sm:$0xff] %v8640_v55  ;;  %v8642_v58 = vpop.f32.mrf.mxu1  ;;  %v3144_v55 = vadd.f32 %v3017_v45, %v8448_v0  ;;  %v8672_v0 = vld [vmem:[%s8867_s2] ss:$0 sm:$0xff] }
 0x1d9   : > { %9092 = vst [vmem:[#allocation35_spill] sm:$0xff] %v8642_v58  ;;  %v8644_v59 = vpop.f32.mrf.mxu0 }
 0x1da   : > { %9093 = vst [vmem:[#allocation36_spill] sm:$0xff] %v8644_v59  ;;  %v8646_v35 = vpop.f32.mrf.mxu1 }
 0x1db   : > { %9094 = vst [vmem:[#allocation37_spill] sm:$0xff] %v8646_v35  ;;  %v8648_v42 = vpop.f32.mrf.mxu0  ;;  %v3505_v35 = vadd.f32 %v8535_v6, %v3146_v24 }
 0x1dc   : > { %9095 = vst [vmem:[#allocation38_spill] sm:$0xff] %v8648_v42  ;;  %v8650_v34 = vpop.f32.mrf.mxu1  ;;  %v3147_v42 = vadd.f32 %v5958_v43, %v8451_v26 }
 0x1dd   : > { %9096 = vst [vmem:[#allocation39_spill] sm:$0xff] %v8650_v34  ;;  %v8652_v30 = vpop.f32.mrf.mxu0 }
 0x1de   : > { %9097 = vst [vmem:[#allocation40_spill] sm:$0xff] %v8652_v30  ;;  %v8654_v15 = vpop.f32.mrf.mxu1  ;;  %v3506_v24 = vadd.f32 %v8544_v5, %v3147_v42 }
 0x1df   : > { %9098 = vst [vmem:[#allocation41_spill] sm:$0xff] %v8654_v15  ;;  %v8657_v22 = vpop.f32.mrf.mxu0  ;;  %v3503_v15 = vadd.f32 %v8540_v39, %v3144_v55  ;;  %v3148_v55 = vadd.f32 %v8558_v54, %v8460_v31  ;;  %v3149_v54 = vadd.f32 %v8566_v4, %v8466_v2  ;;  %v3154_v2 = vadd.f32 %v8570_v7, %v8469_v27 }
 0x1e0   : > { %9099 = vst [vmem:[#allocation42_spill] sm:$0xff] %v8657_v22  ;;  %v8659_v56 = vpop.f32.mrf.mxu1 }
 0x1e1   : > { %9100 = vst [vmem:[#allocation43_spill] sm:$0xff] %v8659_v56  ;;  %v6059_v58 = vpop.f32.mrf.mxu0 }
 0x1e2   : > { %v8662_v59 = vpop.f32.mrf.mxu1 }
 0x1e3   : > { %9101 = vst [vmem:[#allocation44_spill] sm:$0xff] %v8662_v59  ;;  %v4572_v34 = vpop.f32.mrf.mxu0  ;;  %v3150_v59 = vadd.f32 %v8554_v63, %v8457_v48 }
 0x1e4   : > { %v6025_v30 = vpop.f32.mrf.mxu1 }
 0x1e5   : > { %v4231_v36 = vadd.f32 %v6025_v30, %v3505_v35  ;;  %v6060_v22 = vpop.f32.mrf.mxu0  ;;  %v3504_v30 = vadd.f32 %v8546_v28, %v3145_v62  ;;  %v3509_v31 = vadd.f32 %v8548_v37, %v3150_v59  ;;  %v3507_v28 = vadd.f32 %v8552_v21, %v3148_v55 }
 0x1e6   : > { %v4102_v45 = vpop.f32.mrf.mxu1 }
 0x1e7   : > { %v4701_v6 = vadd.f32 %v6059_v58, %v4231_v36  ;;  %v4229_v26 = vadd.f32 %v4102_v45, %v3503_v15  ;;  %v4575_v43 = vpop.f32.mrf.mxu0  ;;  %v3151_v58 = vadd.f32 %v8562_v25, %v8463_v38 }
 0x1e8   : > { %v6026_v60 = vpop.f32.mrf.mxu1 }
 0x1e9   : > { %v4740_v35 = vadd.f32 %v8672_v0, %v4701_v6  ;;  %v4699_v39 = vadd.f32 %v4572_v34, %v4229_v26  ;;  %v4232_v61 = vadd.f32 %v6026_v60, %v3506_v24  ;;  %v6063_v56 = vpop.f32.mrf.mxu0  ;;  %v3510_v37 = vadd.f32 %v8556_v40, %v3151_v58 }
 0x1ea   : > { %v4105_v15 = vpop.f32.mrf.mxu1  ;;  %v3508_v60 = vadd.f32 %v8560_v10, %v3149_v54  ;;  %v3152_v58 = vadd.f32 %v8574_v17, %v8472_v18 }
 0x1eb   : > { %v4772_v42 = vmax.f32 %v4740_v35, 0.0  ;;  %v4738_v5 = vadd.f32 %v8672_v0, %v4699_v39  ;;  %v4702_v48 = vadd.f32 %v6060_v22, %v4232_v61  ;;  %v4230_v63 = vadd.f32 %v4105_v15, %v3504_v30  ;;  %v4588_v36 = vpop.f32.mrf.mxu0 }
 0x1ec   : > { %v6029_v38 = vpop.f32.mrf.mxu1  ;;  %v3513_v61 = vadd.f32 %v8564_v46, %v3154_v2  ;;  %v3155_v15 = vadd.f32 %v8578_v23, %v8475_v13  ;;  %v3153_v46 = vadd.f32 %v8582_v33, %v8478_v8 }
 0x1ed   : > { %v5600_v34 = vpack.c.bf16 %v4772_v42, %v4772_v42  ;;  %v4770_v25 = vmax.f32 %v4738_v5, 0.0  ;;  %v4741_v22 = vadd.f32 %v8672_v0, %v4702_v48  ;;  %v4700_v62 = vadd.f32 %v4575_v43, %v4230_v63  ;;  %v6064_v59 = vpop.f32.mrf.mxu0 }
 0x1ee   : > { %v4235_v21 = vadd.f32 %v6029_v38, %v3509_v31  ;;  %v4118_v4 = vpop.f32.mrf.mxu1  ;;  %v3511_v38 = vadd.f32 %v8568_v50, %v3152_v58 }
 0x1ef   : > { %4933 = vst.msk [vmem:[%s8692_s15 + $0x8] sm:$0xf] %vm4930_vm8, %v5600_v34  ;;  %v5598_v45 = vpack.c.bf16 %v4770_v25, %v4770_v25  ;;  %v4773_v24 = vmax.f32 %v4741_v22, 0.0  ;;  %v4739_v6 = vadd.f32 %v8672_v0, %v4700_v62  ;;  %v4233_v26 = vadd.f32 %v4118_v4, %v3507_v28  ;;  %v4591_v55 = vpop.f32.mrf.mxu0 }
 0x1f0   : > { %v4705_v43 = vadd.f32 %v6063_v56, %v4235_v21  ;;  %v6030_v30 = vpop.f32.mrf.mxu1  ;;  %v3514_v34 = vadd.f32 %v8572_v1, %v3155_v15  ;;  %v3158_v25 = vadd.f32 %v8586_v41, %v8481_v53  ;;  %v3512_v21 = vadd.f32 %v8576_v51, %v3153_v46 }
 0x1f1   : > { %4931 = vst.msk [vmem:[%s8692_s15] sm:$0xf] %vm4930_vm8, %v5598_v45  ;;  %v5601_v40 = vpack.c.bf16 %v4773_v24, %v4773_v24  ;;  %v4771_v35 = vmax.f32 %v4739_v6, 0.0  ;;  %v4703_v27 = vadd.f32 %v4588_v36, %v4233_v26  ;;  %v4236_v7 = vadd.f32 %v6030_v30, %v3510_v37  ;;  %v6067_v39 = vpop.f32.mrf.mxu0 }
 0x1f2   : > { %v4744_v10 = vadd.f32 %v8672_v0, %v4705_v43  ;;  %v4121_v56 = vpop.f32.mrf.mxu1  ;;  %v3156_v4 = vadd.f32 %v8590_v52, %v8484_v12  ;;  %v3517_v26 = vadd.f32 %v8580_v19, %v3158_v25 }
 0x1f3   : > { %4934 = vst.msk [vmem:[%s8692_s15 + $0xc] sm:$0xf] %vm4930_vm8, %v5601_v40  ;;  %v5599_v42 = vpack.c.bf16 %v4771_v35, %v4771_v35  ;;  %v4742_v5 = vadd.f32 %v8672_v0, %v4703_v27  ;;  %v4706_v48 = vadd.f32 %v6064_v59, %v4236_v7  ;;  %v4234_v63 = vadd.f32 %v4121_v56, %v3508_v60  ;;  %v4604_v36 = vpop.f32.mrf.mxu0 }
 0x1f4   : > { %v4776_v31 = vmax.f32 %v4744_v10, 0.0  ;;  %v6033_v28 = vpop.f32.mrf.mxu1  ;;  %v3515_v40 = vadd.f32 %v8584_v57, %v3156_v4  ;;  %v3159_v35 = vadd.f32 %v8594_v14, %v8487_v16  ;;  %v3157_v27 = vadd.f32 %v8598_v32, %v8490_v11 }
 0x1f5   : > { %4932 = vst.msk [vmem:[%s8692_s15 + $0x4] sm:$0xf] %vm4930_vm8, %v5599_v42  ;;  %v4774_v18 = vmax.f32 %v4742_v5, 0.0  ;;  %v4745_v13 = vadd.f32 %v8672_v0, %v4706_v48  ;;  %v4704_v17 = vadd.f32 %v4591_v55, %v4234_v63  ;;  %v4239_v23 = vadd.f32 %v6033_v28, %v3513_v61  ;;  %v6068_v54 = vpop.f32.mrf.mxu0 }
 0x1f6   : > { %v5604_v8 = vpack.c.bf16 %v4776_v31, %v4776_v31  ;;  %v4134_v33 = vpop.f32.mrf.mxu1  ;;  %v3162_v57 = vadd.f32 %v8602_v44, %v8493_v29  ;;  %v3518_v48 = vadd.f32 %v8588_v47, %v3159_v35  ;;  %v3516_v63 = vadd.f32 %v8592_v49, %v3157_v27  ;;  %v9111_v35 = vld [vmem:[#allocation12_spill] sm:$0xff] }
 0x1f7   : > { %v5602_v22 = vpack.c.bf16 %v4774_v18, %v4774_v18  ;;  %v4777_v62 = vmax.f32 %v4745_v13, 0.0  ;;  %v4743_v59 = vadd.f32 %v8672_v0, %v4704_v17  ;;  %v4709_v37 = vadd.f32 %v6067_v39, %v4239_v23  ;;  %v4607_v2 = vpop.f32.mrf.mxu0  ;;  %v9102_v23 = vld [vmem:[#allocation2_spill] sm:$0xff] }
 0x1f8   : > { %4937 = vst.msk [vmem:[%s8692_s15 + $0x18] sm:$0xf] %vm4930_vm8, %v5604_v8  ;;  %v4237_v50 = vadd.f32 %v4134_v33, %v3511_v38  ;;  %v6034_v1 = vpop.f32.mrf.mxu1  ;;  %v3521_v17 = vadd.f32 %v8596_v20, %v3162_v57  ;;  %v9104_v33 = vld [vmem:[#allocation13_spill] sm:$0xff] }
 0x1f9   : > { %4935 = vst.msk [vmem:[%s8692_s15 + $0x10] sm:$0xf] %vm4930_vm8, %v5602_v22  ;;  %v5605_v53 = vpack.c.bf16 %v4777_v62, %v4777_v62  ;;  %v4775_v41 = vmax.f32 %v4743_v59, 0.0  ;;  %v4748_v45 = vadd.f32 %v8672_v0, %v4709_v37  ;;  %v4240_v24 = vadd.f32 %v6034_v1, %v3514_v34  ;;  %v6071_v6 = vpop.f32.mrf.mxu0  ;;  %v9112_v57 = vld [vmem:[#allocation17_spill] sm:$0xff] }
 0x1fa   : > { %v4707_v55 = vadd.f32 %v4604_v36, %v4237_v50  ;;  %v4137_v51 = vpop.f32.mrf.mxu1  ;;  %v3160_v36 = vadd.f32 %v8606_v3, %v8496_v9  ;;  %v9105_v50 = vld [vmem:[#allocation15_spill] sm:$0xff] }
 0x1fb   : > { %4938 = vst.msk [vmem:[%s8692_s15 + $0x1c] sm:$0xf] %vm4930_vm8, %v5605_v53  ;;  %v5603_v12 = vpack.c.bf16 %v4775_v41, %v4775_v41  ;;  %v4780_v52 = vmax.f32 %v4748_v45, 0.0  ;;  %v4710_v60 = vadd.f32 %v6068_v54, %v4240_v24  ;;  %v4238_v43 = vadd.f32 %v4137_v51, %v3512_v21  ;;  %v4620_v30 = vpop.f32.mrf.mxu0  ;;  %v9103_v54 = vld [vmem:[#allocation20_spill] sm:$0xff]  ;;  %v9106_v53 = vld [vmem:[#allocation14_spill] sm:$0xff]  ;;  %v9108_v24 = vld [vmem:[#allocation19_spill] sm:$0xff] }
 0x1fc   : > { %v4746_v19 = vadd.f32 %v8672_v0, %v4707_v55  ;;  %v6037_v7 = vpop.f32.mrf.mxu1  ;;  %v3163_v38 = vadd.f32 %v9103_v54, %v9102_v23  ;;  %v3519_v22 = vadd.f32 %v9104_v33, %v3160_v36  ;;  %v9107_v41 = vld [vmem:[#allocation24_spill] sm:$0xff] }
 0x1fd   : > { %4936 = vst.msk [vmem:[%s8692_s15 + $0x14] sm:$0xf] %vm4930_vm8, %v5603_v12  ;;  %v5608_v39 = vpack.c.bf16 %v4780_v52, %v4780_v52  ;;  %v4749_v61 = vadd.f32 %v8672_v0, %v4710_v60  ;;  %v4708_v58 = vadd.f32 %v4607_v2, %v4238_v43  ;;  %v4243_v15 = vadd.f32 %v6037_v7, %v3517_v26  ;;  %v6072_v10 = vpop.f32.mrf.mxu0 }
 0x1fe   : > { %v4778_v56 = vmax.f32 %v4746_v19, 0.0  ;;  %v4150_v42 = vpop.f32.mrf.mxu1  ;;  %v3522_v1 = vadd.f32 %v9105_v50, %v3163_v38  ;;  %v3161_v45 = vadd.f32 %v9107_v41, %v9106_v53  ;;  %v9122_v50 = vld [vmem:[#allocation31_spill] sm:$0xff]  ;;  %v9123_v53 = vld [vmem:[#allocation25_spill] sm:$0xff] }
 0x1ff   : > { %4941 = vst.msk [vmem:[%s8692_s15 + $0x28] sm:$0xf] %vm4930_vm8, %v5608_v39  ;;  %v4781_v16 = vmax.f32 %v4749_v61, 0.0  ;;  %v4747_v11 = vadd.f32 %v8672_v0, %v4708_v58  ;;  %v4713_v32 = vadd.f32 %v6071_v6, %v4243_v15  ;;  %v4241_v14 = vadd.f32 %v4150_v42, %v3515_v40  ;;  %v4623_v5 = vpop.f32.mrf.mxu0  ;;  %v9109_v6 = vld [vmem:[#allocation8_spill] sm:$0xff]  ;;  %v9110_v40 = vld [vmem:[#allocation9_spill] sm:$0xff]  ;;  %v9113_v42 = vld [vmem:[#allocation22_spill] sm:$0xff] }
 0x200   : > { %v5606_v29 = vpack.c.bf16 %v4778_v56, %v4778_v56  ;;  %v6038_v44 = vpop.f32.mrf.mxu1  ;;  %v3166_v26 = vadd.f32 %v9109_v6, %v9108_v24  ;;  %v3164_v27 = vadd.f32 %v9111_v35, %v9110_v40  ;;  %v3520_v56 = vadd.f32 %v9112_v57, %v3161_v45  ;;  %v9124_v41 = vld [vmem:[#allocation33_spill] sm:$0xff] }
 0x201   : > { %v5609_v46 = vpack.c.bf16 %v4781_v16, %v4781_v16  ;;  %v4779_v31 = vmax.f32 %v4747_v11, 0.0  ;;  %v4752_v28 = vadd.f32 %v8672_v0, %v4713_v32  ;;  %v4711_v18 = vadd.f32 %v4620_v30, %v4241_v14  ;;  %v6075_v13 = vpop.f32.mrf.mxu0  ;;  %v9114_v11 = vld [vmem:[#allocation18_spill] sm:$0xff]  ;;  %v9115_v32 = vld [vmem:[#allocation27_spill] sm:$0xff] }
 0x202   : > { %4939 = vst.msk [vmem:[%s8692_s15 + $0x20] sm:$0xf] %vm4930_vm8, %v5606_v29  ;;  %v4244_v47 = vadd.f32 %v6038_v44, %v3518_v48  ;;  %v4153_v49 = vpop.f32.mrf.mxu1  ;;  %v3525_v16 = vadd.f32 %v9113_v42, %v3166_v26  ;;  %v3167_v14 = vadd.f32 %v9115_v32, %v9114_v11  ;;  %v3168_v45 = vadd.f32 %v9124_v41, %v9123_v53  ;;  %v9130_v42 = vld [vmem:[#allocation37_spill] sm:$0xff] }
 0x203   : > { %4942 = vst.msk [vmem:[%s8692_s15 + $0x2c] sm:$0xf] %vm4930_vm8, %v5609_v46  ;;  %v5607_v9 = vpack.c.bf16 %v4779_v31, %v4779_v31  ;;  %v4784_v3 = vmax.f32 %v4752_v28, 0.0  ;;  %v4750_v34 = vadd.f32 %v8672_v0, %v4711_v18  ;;  %v4242_v25 = vadd.f32 %v4153_v49, %v3516_v63  ;;  %v4636_v8 = vpop.f32.mrf.mxu0  ;;  %v9116_v31 = vld [vmem:[#allocation11_spill] sm:$0xff]  ;;  %v9117_v18 = vld [vmem:[#allocation21_spill] sm:$0xff] }
 0x204   : > { %v4714_v62 = vadd.f32 %v6072_v10, %v4244_v47  ;;  %v6041_v20 = vpop.f32.mrf.mxu1  ;;  %v3523_v28 = vadd.f32 %v9116_v31, %v3164_v27  ;;  %v9133_v31 = vld [vmem:[#allocation39_spill] sm:$0xff] }
 0x205   : > { %4940 = vst.msk [vmem:[%s8692_s15 + $0x24] sm:$0xf] %vm4930_vm8, %v5607_v9  ;;  %v5612_v59 = vpack.c.bf16 %v4784_v3, %v4784_v3  ;;  %v4782_v37 = vmax.f32 %v4750_v34, 0.0  ;;  %v4712_v2 = vadd.f32 %v4623_v5, %v4242_v25  ;;  %v4247_v21 = vadd.f32 %v6041_v20, %v3521_v17  ;;  %v6076_v4 = vpop.f32.mrf.mxu0  ;;  %v9119_v34 = vld [vmem:[#allocation16_spill] sm:$0xff] }
 0x206   : > { %v4753_v55 = vadd.f32 %v8672_v0, %v4714_v62  ;;  %v4166_v51 = vpop.f32.mrf.mxu1  ;;  %v3526_v25 = vadd.f32 %v9119_v34, %v3167_v14 }
 0x207   : > { %4945 = vst.msk [vmem:[%s8692_s15 + $0x38] sm:$0xf] %vm4930_vm8, %v5612_v59  ;;  %v5610_v12 = vpack.c.bf16 %v4782_v37, %v4782_v37  ;;  %v4751_v52 = vadd.f32 %v8672_v0, %v4712_v2  ;;  %v4717_v60 = vadd.f32 %v6075_v13, %v4247_v21  ;;  %v4245_v43 = vadd.f32 %v4166_v51, %v3519_v22  ;;  %v4639_v30 = vpop.f32.mrf.mxu0  ;;  %v9118_v13 = vld [vmem:[#allocation29_spill] sm:$0xff]  ;;  %v9120_v2 = vld [vmem:[#allocation26_spill] sm:$0xff] }
 0x208   : > { %v4785_v19 = vmax.f32 %v4753_v55, 0.0  ;;  %v6042_v7 = vpop.f32.mrf.mxu1  ;;  %v3165_v17 = vadd.f32 %v9118_v13, %v9117_v18 }
 0x209   : > { %4943 = vst.msk [vmem:[%s8692_s15 + $0x30] sm:$0xf] %vm4930_vm8, %v5610_v12  ;;  %v4783_v39 = vmax.f32 %v4751_v52, 0.0  ;;  %v4756_v61 = vadd.f32 %v8672_v0, %v4717_v60  ;;  %v4715_v58 = vadd.f32 %v4636_v8, %v4245_v43  ;;  %v4248_v15 = vadd.f32 %v6042_v7, %v3522_v1  ;;  %v9125_v60 = vld [vmem:[#allocation4_spill] sm:$0xff]  ;;  %v9126_v43 = vld [vmem:[#allocation35_spill] sm:$0xff] }
 0x20a   : > { %v6079_v10 = vpop.f32.mrf.mxu0  ;;  %v5613_v5 = vpack.c.bf16 %v4785_v19, %v4785_v19  ;;  %v4169_v48 = vpop.f32.mrf.mxu1  ;;  %v3524_v21 = vadd.f32 %v9120_v2, %v3165_v17  ;;  %v9137_v2 = vld [vmem:[#allocation41_spill] sm:$0xff] }
 0x20b   : > { %v5611_v63 = vpack.c.bf16 %v4783_v39, %v4783_v39  ;;  %v4788_v36 = vmax.f32 %v4756_v61, 0.0  ;;  %v4754_v29 = vadd.f32 %v8672_v0, %v4715_v58  ;;  %v4718_v44 = vadd.f32 %v6076_v4, %v4248_v15  ;;  %v9121_v4 = vld [vmem:[#allocation23_spill] sm:$0xff]  ;;  %v9127_v58 = vld [vmem:[#allocation28_spill] sm:$0xff] }
 0x20c   : > { %v4652_v46 = vpop.f32.mrf.mxu0  ;;  %4946 = vst.msk [vmem:[%s8692_s15 + $0x3c] sm:$0xf] %vm4930_vm8, %v5613_v5  ;;  %v4246_v23 = vadd.f32 %v4169_v48, %v3520_v56  ;;  %v6045_v54 = vpop.f32.mrf.mxu1  ;;  %v3170_v1 = vadd.f32 %v9122_v50, %v9121_v4  ;;  %v9129_v56 = vld [vmem:[#allocation3_spill] sm:$0xff] }
 0x20d   : > { %4944 = vst.msk [vmem:[%s8692_s15 + $0x34] sm:$0xf] %vm4930_vm8, %v5611_v63  ;;  %v5616_v38 = vpack.c.bf16 %v4788_v36, %v4788_v36  ;;  %v4786_v47 = vmax.f32 %v4754_v29, 0.0  ;;  %v4757_v49 = vadd.f32 %v8672_v0, %v4718_v44  ;;  %v4251_v9 = vadd.f32 %v6045_v54, %v3525_v16  ;;  %v9131_v29 = vld [vmem:[#allocation32_spill] sm:$0xff]  ;;  %v9138_v4 = vld [vmem:[#allocation7_spill] sm:$0xff] }
 0x20e   : > { %v6080_v3 = vpop.f32.mrf.mxu0  ;;  %v4716_v8 = vadd.f32 %v4639_v30, %v4246_v23  ;;  %v4182_v33 = vpop.f32.mrf.mxu1  ;;  %v3171_v30 = vadd.f32 %v9126_v43, %v9125_v60  ;;  %v3529_v15 = vadd.f32 %v9127_v58, %v3170_v1  ;;  %v3169_v16 = vadd.f32 %v9130_v42, %v9129_v56  ;;  %v9139_v50 = vld [vmem:[#allocation43_spill] sm:$0xff] }
 0x20f   : > { %4949 = vst.msk [vmem:[%s8692_s15 + $0x48] sm:$0xf] %vm4930_vm8, %v5616_v38  ;;  %v5614_v22 = vpack.c.bf16 %v4786_v47, %v4786_v47  ;;  %v4789_v62 = vmax.f32 %v4757_v49, 0.0  ;;  %v4721_v20 = vadd.f32 %v6079_v10, %v4251_v9  ;;  %v4249_v59 = vadd.f32 %v4182_v33, %v3523_v28  ;;  %v9128_v10 = vld [vmem:[#allocation30_spill] sm:$0xff] }
 0x210   : > { %v4655_v37 = vpop.f32.mrf.mxu0  ;;  %v4755_v24 = vadd.f32 %v8672_v0, %v4716_v8  ;;  %v6046_v6 = vpop.f32.mrf.mxu1  ;;  %v3527_v57 = vadd.f32 %v9128_v10, %v3168_v45  ;;  %v3530_v44 = vadd.f32 %v9131_v29, %v3171_v30  ;;  %v9134_v49 = vld [vmem:[#allocation34_spill] sm:$0xff]  ;;  %v3175_v1 = vadd.f32 %v9139_v50, %v9138_v4 }
 0x211   : > { %4947 = vst.msk [vmem:[%s8692_s15 + $0x40] sm:$0xf] %vm4930_vm8, %v5614_v22  ;;  %v5617_v26 = vpack.c.bf16 %v4789_v62, %v4789_v62  ;;  %v4760_v55 = vadd.f32 %v8672_v0, %v4721_v20  ;;  %v4719_v51 = vadd.f32 %v4652_v46, %v4249_v59  ;;  %v4252_v12 = vadd.f32 %v6046_v6, %v3526_v25  ;;  %v9132_v46 = vld [vmem:[#allocation6_spill] sm:$0xff]  ;;  %v9135_v20 = vld [vmem:[#allocation36_spill] sm:$0xff] }
 0x212   : > { %v6083_v52 = vpop.f32.mrf.mxu0  ;;  %v4787_v40 = vmax.f32 %v4755_v24, 0.0  ;;  %v4185_v35 = vpop.f32.mrf.mxu1  ;;  %v3174_v28 = vadd.f32 %v9133_v31, %v9132_v46  ;;  %v3528_v9 = vadd.f32 %v9134_v49, %v3169_v16  ;;  %v9144_v16 = vld [vmem:[#allocation42_spill] sm:$0xff] }
 0x213   : > { %4950 = vst.msk [vmem:[%s8692_s15 + $0x4c] sm:$0xf] %vm4930_vm8, %v5617_v26  ;;  %v4792_v27 = vmax.f32 %v4760_v55, 0.0  ;;  %v4758_v19 = vadd.f32 %v8672_v0, %v4719_v51  ;;  %v4722_v7 = vadd.f32 %v6080_v3, %v4252_v12  ;;  %v4250_v39 = vadd.f32 %v4185_v35, %v3524_v21  ;;  %v9140_v55 = vld [vmem:[#allocation10_spill] sm:$0xff]  ;;  %v9141_v51 = vld [vmem:[#allocation44_spill] sm:$0xff] }
 0x214   : > { %v4668_v61 = vpop.f32.mrf.mxu0  ;;  %v5615_v11 = vpack.c.bf16 %v4787_v40, %v4787_v40  ;;  %v6049_v32 = vpop.f32.mrf.mxu1  ;;  %v3533_v59 = vadd.f32 %v9135_v20, %v3174_v28  ;;  %v3173_v12 = vadd.f32 %v9141_v51, %v9140_v55 }
 0x215   : > { %v5620_v14 = vpack.c.bf16 %v4792_v27, %v4792_v27  ;;  %v4790_v5 = vmax.f32 %v4758_v19, 0.0  ;;  %v4761_v48 = vadd.f32 %v8672_v0, %v4722_v7  ;;  %v4720_v63 = vadd.f32 %v4655_v37, %v4250_v39  ;;  %v9136_v37 = vld [vmem:[#allocation5_spill] sm:$0xff]  ;;  %v9142_v19 = vld [vmem:[#allocation38_spill] sm:$0xff]  ;;  %v9143_v39 = vld [vmem:[#allocation40_spill] sm:$0xff] }
 0x216   : > { %v6084_v36 = vpop.f32.mrf.mxu0  ;;  %4948 = vst.msk [vmem:[%s8692_s15 + $0x44] sm:$0xf] %vm4930_vm8, %v5615_v11  ;;  %v4255_v18 = vadd.f32 %v6049_v32, %v3529_v15  ;;  %v4198_v13 = vpop.f32.mrf.mxu1  ;;  %v3172_v21 = vadd.f32 %v9137_v2, %v9136_v37  ;;  %v3532_v11 = vadd.f32 %v9144_v16, %v3173_v12 }
 0x217   : > { %4953 = vst.msk [vmem:[%s8692_s15 + $0x58] sm:$0xf] %vm4930_vm8, %v5620_v14  ;;  %v5618_v17 = vpack.c.bf16 %v4790_v5, %v4790_v5  ;;  %v4793_v23 = vmax.f32 %v4761_v48, 0.0  ;;  %v4759_v54 = vadd.f32 %v8672_v0, %v4720_v63  ;;  %v4253_v38 = vadd.f32 %v4198_v13, %v3527_v57 }
 0x218   : > { %v4671_v47 = vpop.f32.mrf.mxu0  ;;  %v4725_v3 = vadd.f32 %v6083_v52, %v4255_v18  ;;  %v6050_v34 = vpop.f32.mrf.mxu1  ;;  %v3531_v7 = vadd.f32 %v9142_v19, %v3172_v21 }
 0x219   : > { %4951 = vst.msk [vmem:[%s8692_s15 + $0x50] sm:$0xf] %vm4930_vm8, %v5618_v17  ;;  %v5621_v25 = vpack.c.bf16 %v4793_v23, %v4793_v23  ;;  %v4791_v8 = vmax.f32 %v4759_v54, 0.0  ;;  %v4723_v33 = vadd.f32 %v4668_v61, %v4253_v38  ;;  %v4256_v22 = vadd.f32 %v6050_v34, %v3530_v44 }
 0x21a   : > { %v6087_v62 = vpop.f32.mrf.mxu0  ;;  %v4764_v53 = vadd.f32 %v8672_v0, %v4725_v3  ;;  %v4201_v41 = vpop.f32.mrf.mxu1  ;;  %v3534_v61 = vadd.f32 %v9143_v39, %v3175_v1 }
 0x21b   : > { %4954 = vst.msk [vmem:[%s8692_s15 + $0x5c] sm:$0xf] %vm4930_vm8, %v5621_v25  ;;  %v5619_v45 = vpack.c.bf16 %v4791_v8, %v4791_v8  ;;  %v4762_v24 = vadd.f32 %v8672_v0, %v4723_v33  ;;  %v4726_v6 = vadd.f32 %v6084_v36, %v4256_v22  ;;  %v4254_v26 = vadd.f32 %v4201_v41, %v3528_v9 }
 0x21c   : > { %v4796_v52 = vmax.f32 %v4764_v53, 0.0  ;;  %v6053_v60 = vpop.f32.mrf.mxu1  ;;  %v4684_v43 = vpop.f32.mrf.mxu0 }
 0x21d   : > { %4952 = vst.msk [vmem:[%s8692_s15 + $0x54] sm:$0xf] %vm4930_vm8, %v5619_v45  ;;  %v4794_v30 = vmax.f32 %v4762_v24, 0.0  ;;  %v4765_v40 = vadd.f32 %v8672_v0, %v4726_v6  ;;  %v4724_v35 = vadd.f32 %v4671_v47, %v4254_v26  ;;  %v4259_v27 = vadd.f32 %v6053_v60, %v3533_v59 }
 0x21e   : > { %v5624_v58 = vpack.c.bf16 %v4796_v52, %v4796_v52  ;;  %v4214_v15 = vpop.f32.mrf.mxu1  ;;  %v6088_v5 = vpop.f32.mrf.mxu0 }
 0x21f   : > { %v5622_v10 = vpack.c.bf16 %v4794_v30, %v4794_v30  ;;  %v4797_v57 = vmax.f32 %v4765_v40, 0.0  ;;  %v4763_v56 = vadd.f32 %v8672_v0, %v4724_v35  ;;  %v4729_v42 = vadd.f32 %v6087_v62, %v4259_v27 }
 0x220   : > { %4957 = vst.msk [vmem:[%s8692_s15 + $0x68] sm:$0xf] %vm4930_vm8, %v5624_v58  ;;  %v4257_v32 = vadd.f32 %v4214_v15, %v3531_v7  ;;  %v6054_v14 = vpop.f32.mrf.mxu1  ;;  %v4687_v23 = vpop.f32.mrf.mxu0 }
 0x221   : > { %4955 = vst.msk [vmem:[%s8692_s15 + $0x60] sm:$0xf] %vm4930_vm8, %v5622_v10  ;;  %v5625_v48 = vpack.c.bf16 %v4797_v57, %v4797_v57  ;;  %v4795_v63 = vmax.f32 %v4763_v56, 0.0  ;;  %v4768_v36 = vadd.f32 %v8672_v0, %v4729_v42  ;;  %v4260_v29 = vadd.f32 %v6054_v14, %v3534_v61 }
 0x222   : > { %v4727_v44 = vadd.f32 %v4684_v43, %v4257_v32  ;;  %v4217_v46 = vpop.f32.mrf.mxu1 }
 0x223   : > { %4958 = vst.msk [vmem:[%s8692_s15 + $0x6c] sm:$0xf] %vm4930_vm8, %v5625_v48  ;;  %v5623_v31 = vpack.c.bf16 %v4795_v63, %v4795_v63  ;;  %v4800_v28 = vmax.f32 %v4768_v36, 0.0  ;;  %v4730_v18 = vadd.f32 %v6088_v5, %v4260_v29  ;;  %v4258_v13 = vadd.f32 %v4217_v46, %v3532_v11 }
 0x224   : > { %v4766_v17 = vadd.f32 %v8672_v0, %v4727_v44 }
 0x225   : > { %4956 = vst.msk [vmem:[%s8692_s15 + $0x64] sm:$0xf] %vm4930_vm8, %v5623_v31  ;;  %v5628_v54 = vpack.c.bf16 %v4800_v28, %v4800_v28  ;;  %v4769_v38 = vadd.f32 %v8672_v0, %v4730_v18  ;;  %v4728_v47 = vadd.f32 %v4687_v23, %v4258_v13 }
 0x226   : > { %v4798_v49 = vmax.f32 %v4766_v17, 0.0 }
 0x227   : > { %4961 = vst.msk [vmem:[%s8692_s15 + $0x78] sm:$0xf] %vm4930_vm8, %v5628_v54  ;;  %v4801_v9 = vmax.f32 %v4769_v38, 0.0  ;;  %v4767_v3 = vadd.f32 %v8672_v0, %v4728_v47 }
 0x228   : > { %v5626_v34 = vpack.c.bf16 %v4798_v49, %v4798_v49 }
 0x229   : > { %v5629_v25 = vpack.c.bf16 %v4801_v9, %v4801_v9  ;;  %v4799_v8 = vmax.f32 %v4767_v3, 0.0 }
 0x22a   : > { %4959 = vst.msk [vmem:[%s8692_s15 + $0x70] sm:$0xf] %vm4930_vm8, %v5626_v34 }
 0x22b   : > { %4962 = vst.msk [vmem:[%s8692_s15 + $0x7c] sm:$0xf] %vm4930_vm8, %v5629_v25  ;;  %v5627_v33 = vpack.c.bf16 %v4799_v8, %v4799_v8 }
 0x22d   : > { %4960 = vst.msk [vmem:[%s8692_s15 + $0x74] sm:$0xf] %vm4930_vm8, %v5627_v33 }
 0x22e PF: > { %s13_s12 = sadd.s32 1, %s6166_s12  }
 0x22f   : > { %p10_p4 = scmp.ge.s32.totalorder %s13_s12, 4  }
 0x231   :  { %12 = sbr.rel (!%p10_p4) target bundleno = 1 (0x1), region = 72 }

</bundles_post_ra>
